<compile_context>
chip_gen: v7x
topology: tpu7x:2x2x1
jax: 0.10.0
libtpu: 0.0.40
codegen_flags: <defaults>
</compile_context>

<pallas_src>
import functools

import jax
import jax.numpy as jnp
from jax.experimental import pallas as pl
from jax.experimental.pallas import tpu as pltpu


def _round_up(n: int, m: int) -> int:
    return ((n + m - 1) // m) * m


def _leaky_relu(h, slope=0.2):
    return jnp.where(h > 0, h, slope * h)


# ----------------------------------------------------------------------------- kernel
def vae_forward_kernel(
    # streamed per batch tile
    x_ref, eps_ref,
    # encoder params (resident in VMEM across grid steps)
    ew0, eb0, ew1, eb1, ew2, eb2, ew3, eb3,
    # decoder params
    dw0, db0, dw1, db1, dw2, db2, dw3, db3,
    # outputs
    mu_ref, log_sigma_ref, z_ref, px_ref,
    *, l_pad: int,
):
    f32 = jnp.float32
    bf16 = jnp.bfloat16

    def dense(h, w_ref, b_ref):
        # bf16 operands feed the MXU; accumulate and add bias in f32.
        return jnp.dot(h.astype(bf16), w_ref[...], preferred_element_type=f32) + b_ref[...]

    # -------- encoder: (Linear -> LeakyReLU -> Dropout[=id]) x3 -> Linear --------
    h = _leaky_relu(dense(x_ref[...], ew0, eb0))
    h = _leaky_relu(dense(h, ew1, eb1))
    h = _leaky_relu(dense(h, ew2, eb2))
    h_x = dense(h, ew3, eb3)                 # (TILE_B, 2*l_pad), f32

    # chunk(2, dim=-1): mu / log_sigma halves live at 128-aligned lane offsets.
    mu = h_x[:, :l_pad]
    log_sigma = h_x[:, l_pad:]
    sigma = jnp.exp(log_sigma)

    # reparameterization: z = mu + sigma * eps, eps ~ N(0, I)   (f32 element-wise)
    z = mu + sigma * eps_ref[...]

    # -------- decoder: (Linear -> LeakyReLU -> Dropout[=id]) x3 -> Linear -> Sigmoid
    d = _leaky_relu(dense(z, dw0, db0))
    d = _leaky_relu(dense(d, dw1, db1))
    d = _leaky_relu(dense(d, dw2, db2))
    px = jax.nn.sigmoid(dense(d, dw3, db3))

    mu_ref[...] = mu
    log_sigma_ref[...] = log_sigma
    z_ref[...] = z
    px_ref[...] = px


# ------------------------------------------------------------------------ param prep
def init_linear(key, fan_in, fan_out):
    """PyTorch nn.Linear-style init (uniform +/- 1/sqrt(fan_in)); weight stored [in, out]."""
    kw, kb = jax.random.split(key)
    bound = 1.0 / (fan_in ** 0.5)
    w = jax.random.uniform(kw, (fan_in, fan_out), jnp.float32, -bound, bound)
    b = jax.random.uniform(kb, (1, fan_out), jnp.float32, -bound, bound)
    return w, b


def init_vae_params(key, batch_cols, latent_features):
    enc_dims = [(batch_cols, 256), (256, 128), (128, 64), (64, 2 * latent_features)]
    dec_dims = [(latent_features, 64), (64, 128), (128, 256), (256, batch_cols)]
    keys = jax.random.split(key, len(enc_dims) + len(dec_dims))
    encoder = [init_linear(k, i, o) for k, (i, o) in zip(keys[:4], enc_dims)]
    decoder = [init_linear(k, i, o) for k, (i, o) in zip(keys[4:], dec_dims)]
    return {"encoder": encoder, "decoder": decoder}


def prepare_padded_params(params, obs_features, latent_features):
    """Zero-pad parameters to lane-dense (multiple-of-128) shapes.

    Weights -> bf16 (MXU feed), biases -> f32 (added post-accumulation).
    The encoder head [64, 2L] is re-laid-out so the mu / log_sigma halves each start
    at a 128-aligned lane offset, making the in-kernel chunk a free slice.
    """
    F, L = obs_features, latent_features
    F_pad = _round_up(F, 128)
    L_pad = _round_up(L, 128)

    def pad_w(w, rows, cols):
        return jnp.pad(w, ((0, rows - w.shape[0]), (0, cols - w.shape[1]))).astype(jnp.bfloat16)

    def pad_b(b, cols):
        b = b.reshape(1, -1).astype(jnp.float32)
        return jnp.pad(b, ((0, 0), (0, cols - b.shape[1])))

    (ew0, eb0), (ew1, eb1), (ew2, eb2), (ew3, eb3) = params["encoder"]
    (dw0, db0), (dw1, db1), (dw2, db2), (dw3, db3) = params["decoder"]

    # Encoder head: split into mu / log_sigma halves at 128-aligned offsets.
    ew3_p = jnp.zeros((64, 2 * L_pad), jnp.float32)
    ew3_p = ew3_p.at[:, :L].set(ew3[:, :L]).at[:, L_pad:L_pad + L].set(ew3[:, L:])
    eb3_p = jnp.zeros((1, 2 * L_pad), jnp.float32)
    eb3_p = eb3_p.at[0, :L].set(eb3[0, :L]).at[0, L_pad:L_pad + L].set(eb3[0, L:])

    flat = [
        pad_w(ew0, F_pad, 256), pad_b(eb0, 256),
        pad_w(ew1, 256, 128),   pad_b(eb1, 128),
        pad_w(ew2, 128, 64),    pad_b(eb2, 64),
        ew3_p.astype(jnp.bfloat16), eb3_p,
        pad_w(dw0, L_pad, 64),  pad_b(db0, 64),
        pad_w(dw1, 64, 128),    pad_b(db1, 128),
        pad_w(dw2, 128, 256),   pad_b(db2, 256),
        pad_w(dw3, 256, F_pad), pad_b(db3, F_pad),
    ]
    return flat, F_pad, L_pad


# ---------------------------------------------------------------------------- wrapper
def vae_forward(x, eps, params, latent_features, *, tile_b=128):
    """Fused VAE forward. Returns dict with qz mu/log_sigma, z, px_probs and the
    (zero) prior params, mirroring the PyTorch module's forward output."""
    B, F = x.shape
    L = latent_features

    flat_params, F_pad, L_pad = prepare_padded_params(params, F, L)

    B_pad = _round_up(B, tile_b)
    x_p = jnp.pad(x, ((0, B_pad - B), (0, F_pad - F))).astype(jnp.bfloat16)
    eps_p = jnp.pad(eps, ((0, B_pad - B), (0, L_pad - L))).astype(jnp.float32)

    grid = (B_pad // tile_b,)
    row_blk = lambda i: (i, 0)       # streamed over batch tiles
    const_blk = lambda i: (0, 0)     # weights resident across grid steps

    in_specs = [
        pl.BlockSpec((tile_b, F_pad), row_blk),
        pl.BlockSpec((tile_b, L_pad), row_blk),
    ] + [pl.BlockSpec(p.shape, const_blk) for p in flat_params]

    out_specs = (
        pl.BlockSpec((tile_b, L_pad), row_blk),
        pl.BlockSpec((tile_b, L_pad), row_blk),
        pl.BlockSpec((tile_b, L_pad), row_blk),
        pl.BlockSpec((tile_b, F_pad), row_blk),
    )
    out_shape = (
        jax.ShapeDtypeStruct((B_pad, L_pad), jnp.float32),  # mu
        jax.ShapeDtypeStruct((B_pad, L_pad), jnp.float32),  # log_sigma
        jax.ShapeDtypeStruct((B_pad, L_pad), jnp.float32),  # z
        jax.ShapeDtypeStruct((B_pad, F_pad), jnp.float32),  # px (post-sigmoid)
    )

    flops = 2 * B_pad * (F_pad * 256 + 256 * 128 + 128 * 64 + 64 * 2 * L_pad
                         + L_pad * 64 + 64 * 128 + 128 * 256 + 256 * F_pad)
    transcendentals = B_pad * (L_pad + F_pad)  # exp + sigmoid
    param_bytes = sum(int(p.size) * p.dtype.itemsize for p in flat_params)
    out_bytes = 4 * (3 * B_pad * L_pad + B_pad * F_pad)
    bytes_accessed = int(x_p.size) * 2 + int(eps_p.size) * 4 + param_bytes + out_bytes

    mu, log_sigma, z, px = pl.pallas_call(
        functools.partial(vae_forward_kernel, l_pad=L_pad),
        grid=grid,
        in_specs=in_specs,
        out_specs=out_specs,
        out_shape=out_shape,
        compiler_params=pltpu.CompilerParams(dimension_semantics=("parallel",)),
        cost_estimate=pl.CostEstimate(
            flops=flops, transcendentals=transcendentals, bytes_accessed=bytes_accessed),
    )(x_p, eps_p, *flat_params)

    # Strip the lane / batch padding.
    mu = mu[:B, :L]
    log_sigma = log_sigma[:B, :L]
    z = z[:B, :L]
    px = px[:B, :F]

    # prior p(z) = N(0, I): mu = 0, log_sigma = 0 (the `prior_params` buffer).
    prior_mu = jnp.zeros((B, L), jnp.float32)
    prior_log_sigma = jnp.zeros((B, L), jnp.float32)

    return {
        # NOTE: this is sigmoid(decoder(z)) — the PyTorch module calls it px_logits
        # but then feeds it to Bernoulli(logits=...); values here are probabilities.
        "px_probs": px,
        "qz_mu": mu,
        "qz_log_sigma": log_sigma,
        "pz_mu": prior_mu,
        "pz_log_sigma": prior_log_sigma,
        "z": z,
    }


# -------------------------------------------------------------------- pure-JAX reference
def vae_reference(x, eps, params, latent_features):
    """Reference forward using the same padded bf16 params (for correctness check)."""
    B, F = x.shape
    L = latent_features
    flat, F_pad, L_pad = prepare_padded_params(params, F, L)
    (ew0, eb0, ew1, eb1, ew2, eb2, ew3, eb3,
     dw0, db0, dw1, db1, dw2, db2, dw3, db3) = flat

    x_p = jnp.pad(x, ((0, 0), (0, F_pad - F))).astype(jnp.bfloat16)
    eps_p = jnp.pad(eps, ((0, 0), (0, L_pad - L))).astype(jnp.float32)

    bf16, f32 = jnp.bfloat16, jnp.float32

    def dense(h, w, b):
        return jnp.dot(h.astype(bf16), w, preferred_element_type=f32) + b

    h = _leaky_relu(dense(x_p, ew0, eb0))
    h = _leaky_relu(dense(h, ew1, eb1))
    h = _leaky_relu(dense(h, ew2, eb2))
    h_x = dense(h, ew3, eb3)
    mu, log_sigma = h_x[:, :L_pad], h_x[:, L_pad:]
    z = mu + jnp.exp(log_sigma) * eps_p
    d = _leaky_relu(dense(z, dw0, db0))
    d = _leaky_relu(dense(d, dw1, db1))
    d = _leaky_relu(dense(d, dw2, db2))
    px = jax.nn.sigmoid(dense(d, dw3, db3))
    return {
        "qz_mu": mu[:, :L],
        "qz_log_sigma": log_sigma[:, :L],
        "z": z[:, :L],
        "px_probs": px[:, :F],
    }


if __name__ == "__main__":
    # Small shapes consistent with the module: latent + batch_cols tiny, batch big
    # enough to exercise the batch grid (2 tiles of 128 rows).
    B = 256
    BATCH_COLS = 32
    LATENT = 16

    root = jax.random.PRNGKey(0)
    k_params, k_x, k_eps = jax.random.split(root, 3)

    params = init_vae_params(k_params, BATCH_COLS, LATENT)
    x = jax.random.uniform(k_x, (B, BATCH_COLS), jnp.float32)   # Bernoulli obs -> [0,1]
    eps = jax.random.normal(k_eps, (B, LATENT), jnp.float32)

    out = vae_forward(x, eps, params, LATENT, tile_b=128)
    jax.block_until_ready(out)

    # Shape sanity (mirrors PyTorch forward semantics).
    assert out["px_probs"].shape == (B, BATCH_COLS)
    assert out["qz_mu"].shape == (B, LATENT)
    assert out["qz_log_sigma"].shape == (B, LATENT)
    assert out["z"].shape == (B, LATENT)

    # Numerical check against a pure-JAX reference using the same bf16 params.
    ref = vae_reference(x, eps, params, LATENT)
    for key in ("qz_mu", "qz_log_sigma", "z", "px_probs"):
        assert jnp.allclose(out[key], ref[key], atol=2e-3, rtol=2e-3), key

    print("KERNEL_OK")
</pallas_src>

<mosaic_0001>
module attributes {stable_mosaic.version = 11 : i64} {
  func.func @vae_forward_kernel(%arg0: i32, %arg1: memref<128x128xbf16, #tpu.memory_space<vmem>>, %arg2: memref<128x128xf32, #tpu.memory_space<vmem>>, %arg3: memref<128x256xbf16, #tpu.memory_space<vmem>>, %arg4: memref<1x256xf32, #tpu.memory_space<vmem>>, %arg5: memref<256x128xbf16, #tpu.memory_space<vmem>>, %arg6: memref<1x128xf32, #tpu.memory_space<vmem>>, %arg7: memref<128x64xbf16, #tpu.memory_space<vmem>>, %arg8: memref<1x64xf32, #tpu.memory_space<vmem>>, %arg9: memref<64x256xbf16, #tpu.memory_space<vmem>>, %arg10: memref<1x256xf32, #tpu.memory_space<vmem>>, %arg11: memref<128x64xbf16, #tpu.memory_space<vmem>>, %arg12: memref<1x64xf32, #tpu.memory_space<vmem>>, %arg13: memref<64x128xbf16, #tpu.memory_space<vmem>>, %arg14: memref<1x128xf32, #tpu.memory_space<vmem>>, %arg15: memref<128x256xbf16, #tpu.memory_space<vmem>>, %arg16: memref<1x256xf32, #tpu.memory_space<vmem>>, %arg17: memref<256x128xbf16, #tpu.memory_space<vmem>>, %arg18: memref<1x128xf32, #tpu.memory_space<vmem>>, %arg19: memref<128x128xf32, #tpu.memory_space<vmem>>, %arg20: memref<128x128xf32, #tpu.memory_space<vmem>>, %arg21: memref<128x128xf32, #tpu.memory_space<vmem>>, %arg22: memref<128x128xf32, #tpu.memory_space<vmem>>) attributes {dimension_semantics = [#tpu.dimension_semantics<parallel>], iteration_bounds = array<i64: 2>, scalar_prefetch = 0 : i64, scratch_operands = 0 : i64, tpu.core_type = #tpu.core_type<tc>, window_params = [{transform_indices = @transform_0, window_bounds = array<i64: 128, 128>}, {transform_indices = @transform_1, window_bounds = array<i64: 128, 128>}, {pipeline_mode = #tpu.pipeline_mode<synchronous>, transform_indices = @transform_2, window_bounds = array<i64: 128, 256>}, {pipeline_mode = #tpu.pipeline_mode<synchronous>, transform_indices = @transform_3, window_bounds = array<i64: 1, 256>}, {pipeline_mode = #tpu.pipeline_mode<synchronous>, transform_indices = @transform_4, window_bounds = array<i64: 256, 128>}, {pipeline_mode = #tpu.pipeline_mode<synchronous>, transform_indices = @transform_5, window_bounds = array<i64: 1, 128>}, {pipeline_mode = #tpu.pipeline_mode<synchronous>, transform_indices = @transform_6, window_bounds = array<i64: 128, 64>}, {pipeline_mode = #tpu.pipeline_mode<synchronous>, transform_indices = @transform_7, window_bounds = array<i64: 1, 64>}, {pipeline_mode = #tpu.pipeline_mode<synchronous>, transform_indices = @transform_8, window_bounds = array<i64: 64, 256>}, {pipeline_mode = #tpu.pipeline_mode<synchronous>, transform_indices = @transform_9, window_bounds = array<i64: 1, 256>}, {pipeline_mode = #tpu.pipeline_mode<synchronous>, transform_indices = @transform_10, window_bounds = array<i64: 128, 64>}, {pipeline_mode = #tpu.pipeline_mode<synchronous>, transform_indices = @transform_11, window_bounds = array<i64: 1, 64>}, {pipeline_mode = #tpu.pipeline_mode<synchronous>, transform_indices = @transform_12, window_bounds = array<i64: 64, 128>}, {pipeline_mode = #tpu.pipeline_mode<synchronous>, transform_indices = @transform_13, window_bounds = array<i64: 1, 128>}, {pipeline_mode = #tpu.pipeline_mode<synchronous>, transform_indices = @transform_14, window_bounds = array<i64: 128, 256>}, {pipeline_mode = #tpu.pipeline_mode<synchronous>, transform_indices = @transform_15, window_bounds = array<i64: 1, 256>}, {pipeline_mode = #tpu.pipeline_mode<synchronous>, transform_indices = @transform_16, window_bounds = array<i64: 256, 128>}, {pipeline_mode = #tpu.pipeline_mode<synchronous>, transform_indices = @transform_17, window_bounds = array<i64: 1, 128>}, {transform_indices = @transform_18, window_bounds = array<i64: 128, 128>}, {transform_indices = @transform_19, window_bounds = array<i64: 128, 128>}, {transform_indices = @transform_20, window_bounds = array<i64: 128, 128>}, {transform_indices = @transform_21, window_bounds = array<i64: 128, 128>}]} {
    %c0 = arith.constant 0 : index
    %c0_0 = arith.constant 0 : index
    %0 = vector.load %arg1[%c0, %c0_0] : memref<128x128xbf16, #tpu.memory_space<vmem>>, vector<128x128xbf16>
    %c0_1 = arith.constant 0 : index
    %c0_2 = arith.constant 0 : index
    %1 = vector.load %arg3[%c0_1, %c0_2] : memref<128x256xbf16, #tpu.memory_space<vmem>>, vector<128x256xbf16>
    %cst = arith.constant dense<0.000000e+00> : vector<128x256xf32>
    %2 = tpu.matmul %0, %1, %cst {dimension_numbers = #tpu.dot_dimension_numbers<[1], [0], [0], [1], [0, 0, 1, 1], [], []>} : vector<128x128xbf16>, vector<128x256xbf16>, vector<128x256xf32> -> vector<128x256xf32>
    %c0_3 = arith.constant 0 : index
    %c0_4 = arith.constant 0 : index
    %3 = vector.load %arg4[%c0_3, %c0_4] : memref<1x256xf32, #tpu.memory_space<vmem>>, vector<1x256xf32>
    %4 = vector.broadcast %3 : vector<1x256xf32> to vector<128x256xf32>
    %5 = arith.addf %2, %4 : vector<128x256xf32>
    %cst_5 = arith.constant 0.000000e+00 : f32
    %6 = vector.broadcast %cst_5 : f32 to vector<128x256xf32>
    %7 = arith.cmpf ogt, %5, %6 : vector<128x256xf32>
    %cst_6 = arith.constant 2.000000e-01 : f32
    %8 = vector.broadcast %cst_6 : f32 to vector<128x256xf32>
    %9 = arith.mulf %8, %5 : vector<128x256xf32>
    %10 = arith.select %7, %5, %9 : vector<128x256xi1>, vector<128x256xf32>
    %11 = arith.truncf %10 : vector<128x256xf32> to vector<128x256xbf16>
    %c0_7 = arith.constant 0 : index
    %c0_8 = arith.constant 0 : index
    %12 = vector.load %arg5[%c0_7, %c0_8] : memref<256x128xbf16, #tpu.memory_space<vmem>>, vector<256x128xbf16>
    %cst_9 = arith.constant dense<0.000000e+00> : vector<128x128xf32>
    %13 = tpu.matmul %11, %12, %cst_9 {dimension_numbers = #tpu.dot_dimension_numbers<[1], [0], [0], [1], [0, 0, 1, 1], [], []>} : vector<128x256xbf16>, vector<256x128xbf16>, vector<128x128xf32> -> vector<128x128xf32>
    %c0_10 = arith.constant 0 : index
    %c0_11 = arith.constant 0 : index
    %14 = vector.load %arg6[%c0_10, %c0_11] : memref<1x128xf32, #tpu.memory_space<vmem>>, vector<1x128xf32>
    %15 = vector.broadcast %14 : vector<1x128xf32> to vector<128x128xf32>
    %16 = arith.addf %13, %15 : vector<128x128xf32>
    %cst_12 = arith.constant 0.000000e+00 : f32
    %17 = vector.broadcast %cst_12 : f32 to vector<128x128xf32>
    %18 = arith.cmpf ogt, %16, %17 : vector<128x128xf32>
    %cst_13 = arith.constant 2.000000e-01 : f32
    %19 = vector.broadcast %cst_13 : f32 to vector<128x128xf32>
    %20 = arith.mulf %19, %16 : vector<128x128xf32>
    %21 = arith.select %18, %16, %20 : vector<128x128xi1>, vector<128x128xf32>
    %22 = arith.truncf %21 : vector<128x128xf32> to vector<128x128xbf16>
    %c0_14 = arith.constant 0 : index
    %c0_15 = arith.constant 0 : index
    %23 = vector.load %arg7[%c0_14, %c0_15] : memref<128x64xbf16, #tpu.memory_space<vmem>>, vector<128x64xbf16>
    %cst_16 = arith.constant dense<0.000000e+00> : vector<128x64xf32>
    %24 = tpu.matmul %22, %23, %cst_16 {dimension_numbers = #tpu.dot_dimension_numbers<[1], [0], [0], [1], [0, 0, 1, 1], [], []>} : vector<128x128xbf16>, vector<128x64xbf16>, vector<128x64xf32> -> vector<128x64xf32>
    %c0_17 = arith.constant 0 : index
    %c0_18 = arith.constant 0 : index
    %25 = vector.load %arg8[%c0_17, %c0_18] : memref<1x64xf32, #tpu.memory_space<vmem>>, vector<1x64xf32>
    %26 = vector.broadcast %25 : vector<1x64xf32> to vector<128x64xf32>
    %27 = arith.addf %24, %26 : vector<128x64xf32>
    %cst_19 = arith.constant 0.000000e+00 : f32
    %28 = vector.broadcast %cst_19 : f32 to vector<128x64xf32>
    %29 = arith.cmpf ogt, %27, %28 : vector<128x64xf32>
    %cst_20 = arith.constant 2.000000e-01 : f32
    %30 = vector.broadcast %cst_20 : f32 to vector<128x64xf32>
    %31 = arith.mulf %30, %27 : vector<128x64xf32>
    %32 = arith.select %29, %27, %31 : vector<128x64xi1>, vector<128x64xf32>
    %33 = arith.truncf %32 : vector<128x64xf32> to vector<128x64xbf16>
    %c0_21 = arith.constant 0 : index
    %c0_22 = arith.constant 0 : index
    %34 = vector.load %arg9[%c0_21, %c0_22] : memref<64x256xbf16, #tpu.memory_space<vmem>>, vector<64x256xbf16>
    %cst_23 = arith.constant dense<0.000000e+00> : vector<128x256xf32>
    %35 = tpu.matmul %33, %34, %cst_23 {dimension_numbers = #tpu.dot_dimension_numbers<[1], [0], [0], [1], [0, 0, 1, 1], [], []>} : vector<128x64xbf16>, vector<64x256xbf16>, vector<128x256xf32> -> vector<128x256xf32>
    %c0_24 = arith.constant 0 : index
    %c0_25 = arith.constant 0 : index
    %36 = vector.load %arg10[%c0_24, %c0_25] : memref<1x256xf32, #tpu.memory_space<vmem>>, vector<1x256xf32>
    %37 = vector.broadcast %36 : vector<1x256xf32> to vector<128x256xf32>
    %38 = arith.addf %35, %37 : vector<128x256xf32>
    %39 = vector.extract_strided_slice %38 {offsets = [0, 0], sizes = [128, 128], strides = [1, 1]} : vector<128x256xf32> to vector<128x128xf32>
    %40 = vector.extract_strided_slice %38 {offsets = [0, 128], sizes = [128, 128], strides = [1, 1]} : vector<128x256xf32> to vector<128x128xf32>
    %41 = math.exp %40 : vector<128x128xf32>
    %c0_26 = arith.constant 0 : index
    %c0_27 = arith.constant 0 : index
    %42 = vector.load %arg2[%c0_26, %c0_27] : memref<128x128xf32, #tpu.memory_space<vmem>>, vector<128x128xf32>
    %43 = arith.mulf %41, %42 : vector<128x128xf32>
    %44 = arith.addf %39, %43 : vector<128x128xf32>
    %45 = arith.truncf %44 : vector<128x128xf32> to vector<128x128xbf16>
    %c0_28 = arith.constant 0 : index
    %c0_29 = arith.constant 0 : index
    %46 = vector.load %arg11[%c0_28, %c0_29] : memref<128x64xbf16, #tpu.memory_space<vmem>>, vector<128x64xbf16>
    %cst_30 = arith.constant dense<0.000000e+00> : vector<128x64xf32>
    %47 = tpu.matmul %45, %46, %cst_30 {dimension_numbers = #tpu.dot_dimension_numbers<[1], [0], [0], [1], [0, 0, 1, 1], [], []>} : vector<128x128xbf16>, vector<128x64xbf16>, vector<128x64xf32> -> vector<128x64xf32>
    %c0_31 = arith.constant 0 : index
    %c0_32 = arith.constant 0 : index
    %48 = vector.load %arg12[%c0_31, %c0_32] : memref<1x64xf32, #tpu.memory_space<vmem>>, vector<1x64xf32>
    %49 = vector.broadcast %48 : vector<1x64xf32> to vector<128x64xf32>
    %50 = arith.addf %47, %49 : vector<128x64xf32>
    %cst_33 = arith.constant 0.000000e+00 : f32
    %51 = vector.broadcast %cst_33 : f32 to vector<128x64xf32>
    %52 = arith.cmpf ogt, %50, %51 : vector<128x64xf32>
    %cst_34 = arith.constant 2.000000e-01 : f32
    %53 = vector.broadcast %cst_34 : f32 to vector<128x64xf32>
    %54 = arith.mulf %53, %50 : vector<128x64xf32>
    %55 = arith.select %52, %50, %54 : vector<128x64xi1>, vector<128x64xf32>
    %56 = arith.truncf %55 : vector<128x64xf32> to vector<128x64xbf16>
    %c0_35 = arith.constant 0 : index
    %c0_36 = arith.constant 0 : index
    %57 = vector.load %arg13[%c0_35, %c0_36] : memref<64x128xbf16, #tpu.memory_space<vmem>>, vector<64x128xbf16>
    %cst_37 = arith.constant dense<0.000000e+00> : vector<128x128xf32>
    %58 = tpu.matmul %56, %57, %cst_37 {dimension_numbers = #tpu.dot_dimension_numbers<[1], [0], [0], [1], [0, 0, 1, 1], [], []>} : vector<128x64xbf16>, vector<64x128xbf16>, vector<128x128xf32> -> vector<128x128xf32>
    %c0_38 = arith.constant 0 : index
    %c0_39 = arith.constant 0 : index
    %59 = vector.load %arg14[%c0_38, %c0_39] : memref<1x128xf32, #tpu.memory_space<vmem>>, vector<1x128xf32>
    %60 = vector.broadcast %59 : vector<1x128xf32> to vector<128x128xf32>
    %61 = arith.addf %58, %60 : vector<128x128xf32>
    %cst_40 = arith.constant 0.000000e+00 : f32
    %62 = vector.broadcast %cst_40 : f32 to vector<128x128xf32>
    %63 = arith.cmpf ogt, %61, %62 : vector<128x128xf32>
    %cst_41 = arith.constant 2.000000e-01 : f32
    %64 = vector.broadcast %cst_41 : f32 to vector<128x128xf32>
    %65 = arith.mulf %64, %61 : vector<128x128xf32>
    %66 = arith.select %63, %61, %65 : vector<128x128xi1>, vector<128x128xf32>
    %67 = arith.truncf %66 : vector<128x128xf32> to vector<128x128xbf16>
    %c0_42 = arith.constant 0 : index
    %c0_43 = arith.constant 0 : index
    %68 = vector.load %arg15[%c0_42, %c0_43] : memref<128x256xbf16, #tpu.memory_space<vmem>>, vector<128x256xbf16>
    %cst_44 = arith.constant dense<0.000000e+00> : vector<128x256xf32>
    %69 = tpu.matmul %67, %68, %cst_44 {dimension_numbers = #tpu.dot_dimension_numbers<[1], [0], [0], [1], [0, 0, 1, 1], [], []>} : vector<128x128xbf16>, vector<128x256xbf16>, vector<128x256xf32> -> vector<128x256xf32>
    %c0_45 = arith.constant 0 : index
    %c0_46 = arith.constant 0 : index
    %70 = vector.load %arg16[%c0_45, %c0_46] : memref<1x256xf32, #tpu.memory_space<vmem>>, vector<1x256xf32>
    %71 = vector.broadcast %70 : vector<1x256xf32> to vector<128x256xf32>
    %72 = arith.addf %69, %71 : vector<128x256xf32>
    %cst_47 = arith.constant 0.000000e+00 : f32
    %73 = vector.broadcast %cst_47 : f32 to vector<128x256xf32>
    %74 = arith.cmpf ogt, %72, %73 : vector<128x256xf32>
    %cst_48 = arith.constant 2.000000e-01 : f32
    %75 = vector.broadcast %cst_48 : f32 to vector<128x256xf32>
    %76 = arith.mulf %75, %72 : vector<128x256xf32>
    %77 = arith.select %74, %72, %76 : vector<128x256xi1>, vector<128x256xf32>
    %78 = arith.truncf %77 : vector<128x256xf32> to vector<128x256xbf16>
    %c0_49 = arith.constant 0 : index
    %c0_50 = arith.constant 0 : index
    %79 = vector.load %arg17[%c0_49, %c0_50] : memref<256x128xbf16, #tpu.memory_space<vmem>>, vector<256x128xbf16>
    %cst_51 = arith.constant dense<0.000000e+00> : vector<128x128xf32>
    %80 = tpu.matmul %78, %79, %cst_51 {dimension_numbers = #tpu.dot_dimension_numbers<[1], [0], [0], [1], [0, 0, 1, 1], [], []>} : vector<128x256xbf16>, vector<256x128xbf16>, vector<128x128xf32> -> vector<128x128xf32>
    %c0_52 = arith.constant 0 : index
    %c0_53 = arith.constant 0 : index
    %81 = vector.load %arg18[%c0_52, %c0_53] : memref<1x128xf32, #tpu.memory_space<vmem>>, vector<1x128xf32>
    %82 = vector.broadcast %81 : vector<1x128xf32> to vector<128x128xf32>
    %83 = arith.addf %80, %82 : vector<128x128xf32>
    %84 = arith.negf %83 : vector<128x128xf32>
    %85 = math.exp %84 : vector<128x128xf32>
    %cst_54 = arith.constant 1.000000e+00 : f32
    %86 = vector.broadcast %cst_54 : f32 to vector<128x128xf32>
    %87 = arith.addf %86, %85 : vector<128x128xf32>
    %88 = arith.divf %86, %87 : vector<128x128xf32>
    %c0_55 = arith.constant 0 : index
    %c0_56 = arith.constant 0 : index
    %89 = vector.load %arg19[%c0_55, %c0_56] : memref<128x128xf32, #tpu.memory_space<vmem>>, vector<128x128xf32>
    tpu.vector_store %arg19[%c0_55, %c0_56], %39 {strides = array<i32>} : memref<128x128xf32, #tpu.memory_space<vmem>>, vector<128x128xf32>,
    %c0_57 = arith.constant 0 : index
    %c0_58 = arith.constant 0 : index
    %90 = vector.load %arg20[%c0_57, %c0_58] : memref<128x128xf32, #tpu.memory_space<vmem>>, vector<128x128xf32>
    tpu.vector_store %arg20[%c0_57, %c0_58], %40 {strides = array<i32>} : memref<128x128xf32, #tpu.memory_space<vmem>>, vector<128x128xf32>,
    %c0_59 = arith.constant 0 : index
    %c0_60 = arith.constant 0 : index
    %91 = vector.load %arg21[%c0_59, %c0_60] : memref<128x128xf32, #tpu.memory_space<vmem>>, vector<128x128xf32>
    tpu.vector_store %arg21[%c0_59, %c0_60], %44 {strides = array<i32>} : memref<128x128xf32, #tpu.memory_space<vmem>>, vector<128x128xf32>,
    %c0_61 = arith.constant 0 : index
    %c0_62 = arith.constant 0 : index
    %92 = vector.load %arg22[%c0_61, %c0_62] : memref<128x128xf32, #tpu.memory_space<vmem>>, vector<128x128xf32>
    tpu.vector_store %arg22[%c0_61, %c0_62], %88 {strides = array<i32>} : memref<128x128xf32, #tpu.memory_space<vmem>>, vector<128x128xf32>,
    return
  }
  func.func @transform_0(%arg0: i32) -> (i32, i32) {
    %c0_i32 = arith.constant 0 : i32
    %c0_i32_0 = arith.constant 0 : i32
    return %arg0, %c0_i32 : i32, i32
  }
  func.func @transform_1(%arg0: i32) -> (i32, i32) {
    %c0_i32 = arith.constant 0 : i32
    %c0_i32_0 = arith.constant 0 : i32
    return %arg0, %c0_i32 : i32, i32
  }
  func.func @transform_2(%arg0: i32) -> (i32, i32) {
    %c0_i32 = arith.constant 0 : i32
    %c0_i32_0 = arith.constant 0 : i32
    %c0_i32_1 = arith.constant 0 : i32
    return %c0_i32, %c0_i32_0 : i32, i32
  }
  func.func @transform_3(%arg0: i32) -> (i32, i32) {
    %c0_i32 = arith.constant 0 : i32
    %c0_i32_0 = arith.constant 0 : i32
    %c0_i32_1 = arith.constant 0 : i32
    return %c0_i32, %c0_i32_0 : i32, i32
  }
  func.func @transform_4(%arg0: i32) -> (i32, i32) {
    %c0_i32 = arith.constant 0 : i32
    %c0_i32_0 = arith.constant 0 : i32
    %c0_i32_1 = arith.constant 0 : i32
    return %c0_i32, %c0_i32_0 : i32, i32
  }
  func.func @transform_5(%arg0: i32) -> (i32, i32) {
    %c0_i32 = arith.constant 0 : i32
    %c0_i32_0 = arith.constant 0 : i32
    %c0_i32_1 = arith.constant 0 : i32
    return %c0_i32, %c0_i32_0 : i32, i32
  }
  func.func @transform_6(%arg0: i32) -> (i32, i32) {
    %c0_i32 = arith.constant 0 : i32
    %c0_i32_0 = arith.constant 0 : i32
    %c0_i32_1 = arith.constant 0 : i32
    return %c0_i32, %c0_i32_0 : i32, i32
  }
  func.func @transform_7(%arg0: i32) -> (i32, i32) {
    %c0_i32 = arith.constant 0 : i32
    %c0_i32_0 = arith.constant 0 : i32
    %c0_i32_1 = arith.constant 0 : i32
    return %c0_i32, %c0_i32_0 : i32, i32
  }
  func.func @transform_8(%arg0: i32) -> (i32, i32) {
    %c0_i32 = arith.constant 0 : i32
    %c0_i32_0 = arith.constant 0 : i32
    %c0_i32_1 = arith.constant 0 : i32
    return %c0_i32, %c0_i32_0 : i32, i32
  }
  func.func @transform_9(%arg0: i32) -> (i32, i32) {
    %c0_i32 = arith.constant 0 : i32
    %c0_i32_0 = arith.constant 0 : i32
    %c0_i32_1 = arith.constant 0 : i32
    return %c0_i32, %c0_i32_0 : i32, i32
  }
  func.func @transform_10(%arg0: i32) -> (i32, i32) {
    %c0_i32 = arith.constant 0 : i32
    %c0_i32_0 = arith.constant 0 : i32
    %c0_i32_1 = arith.constant 0 : i32
    return %c0_i32, %c0_i32_0 : i32, i32
  }
  func.func @transform_11(%arg0: i32) -> (i32, i32) {
    %c0_i32 = arith.constant 0 : i32
    %c0_i32_0 = arith.constant 0 : i32
    %c0_i32_1 = arith.constant 0 : i32
    return %c0_i32, %c0_i32_0 : i32, i32
  }
  func.func @transform_12(%arg0: i32) -> (i32, i32) {
    %c0_i32 = arith.constant 0 : i32
    %c0_i32_0 = arith.constant 0 : i32
    %c0_i32_1 = arith.constant 0 : i32
    return %c0_i32, %c0_i32_0 : i32, i32
  }
  func.func @transform_13(%arg0: i32) -> (i32, i32) {
    %c0_i32 = arith.constant 0 : i32
    %c0_i32_0 = arith.constant 0 : i32
    %c0_i32_1 = arith.constant 0 : i32
    return %c0_i32, %c0_i32_0 : i32, i32
  }
  func.func @transform_14(%arg0: i32) -> (i32, i32) {
    %c0_i32 = arith.constant 0 : i32
    %c0_i32_0 = arith.constant 0 : i32
    %c0_i32_1 = arith.constant 0 : i32
    return %c0_i32, %c0_i32_0 : i32, i32
  }
  func.func @transform_15(%arg0: i32) -> (i32, i32) {
    %c0_i32 = arith.constant 0 : i32
    %c0_i32_0 = arith.constant 0 : i32
    %c0_i32_1 = arith.constant 0 : i32
    return %c0_i32, %c0_i32_0 : i32, i32
  }
  func.func @transform_16(%arg0: i32) -> (i32, i32) {
    %c0_i32 = arith.constant 0 : i32
    %c0_i32_0 = arith.constant 0 : i32
    %c0_i32_1 = arith.constant 0 : i32
    return %c0_i32, %c0_i32_0 : i32, i32
  }
  func.func @transform_17(%arg0: i32) -> (i32, i32) {
    %c0_i32 = arith.constant 0 : i32
    %c0_i32_0 = arith.constant 0 : i32
    %c0_i32_1 = arith.constant 0 : i32
    return %c0_i32, %c0_i32_0 : i32, i32
  }
  func.func @transform_18(%arg0: i32) -> (i32, i32) {
    %c0_i32 = arith.constant 0 : i32
    %c0_i32_0 = arith.constant 0 : i32
    return %arg0, %c0_i32 : i32, i32
  }
  func.func @transform_19(%arg0: i32) -> (i32, i32) {
    %c0_i32 = arith.constant 0 : i32
    %c0_i32_0 = arith.constant 0 : i32
    return %arg0, %c0_i32 : i32, i32
  }
  func.func @transform_20(%arg0: i32) -> (i32, i32) {
    %c0_i32 = arith.constant 0 : i32
    %c0_i32_0 = arith.constant 0 : i32
    return %arg0, %c0_i32 : i32, i32
  }
  func.func @transform_21(%arg0: i32) -> (i32, i32) {
    %c0_i32 = arith.constant 0 : i32
    %c0_i32_0 = arith.constant 0 : i32
    return %arg0, %c0_i32 : i32, i32
  }
}

</mosaic_0001>

<bundles_post_ra>
// kernel: tpu_custom_call.1
= control target key start
LH: loop header
LB: loop body
LE: loop exit
PB: predicated region body
PF: predicated region fallthrough
CT: control target
= control target key end

     0   :  { %s5905_s0 = inlined_call_operand.vmem [shape: bf16[256,128], index: 0, kind: input, shape index: {}]   ;;  %s5906_s1 = inlined_call_operand.hbm [shape: f32[256,128], index: 1, kind: input, shape index: {}]   ;;  %s5907_s2 = inlined_call_operand.hbm [shape: bf16[128,256], index: 2, kind: input, shape index: {}]   ;;  %s5908_s3 = inlined_call_operand.vmem [shape: f32[1,256], index: 3, kind: input, shape index: {}]   ;;  %s5909_s4 = inlined_call_operand.hbm [shape: bf16[256,128], index: 4, kind: input, shape index: {}]   ;;  %s5910_s5 = inlined_call_operand.hbm [shape: f32[1,128], index: 5, kind: input, shape index: {}]   ;;  %s5911_s6 = inlined_call_operand.vmem [shape: bf16[128,64], index: 6, kind: input, shape index: {}]   ;;  %s5912_s7 = inlined_call_operand.hbm [shape: f32[1,64], index: 7, kind: input, shape index: {}]   ;;  %s5913_s8 = inlined_call_operand.vmem [shape: bf16[64,256], index: 8, kind: input, shape index: {}]   ;;  %s5914_s9 = inlined_call_operand.hbm [shape: f32[1,256], index: 9, kind: input, shape index: {}]   ;;  %s5915_s10 = inlined_call_operand.vmem [shape: bf16[128,64], index: 10, kind: input, shape index: {}]   ;;  %s5916_s11 = inlined_call_operand.vmem [shape: f32[1,64], index: 11, kind: input, shape index: {}]   ;;  %s5917_s12 = inlined_call_operand.hbm [shape: bf16[64,128], index: 12, kind: input, shape index: {}]   ;;  %s5918_s13 = inlined_call_operand.vmem [shape: f32[1,128], index: 13, kind: input, shape index: {}]   ;;  %s5919_s14 = inlined_call_operand.hbm [shape: bf16[128,256], index: 14, kind: input, shape index: {}]   ;;  %s5920_s15 = inlined_call_operand.vmem [shape: f32[1,256], index: 15, kind: input, shape index: {}]   ;;  %s5921_s16 = inlined_call_operand.hbm [shape: bf16[256,128], index: 16, kind: input, shape index: {}]   ;;  %s5922_s17 = inlined_call_operand.vmem [shape: f32[1,128], index: 17, kind: input, shape index: {}]   ;;  %s5923_s18 = inlined_call_operand.hbm [shape: f32[256,128], index: 18, kind: output, shape index: {0}]   ;;  %s5924_s19 = inlined_call_operand.hbm [shape: f32[256,128], index: 19, kind: output, shape index: {1}]   ;;  %s5925_s20 = inlined_call_operand.hbm [shape: f32[256,128], index: 20, kind: output, shape index: {2}]   ;;  %s5926_s21 = inlined_call_operand.hbm [shape: f32[256,128], index: 21, kind: output, shape index: {3}]  }
   0x1   :  { %5947 = sst [smem:[#allocation31_spill]] %s5905_s0 }
   0x2   :  { %5948 = sst [smem:[#allocation32_spill]] %s5906_s1 }
   0x3   :  { %5949 = sst [smem:[#allocation33_spill]] %s5907_s2 }
   0x4   :  { %5950 = sst [smem:[#allocation34_spill]] %s5908_s3 }
   0x5   :  { %5951 = sst [smem:[#allocation35_spill]] %s5909_s4 }
   0x6   :  { %5952 = sst [smem:[#allocation36_spill]] %s5910_s5 }
   0x7   :  { %5953 = sst [smem:[#allocation37_spill]] %s5911_s6 }
   0x8   :  { %5954 = sst [smem:[#allocation38_spill]] %s5912_s7 }
   0x9   :  { %5955 = sst [smem:[#allocation39_spill]] %s5913_s8 }
   0xa   :  { %5956 = sst [smem:[#allocation40_spill]] %s5914_s9 }
   0xb   :  { %5957 = sst [smem:[#allocation41_spill]] %s5915_s10 }
   0xc   :  { %5958 = sst [smem:[#allocation42_spill]] %s5916_s11 }
   0xd   :  { %5959 = sst [smem:[#allocation43_spill]] %s5917_s12 }
   0xe   :  { %5960 = sst [smem:[#allocation44_spill]] %s5918_s13 }
   0xf   :  { %5961 = sst [smem:[#allocation45_spill]] %s5919_s14 }
  0x10   :  { %5962 = sst [smem:[#allocation46_spill]] %s5920_s15 }
  0x11   :  { %5963 = sst [smem:[#allocation47_spill]] %s5921_s16 }
  0x12   :  { %5964 = sst [smem:[#allocation48_spill]] %s5922_s17 }
  0x13   :  { %5965 = sst [smem:[#allocation49_spill]] %s5923_s18 }
  0x14   :  { %5966 = sst [smem:[#allocation50_spill]] %s5924_s19 }
  0x15   :  { %5967 = sst [smem:[#allocation51_spill]] %s5925_s20 }
  0x16   :  { %5968 = sst [smem:[#allocation52_spill]] %s5926_s21 }
  0x17   :  { %27 = vsyncpa [#allocation3], 0 }
  0x18   :  { %29 = vsyncpa [#allocation3 + $0x1], 0 }
  0x19   :  { %30 = vsyncpa [#allocation6], 0 }
  0x1a   :  { %31 = vsyncpa [#allocation9], 0 }
  0x1b   :  { %32 = vsyncpa [#allocation12], 0 }
  0x1c   :  { %33 = vsyncpa [#allocation15], 0 }
  0x1d   :  { %34 = vsyncpa [#allocation4], 0 }
  0x1e   :  { %36 = vsyncpa [#allocation4 + $0x1], 0 }
  0x1f   :  { %37 = vsyncpa [#allocation19], 0 }
  0x20   :  { %39 = vsyncpa [#allocation19 + $0x1], 0 }
  0x21   :  { %40 = vsyncpa [#allocation22], 0 }
  0x22   :  { %42 = vsyncpa [#allocation22 + $0x1], 0  ;;  %s4919_s2 = smov 0   ;;  %s4921_s25 = smov 0  }
  0x23   :  { %s4923_s26 = smov 0   ;;  %s4925_s27 = smov 0  }
  0x24 LB: > { %s4789_s3 = smov [#allocation5]   ;;  %s4940_s29 = sadd.s32 4294967295, %s4787_s27   ;;  %s4787_s27 = sphi %s4925_s27, %s6019_s27   ;;  %s4783_s26 = sphi %s4923_s26, %s6018_s26   ;;  %s4779_s25 = sphi %s4921_s25, %s6017_s25   ;;  %s4775_s2 = sphi %s4919_s2, %s6016_s2  }
  0x25   : > { %s557_s28 = sshll.u32 %s4789_s3, 4  ;;  %p3533_p0 = scmp.ge.s32.totalorder %s4787_s27, 1  ;;  %s4945_s28 = int_to_ptr.vmem [resolvable:$true] %s557_s28 }
  0x26   : > { %p5938_p1 = scmp.eq.s32.totalorder %s4940_s29, 0  ;;  %p545_p2 = scmp.lt.s32.totalorder %s4787_s27, 3 }
  0x27   : > { %s4790_s4 = smov [#allocation8]   ;;  %s4791_s22 = smov [#allocation11]  }
  0x28   : > { %p4947_p3 = pnand %p3533_p0, %p545_p2  ;;  %s587_s30 = sshll.u32 %s4790_s4, 4  ;;  %s4960_s30 = int_to_ptr.vmem [resolvable:$true] %s587_s30 }
  0x29   : > { %s615_s23 = sshll.u32 %s4791_s22, 4  ;;  %s5971_s3 = sld [smem:[#allocation33_spill]]  ;;  %s4962_s23 = int_to_ptr.vmem [resolvable:$true] %s615_s23 }
  0x2a   : > { %s5969_s0 = scalar_select %p4947_p3, 1, 0 }
  0x2b   : > { %p4036_p5 = pneg %p4947_p3 }
  0x2d   : > { %p4956_p6 = pnand %p4036_p5, %p5938_p1 }
  0x2f   : > { %s4359_s21 = scalar_lea.hbm %s5971_s3, 2048  ;;  %p4972_p8 = pneg %p4956_p6 }
  0x30   : > { %p4360_p7 = scmp.ne.s32.totalorder %s5971_s3, %s4359_s21  ;;  %p4366_p11 = scmp.lt.u32.totalorder %s4359_s21, %s5971_s3 }
  0x32   : > { %p4362_p9 = pnand %p4972_p8, %p4360_p7 }
  0x34   : > { %p4363_p10 = pneg %p4362_p9 }
  0x36   : > { %p4368_p12 = pnand %p4366_p11, %p4363_p10 }
  0x38   : > { %4371 = shalt.err (!%p4368_p12)
}
  0x39   : > { %s4372_s17 = scalar_lea.vmem %s4945_s28, 2048  ;;  %p4380_p5 = scmp.lt.s32.totalorder %s4945_s28, %s4945_s28 }
  0x3a   : > { %p4373_p13 = scmp.ne.s32.totalorder %s4945_s28, %s4372_s17  ;;  %p4381_p4 = scmp.lt.s32.totalorder %s4372_s17, %s4372_s17 }
  0x3c   : > { %p4375_p0 = pnand %p4373_p13, %p4972_p8  ;;  %p4382_p7 = por %p4381_p4, %p4380_p5 }
  0x3e   : > { %p4376_p2 = pneg %p4375_p0 }
  0x40   : > { %p4383_p9 = pnand %p4382_p7, %p4376_p2 }
  0x42   : > { %4386 = shalt.err (!%p4383_p9)
}
  0x43   : > { %s5936_s18 = smov 128   ;;  %s5940_s20 = smov 8  }
  0x44   : > { %4039 = dma.hbm_to_vmem [thread:$0]  (!%p4956_p6), %s5971_s3, 2048, %s4945_s28, [#allocation6], %s5936_s18, %s5936_s18, %s5940_s20  }
  0x45   : > { %s5973_s19 = sld [smem:[#allocation36_spill]] }
  0x4b   : > { %s4387_s17 = scalar_lea.hbm %s5973_s19, 16 }
  0x4c   : > { %p4388_p4 = scmp.ne.s32.totalorder %s5973_s19, %s4387_s17  ;;  %p4394_p12 = scmp.lt.u32.totalorder %s4387_s17, %s5973_s19 }
  0x4e   : > { %p4390_p10 = pnand %p4388_p4, %p4972_p8 }
  0x50   : > { %p4391_p11 = pneg %p4390_p10 }
  0x52   : > { %p4396_p13 = pnand %p4394_p12, %p4391_p11 }
  0x54   : > { %4399 = shalt.err (!%p4396_p13)
}
  0x55   : > { %s4400_s28 = scalar_lea.vmem %s4960_s30, 16  ;;  %s4407_s13 = scalar_lea.vmem %s4960_s30, 32 }
  0x56   : > { %p4401_p0 = scmp.ne.s32.totalorder %s4960_s30, %s4400_s28  ;;  %p4408_p7 = scmp.lt.s32.totalorder %s4960_s30, %s4960_s30 }
  0x57   : > { %p4409_p9 = scmp.lt.s32.totalorder %s4407_s13, %s4400_s28 }
  0x58   : > { %p4403_p2 = pnand %p4401_p0, %p4972_p8 }
  0x59   : > { %p4410_p4 = por %p4409_p9, %p4408_p7 }
  0x5a   : > { %p4404_p5 = pneg %p4403_p2 }
  0x5c   : > { %p4411_p10 = pnand %p4410_p4, %p4404_p5 }
  0x5e   : > { %4414 = shalt.err (!%p4411_p10)
}
  0x5f   : > { %4045 = dma.hbm_to_vmem [thread:$0]  (!%p4956_p6), %s5973_s19, 16, %s4960_s30, [#allocation9]  }
  0x60   : > { %s5974_s9 = sld [smem:[#allocation40_spill]] }
  0x66   : > { %s4415_s1 = scalar_lea.hbm %s5974_s9, 32 }
  0x67   : > { %p4416_p11 = scmp.ne.s32.totalorder %s5974_s9, %s4415_s1  ;;  %p4422_p0 = scmp.lt.u32.totalorder %s4415_s1, %s5974_s9 }
  0x69   : > { %p4418_p12 = pnand %p4416_p11, %p4972_p8 }
  0x6b   : > { %p4419_p13 = pneg %p4418_p12 }
  0x6d   : > { %p4424_p2 = pnand %p4422_p0, %p4419_p13 }
  0x6f   : > { %4427 = shalt.err (!%p4424_p2)
}
  0x70   : > { %s4428_s30 = scalar_lea.vmem %s4962_s23, 32  ;;  %p4436_p4 = scmp.lt.s32.totalorder %s4962_s23, %s4962_s23 }
  0x71   : > { %p4429_p5 = scmp.ne.s32.totalorder %s4962_s23, %s4428_s30  ;;  %p4437_p10 = scmp.lt.s32.totalorder %s4428_s30, %s4428_s30 }
  0x73   : > { %p4431_p7 = pnand %p4429_p5, %p4972_p8  ;;  %p4438_p11 = por %p4437_p10, %p4436_p4 }
  0x75   : > { %p4432_p9 = pneg %p4431_p7 }
  0x77   : > { %p4439_p12 = pnand %p4438_p11, %p4432_p9 }
  0x79   : > { %4442 = shalt.err (!%p4439_p12)
}
  0x7a   : > { %4051 = dma.hbm_to_vmem [thread:$0]  (!%p4956_p6), %s5974_s9, 32, %s4962_s23, [#allocation12]  }
  0x7b   : > { %s4794_s11 = smov [#allocation14]   ;;  %s4795_s21 = smov [#allocation7]  }
  0x7c   : > { %s647_s15 = sshll.u32 %s4794_s11, 4  ;;  %s573_s1 = sshll.u32 %s4795_s21, 4  ;;  %s648_s15 = int_to_ptr.vmem [resolvable:$true] %s647_s15  ;;  %s574_s1 = int_to_ptr.vmem [resolvable:$true] %s573_s1 }
  0x7d   : > { %s5975_s14 = sld [smem:[#allocation45_spill]] }
  0x83   : > { %s4443_s17 = scalar_lea.hbm %s5975_s14, 2048 }
  0x84   : > { %p4444_p13 = scmp.ne.s32.totalorder %s5975_s14, %s4443_s17  ;;  %p4450_p5 = scmp.lt.u32.totalorder %s4443_s17, %s5975_s14 }
  0x86   : > { %p4446_p0 = pnand %p4444_p13, %p4972_p8 }
  0x88   : > { %p4447_p2 = pneg %p4446_p0 }
  0x8a   : > { %p4452_p7 = pnand %p4450_p5, %p4447_p2 }
  0x8c   : > { %4455 = shalt.err (!%p4452_p7)
}
  0x8d   : > { %s4456_s23 = scalar_lea.vmem %s648_s15, 2048  ;;  %p4464_p11 = scmp.lt.s32.totalorder %s648_s15, %s648_s15 }
  0x8e   : > { %p4457_p9 = scmp.ne.s32.totalorder %s648_s15, %s4456_s23  ;;  %p4465_p12 = scmp.lt.s32.totalorder %s4456_s23, %s4456_s23 }
  0x90   : > { %p4459_p4 = pnand %p4457_p9, %p4972_p8  ;;  %p4466_p1 = por %p4465_p12, %p4464_p11 }
  0x92   : > { %p4460_p10 = pneg %p4459_p4 }
  0x94   : > { %p4467_p3 = pnand %p4466_p1, %p4460_p10 }
  0x96   : > { %4470 = shalt.err (!%p4467_p3)
}
  0x97   : > { %s5976_s10 = smov 128   ;;  %s5977_s22 = sld [smem:[#allocation35_spill]] }
  0x98   : > { %4057 = dma.hbm_to_vmem [thread:$0]  (!%p4956_p6), %s5975_s14, 2048, %s648_s15, [#allocation15], %s5976_s10, %s5976_s10, %s5940_s20  }
  0x9d   : > { %s4471_s17 = scalar_lea.hbm %s5977_s22, 2048 }
  0x9e   : > { %p4472_p1 = scmp.ne.s32.totalorder %s5977_s22, %s4471_s17  ;;  %p4478_p0 = scmp.lt.u32.totalorder %s4471_s17, %s5977_s22 }
  0xa0   : > { %p4474_p3 = pnand %p4472_p1, %p4972_p8 }
  0xa2   : > { %p4475_p13 = pneg %p4474_p3 }
  0xa4   : > { %p4480_p2 = pnand %p4478_p0, %p4475_p13 }
  0xa6   : > { %4483 = shalt.err (!%p4480_p2)
}
  0xa7   : > { %s4484_s18 = scalar_lea.vmem %s574_s1, 2048  ;;  %p4492_p4 = scmp.lt.s32.totalorder %s574_s1, %s574_s1 }
  0xa8   : > { %p4485_p5 = scmp.ne.s32.totalorder %s574_s1, %s4484_s18  ;;  %p4493_p10 = scmp.lt.s32.totalorder %s4484_s18, %s4484_s18 }
  0xaa   : > { %p4487_p7 = pnand %p4485_p5, %p4972_p8  ;;  %p4494_p11 = por %p4493_p10, %p4492_p4 }
  0xac   : > { %p4488_p9 = pneg %p4487_p7 }
  0xae   : > { %p4495_p12 = pnand %p4494_p11, %p4488_p9 }
  0xb0   : > { %4498 = shalt.err (!%p4495_p12)
}
  0xb1   : > { %s4796_s15 = smov 64   ;;  %s4797_s11 = smov 4  }
  0xb2   : > { %4042 = dma.hbm_to_vmem [thread:$0]  (!%p4956_p6), %s5977_s22, 2048, %s574_s1, [#allocation6], %s4796_s15, %s4796_s15, %s4797_s11  }
  0xb3   : > { %s4798_s17 = smov [#allocation10]   ;;  %s4799_s30 = smov [#allocation13]  }
  0xb4   : > { %s601_s28 = sshll.u32 %s4798_s17, 4  ;;  %s631_s13 = sshll.u32 %s4799_s30, 4  ;;  %s602_s28 = int_to_ptr.vmem [resolvable:$true] %s601_s28  ;;  %s632_s13 = int_to_ptr.vmem [resolvable:$true] %s631_s13 }
  0xb5   : > { %s5978_s7 = sld [smem:[#allocation38_spill]] }
  0xbb   : > { %s4499_s20 = scalar_lea.hbm %s5978_s7, 16 }
  0xbc   : > { %p4500_p1 = scmp.ne.s32.totalorder %s5978_s7, %s4499_s20  ;;  %p4506_p0 = scmp.lt.u32.totalorder %s4499_s20, %s5978_s7 }
  0xbe   : > { %p4502_p3 = pnand %p4500_p1, %p4972_p8 }
  0xc0   : > { %p4503_p13 = pneg %p4502_p3 }
  0xc2   : > { %p4508_p2 = pnand %p4506_p0, %p4503_p13 }
  0xc4   : > { %4511 = shalt.err (!%p4508_p2)
}
  0xc5   : > { %s4512_s1 = scalar_lea.vmem %s602_s28, 16  ;;  %s4519_s21 = scalar_lea.vmem %s602_s28, 32 }
  0xc6   : > { %p4513_p5 = scmp.ne.s32.totalorder %s602_s28, %s4512_s1  ;;  %p4520_p4 = scmp.lt.s32.totalorder %s602_s28, %s602_s28 }
  0xc7   : > { %p4521_p10 = scmp.lt.s32.totalorder %s4519_s21, %s4512_s1 }
  0xc8   : > { %p4515_p7 = pnand %p4513_p5, %p4972_p8 }
  0xc9   : > { %p4522_p11 = por %p4521_p10, %p4520_p4 }
  0xca   : > { %p4516_p9 = pneg %p4515_p7 }
  0xcc   : > { %p4523_p12 = pnand %p4522_p11, %p4516_p9 }
  0xce   : > { %4526 = shalt.err (!%p4523_p12)
}
  0xcf   : > { %4048 = dma.hbm_to_vmem [thread:$0]  (!%p4956_p6), %s5978_s7, 16, %s602_s28, [#allocation9]  }
  0xd0   : > { %s5979_s12 = sld [smem:[#allocation43_spill]] }
  0xd6   : > { %s4527_s20 = scalar_lea.hbm %s5979_s12, 512 }
  0xd7   : > { %p4528_p1 = scmp.ne.s32.totalorder %s5979_s12, %s4527_s20  ;;  %p4534_p0 = scmp.lt.u32.totalorder %s4527_s20, %s5979_s12 }
  0xd9   : > { %p4530_p3 = pnand %p4528_p1, %p4972_p8 }
  0xdb   : > { %p4531_p13 = pneg %p4530_p3 }
  0xdd   : > { %p4536_p2 = pnand %p4534_p0, %p4531_p13 }
  0xdf   : > { %4539 = shalt.err (!%p4536_p2)
}
  0xe0   : > { %s4540_s18 = scalar_lea.vmem %s632_s13, 512  ;;  %p4548_p4 = scmp.lt.s32.totalorder %s632_s13, %s632_s13 }
  0xe1   : > { %p4541_p5 = scmp.ne.s32.totalorder %s632_s13, %s4540_s18  ;;  %p4549_p10 = scmp.lt.s32.totalorder %s4540_s18, %s4540_s18 }
  0xe3   : > { %p4543_p7 = pnand %p4541_p5, %p4972_p8  ;;  %p4550_p11 = por %p4549_p10, %p4548_p4 }
  0xe5   : > { %p4544_p9 = pneg %p4543_p7 }
  0xe7   : > { %p4551_p12 = pnand %p4550_p11, %p4544_p9 }
  0xe9   : > { %4554 = shalt.err (!%p4551_p12)
}
  0xea   : > { %4054 = dma.hbm_to_vmem [thread:$0]  (!%p4956_p6), %s5979_s12, 512, %s632_s13, [#allocation12], %s4796_s15, %s4796_s15, %s4797_s11  }
  0xeb   : > { %s4800_s21 = smov [#allocation16]   ;;  %s5980_s16 = sld [smem:[#allocation47_spill]] }
  0xec   : > { %s663_s9 = sshll.u32 %s4800_s21, 4  ;;  %s664_s9 = int_to_ptr.vmem [resolvable:$true] %s663_s9 }
  0xf1   : > { %s4555_s19 = scalar_lea.hbm %s5980_s16, 2048 }
  0xf2   : > { %p4556_p1 = scmp.ne.s32.totalorder %s5980_s16, %s4555_s19  ;;  %p4562_p0 = scmp.lt.u32.totalorder %s4555_s19, %s5980_s16 }
  0xf4   : > { %p4558_p3 = pnand %p4556_p1, %p4972_p8 }
  0xf6   : > { %p4559_p13 = pneg %p4558_p3 }
  0xf8   : > { %p4564_p2 = pnand %p4562_p0, %p4559_p13 }
  0xfa   : > { %4567 = shalt.err (!%p4564_p2)
}
  0xfb   : > { %s4568_s13 = scalar_lea.vmem %s664_s9, 2048  ;;  %p4576_p4 = scmp.lt.s32.totalorder %s664_s9, %s664_s9 }
  0xfc   : > { %p4569_p5 = scmp.ne.s32.totalorder %s664_s9, %s4568_s13  ;;  %p4577_p10 = scmp.lt.s32.totalorder %s4568_s13, %s4568_s13 }
  0xfe   : > { %p4571_p7 = pnand %p4569_p5, %p4972_p8  ;;  %p4578_p11 = por %p4577_p10, %p4576_p4 }
 0x100   : > { %p4572_p9 = pneg %p4571_p7 }
 0x102   : > { %p4579_p12 = pnand %p4578_p11, %p4572_p9 }
 0x104   : > { %4582 = shalt.err (!%p4579_p12)
}
 0x105   : > { %4060 = dma.hbm_to_vmem [thread:$0]  (!%p4956_p6), %s5980_s16, 2048, %s664_s9, [#allocation15], %s4796_s15, %s4796_s15, %s4797_s11  }
 0x106   : > { %s5944_s5 = sadd.s32 4294967294, %s4787_s27   ;;  %s5147_s4 = sadd.s32 1, %s4787_s27  }
 0x107   : > { %s78_s28 = ssub.s32 %s4787_s27, %s5147_s4  ;;  %s81_s1 = sadd.s32 1, %s4783_s26 }
 0x108   : > { %p79_p8 = scmp.eq.s32.totalorder %s78_s28, 0  ;;  %p88_p1 = scmp.ne.s32.totalorder %s4783_s26, %s4779_s25 }
 0x109   : > { %p89_p3 = scmp.eq.s32.totalorder %s4787_s27, 0  ;;  %p94_p13 = scmp.ne.s32.totalorder %s4779_s25, %s4775_s2 }
 0x10a   : > { %s5158_s21 = scalar_select %p79_p8, %s4783_s26, %s81_s1  }
 0x10b   : > { %p5160_p0 = por %p89_p3, %p88_p1  ;;  %p5982_p2 = scmp.eq.s32.totalorder %s4940_s29, 0 }
 0x10c   : > { %p454_p5 = scmp.eq.s32.totalorder %s4940_s29, 1  ;;  %p460_p7 = scmp.eq.s32.totalorder %s5944_s5, 1 }
 0x10d   : > { %p5166_p6 = por %p5982_p2, %p94_p13  ;;  %p4086_p9 = scmp.lt.s32.totalorder %s4787_s27, 2 }
 0x10e   : > { %s689_s11 = sand.u32 1, %s4783_s26   ;;  %p5175_p4 = por %p454_p5, %p88_p1 }
 0x10f   : > { %p5179_p10 = por %p460_p7, %p94_p13  ;;  %s3543_s19 = sshll.u32 %s689_s11, 7 }
 0x110   : > { %s5984_s9 = scalar_select %p5175_p4, 1, 0 }
 0x111   : > { %s5985_s14 = scalar_select %p5179_p10, 1, 0 }
 0x112   : > { %s3713_s20 = sshll.u32 %s4787_s27, 11  ;;  %s5986_s30 = sld [smem:[#allocation32_spill]] }
 0x113   : > { %s693_s23 = scalar_lea.vmem [#allocation2], %s3543_s19  ;;  %p5193_p11 = pnand %p4086_p9, %p5160_p0 }
 0x114   : > { %s700_s18 = sshll.u32 %s693_s23, 4  ;;  %s5197_s1 = scalar_lea.sflag [#allocation3], %s689_s11  ;;  %s5189_s18 = int_to_ptr.vmem [resolvable:$true] %s700_s18 }
 0x115   : > { %p4585_p8 = pneg %p5193_p11 }
 0x118   : > { %s5187_s13 = scalar_lea.hbm %s5986_s30, %s3713_s20  ;;  %s4588_s3 = scalar_lea.hbm %s5986_s30, 4096 }
 0x119   : > { %s4583_s24 = scalar_lea.hbm %s5187_s13, 2048  ;;  %p4589_p13 = scmp.lt.u32.totalorder %s5187_s13, %s5986_s30 }
 0x11a   : > { %p4584_p12 = scmp.ne.s32.totalorder %s5187_s13, %s4583_s24  ;;  %p4590_p0 = scmp.lt.u32.totalorder %s4588_s3, %s4583_s24 }
 0x11b   : > { %p4592_p5 = scmp.lt.u32.totalorder %s4583_s24, %s5187_s13 }
 0x11c   : > { %p4586_p1 = pnand %p4585_p8, %p4584_p12  ;;  %p4591_p2 = por %p4590_p0, %p4589_p13 }
 0x11e   : > { %p4587_p3 = pneg %p4586_p1  ;;  %p4593_p7 = por %p4592_p5, %p4591_p2 }
 0x120   : > { %p4594_p9 = pnand %p4593_p7, %p4587_p3 }
 0x122   : > { %4597 = shalt.err (!%p4594_p9)
}
 0x123   : > { %s4598_s11 = scalar_lea.vmem %s5189_s18, 2048  ;;  %s4801_s19 = smov [#allocation2]  }
 0x124   : > { %p4599_p12 = scmp.ne.s32.totalorder %s5189_s18, %s4598_s11  ;;  %s4603_s20 = sshll.u32 %s4801_s19, 4  ;;  %s4604_s20 = int_to_ptr.vmem [resolvable:$false] %s4603_s20 }
 0x125   : > { %s4605_s17 = scalar_lea.vmem %s4604_s20, 4096  ;;  %p4606_p4 = scmp.lt.s32.totalorder %s5189_s18, %s4604_s20 }
 0x126   : > { %p4601_p1 = pnand %p4599_p12, %p4585_p8  ;;  %p4607_p13 = scmp.lt.s32.totalorder %s4605_s17, %s4598_s11 }
 0x128   : > { %p4602_p10 = pneg %p4601_p1  ;;  %p4608_p0 = por %p4607_p13, %p4606_p4 }
 0x12a   : > { %p4609_p2 = pnand %p4608_p0, %p4602_p10 }
 0x12c   : > { %4612 = shalt.err (!%p4609_p2)
}
 0x12d   : > { %s5988_s24 = smov 8   ;;  %p5989_p8 = scmp.ne.s32.totalorder %s5969_s0, 0 }
 0x12e   : > { %4064 = dma.hbm_to_vmem [thread:$0]  (!%p5193_p11), %s5187_s13, 2048, %s5189_s18, %s5197_s1, %s5976_s10, %s5976_s10, %s5988_s24  }
 0x12f   : > { %712 = sbr.rel (%p5989_p8) target bundleno = 2261 (0x8d5), region = 92  ;;  %s5231_s3 = sand.u32 (!%p5989_p8), 1, %s4779_s25  }
 0x130   : > { %s5234_s23 = sshll.u32 (!%p5989_p8), %s5231_s3, 7  ;;  %s715_s28 = scalar_lea.sflag (!%p5989_p8), [#allocation3], %s5231_s3 }
 0x131   : > { %s5238_s11 = scalar_lea.vmem (!%p5989_p8), [#allocation2], %s5234_s23 }
 0x136   : > { %4742 = dma.done.wait (%p5166_p6), %s715_s28, 2048  }
 0x137   : > { %4744 = vsyncadd (%p5166_p6), %s715_s28, 4294965248  ;;  %p5990_p4 = scmp.eq.s32.totalorder %s4940_s29, 0 }
 0x139   : > { %4746 = dma.done.wait (%p5990_p4), [#allocation6], 4096   ;;  %p5991_p10 = pmov %p5990_p4 }
 0x13a   : > { %p5992_p11 = pmov %p5990_p4 }
 0x13b   : > { %4748 = vsyncadd (%p5991_p10), [#allocation6], 4294963200 }
 0x13c   : > { %4750 = dma.done.wait (%p5992_p11), [#allocation9], 32   ;;  %p5993_p3 = pmov %p5990_p4 }
 0x13e   : > { %4752 = vsyncadd (%p5993_p3), [#allocation9], 4294967264  ;;  %p5994_p5 = pmov %p5993_p3 }
 0x13f   : > { %p5995_p7 = pmov %p5993_p3 }
 0x140   : > { %4754 = dma.done.wait (%p5994_p5), [#allocation12], 544  }
 0x141   : > { %4756 = vsyncadd (%p5995_p7), [#allocation12], 4294966752  ;;  %p5996_p6 = pmov %p5993_p3 }
 0x142   : > { %p5997_p9 = pmov %p5993_p3 }
 0x143   : > { %4758 = dma.done.wait (%p5996_p6), [#allocation15], 4096  }
 0x144   : > { %4760 = vsyncadd (%p5997_p9), [#allocation15], 4294963200  ;;  %v4802_v0 = vmov 0   ;;  %s3560_s0 = sshll.u32 %s4940_s29, 4  ;;  %v4143_v1 = vld [vmem:[#allocation5 + $0x4] ss:$8 sps:$4 sm:$0xff]   ;;  %v875_v47 = vlaneseq }
 0x145   : > { %1045 = vmatprep.mubr.bf16.mxu0 %v4802_v0  ;;  %p830_p12 = scmp.lt.s32.totalorder %s3560_s0, 31  ;;  %v4145_v2 = vld [vmem:[#allocation5] ss:$8 sps:$4 sm:$0xff]   ;;  %1013 = vmatprep.subr.bf16.mxu0 %v4143_v1  ;;  %v4146_v3 = vld [vmem:[#allocation5 + $0x14] ss:$8 sps:$4 sm:$0xff]   ;;  %s5998_s18 = sld [smem:[#allocation31_spill]] }
 0x146   : > { %1014 = vmatpush1.bf16.msra.mxu0 %v4145_v2  ;;  %v4148_v4 = vld [vmem:[#allocation5 + $0x10] ss:$8 sps:$4 sm:$0xff]   ;;  %v4149_v5 = vld [vmem:[#allocation5 + $0x24] ss:$8 sps:$4 sm:$0xff]   ;;  %v4151_v6 = vld [vmem:[#allocation5 + $0x20] ss:$8 sps:$4 sm:$0xff]  }
 0x147   : > { %s6021_s0 = smov (!%p830_p12, %s3560_s0), 31  ;;  %1015 = vmatprep.subr.bf16.mxu0 %v4146_v3  ;;  %v4152_v7 = vld [vmem:[#allocation5 + $0x34] ss:$8 sps:$4 sm:$0xff]   ;;  %v4154_v8 = vld [vmem:[#allocation5 + $0x30] ss:$8 sps:$4 sm:$0xff]   ;;  %v4175_v14 = vld [vmem:[#allocation7 + $0x40] sm:$0xff]  }
 0x148   : > { %s3561_s10 = sshll.u32 %s6021_s0, 2  ;;  %v4155_v9 = vld [vmem:[#allocation5 + $0x44] ss:$8 sps:$4 sm:$0xff]   ;;  %v4157_v10 = vld [vmem:[#allocation5 + $0x40] ss:$8 sps:$4 sm:$0xff]   ;;  %3718 = vmatprep.subr.bf16.mxu1 %v4175_v14  ;;  %v4179_v19 = vld [vmem:[#allocation7 + $0x50] sm:$0xff]  }
 0x149   : > { %v4158_v11 = vld [vmem:[#allocation5 + $0x54] ss:$8 sps:$4 sm:$0xff]   ;;  %v4160_v12 = vld [vmem:[#allocation5 + $0x50] ss:$8 sps:$4 sm:$0xff]   ;;  %v4161_v13 = vld [vmem:[#allocation5 + $0x64] ss:$8 sps:$4 sm:$0xff]  }
 0x14a   : > { %1016 = vmatpush1.bf16.msra.mxu0 %v4148_v4  ;;  %v4176_v15 = vld [vmem:[#allocation7] sm:$0xff]   ;;  %v4177_v17 = vld [vmem:[#allocation7 + $0x48] sm:$0xff]   ;;  %v4164_v20 = vld [vmem:[#allocation5 + $0x74] ss:$8 sps:$4 sm:$0xff]   ;;  %s5999_s6 = sld [smem:[#allocation37_spill]]  ;;  %v876_v48 = vshrl.u32 %v875_v47, 7 }
 0x14b   : > { %1017 = vmatprep.subr.bf16.mxu0 %v4149_v5  ;;  %s5265_s1 = scalar_lea.vmem %s5998_s18, %s3561_s10  ;;  %v4163_v16 = vld [vmem:[#allocation5 + $0x60] ss:$8 sps:$4 sm:$0xff]   ;;  %3719 = vmatpush3.bf16.msra.mxu1 %v4176_v15  ;;  %v4166_v21 = vld [vmem:[#allocation5 + $0x70] ss:$8 sps:$4 sm:$0xff]   ;;  %s6000_s24 = sld [smem:[#allocation34_spill]] }
 0x14c   : > { %v4178_v18 = vld [vmem:[#allocation7 + $0x8] sm:$0xff]   ;;  %3720 = vmatprep.subr.bf16.mxu1 %v4177_v17  ;;  %v4180_v22 = vld [vmem:[#allocation7 + $0x10] sm:$0xff]   ;;  %v4181_v23 = vld [vmem:[#allocation7 + $0x58] sm:$0xff]   ;;  %v5300_v49 = vsub.s32 0, %v876_v48  ;;  %v5305_v51 = vsub.s32 1, %v876_v48  ;;  %s6001_s8 = sld [smem:[#allocation39_spill]] }
 0x14d   : > { %v4167_v24 = vld [vmem:[%s5265_s1] sm:$0xff]   ;;  %v4182_v25 = vld [vmem:[#allocation7 + $0x18] sm:$0xff]   ;;  %v4168_v28 = vld [vmem:[%s5265_s1 + $0x8] sm:$0xff]   ;;  %s6002_s28 = sld [smem:[#allocation41_spill]]  ;;  %s5464_s18 = scalar_lea.vmem [#allocation17], %s5234_s23 }
 0x14e   : > { %1018 = vmatpush1.bf16.msra.mxu0 %v4151_v6  ;;  %v4183_v26 = vld [vmem:[#allocation7 + $0x60] sm:$0xff]   ;;  %v4169_v29 = vld [vmem:[%s5265_s1 + $0x10] sm:$0xff]   ;;  %v4170_v30 = vld [vmem:[%s5265_s1 + $0x18] sm:$0xff]   ;;  %s5499_s19 = scalar_lea.vmem [#allocation20], %s5234_s23  ;;  %s6003_s17 = sld [smem:[#allocation42_spill]] }
 0x14f   : > { %1019 = vmatprep.subr.bf16.mxu0 %v4152_v7  ;;  %3721 = vmatpush3.bf16.msra.mxu1 %v4178_v18  ;;  %v4184_v27 = vld [vmem:[#allocation7 + $0x20] sm:$0xff]   ;;  %v4172_v32 = vld [vmem:[%s5265_s1 + $0x28] sm:$0xff]   ;;  %v4173_v33 = vld [vmem:[%s5265_s1 + $0x30] sm:$0xff]   ;;  %s6004_s10 = sld [smem:[#allocation44_spill]]  ;;  %s3206_s20 = sand.u32 1, %s4940_s29  }
 0x150   : > { %3722 = vmatprep.subr.bf16.mxu1 %v4179_v19  ;;  %v4171_v31 = vld [vmem:[%s5265_s1 + $0x20] sm:$0xff]   ;;  %v4174_v34 = vld [vmem:[%s5265_s1 + $0x38] sm:$0xff]   ;;  %v4185_v35 = vld [vmem:[#allocation7 + $0x68] sm:$0xff]   ;;  %s5469_s1 = scalar_lea.vmem [#allocation18], %s5234_s23  ;;  %p6008_p13 = scmp.ne.s32.totalorder %s5984_s9, 0 }
 0x151   : > { %v4186_v36 = vld [vmem:[#allocation7 + $0x28] sm:$0xff]   ;;  %v4187_v37 = vld [vmem:[#allocation7 + $0x70] sm:$0xff]   ;;  %v4189_v39 = vld [vmem:[#allocation7 + $0x78] sm:$0xff]   ;;  %s3246_s13 = sshll.u32 %s5469_s1, 4  ;;  %s5714_s13 = int_to_ptr.vmem [resolvable:$true] %s3246_s13 }
 0x152   : > { %1020 = vmatpush1.bf16.msra.mxu0 %v4154_v8  ;;  %v4188_v38 = vld [vmem:[#allocation7 + $0x30] sm:$0xff]   ;;  %v4190_v40 = vld [vmem:[#allocation7 + $0x38] sm:$0xff]   ;;  %v4191_v41 = vld [vmem:[%s5999_s6] sm:$0xff]  }
 0x153   : > { %1021 = vmatprep.subr.bf16.mxu0 %v4155_v9  ;;  %3723 = vmatpush3.bf16.msra.mxu1 %v4180_v22  ;;  %v4192_v42 = vld [vmem:[%s5999_s6 + $0x8] sm:$0xff]   ;;  %v4193_v43 = vld [vmem:[%s5999_s6 + $0x10] sm:$0xff]   ;;  %v4194_v44 = vld [vmem:[%s5999_s6 + $0x18] sm:$0xff]  }
 0x154   : > { %3724 = vmatprep.subr.bf16.mxu1 %v4181_v23  ;;  %v4195_v45 = vld [vmem:[%s5999_s6 + $0x20] sm:$0xff]   ;;  %v4196_v46 = vld [vmem:[%s5999_s6 + $0x28] sm:$0xff]  }
 0x155   : > { %v873_v50 = vld [vmem:[%s6000_s24] sm:$0x3]  ;;  %s4803_s24 = smov [#allocation18]  }
 0x156   : > { %1022 = vmatpush1.bf16.msra.mxu0 %v4157_v10  ;;  %v5308_v52 = vrot.slane %v873_v50, %v5300_v49  ;;  %v5311_v53 = vrot.slane %v873_v50, %v5305_v51  ;;  %s4617_s0 = sshll.u32 %s4803_s24, 4  ;;  %s4618_s0 = int_to_ptr.vmem [resolvable:$false] %s4617_s0 }
 0x157   : > { %1023 = vmatprep.subr.bf16.mxu0 %v4158_v11  ;;  %3725 = vmatpush3.bf16.msra.mxu1 %v4182_v25  ;;  %p4620_p8 = scmp.lt.s32.totalorder %s5714_s13, %s4618_s0 }
 0x158   : > { %3726 = vmatprep.subr.bf16.mxu1 %v4183_v26 }
 0x15a   : > { %1024 = vmatpush1.bf16.msra.mxu0 %v4160_v12 }
 0x15b   : > { %1025 = vmatprep.subr.bf16.mxu0 %v4161_v13  ;;  %3727 = vmatpush3.bf16.msra.mxu1 %v4184_v27 }
 0x15c   : > { %3728 = vmatprep.subr.bf16.mxu1 %v4185_v35 }
 0x15e   : > { %1026 = vmatpush1.bf16.msra.mxu0 %v4163_v16 }
 0x15f   : > { %1027 = vmatprep.subr.bf16.mxu0 %v4164_v20  ;;  %3729 = vmatpush3.bf16.msra.mxu1 %v4186_v36 }
 0x160   : > { %3730 = vmatprep.subr.bf16.mxu1 %v4187_v37 }
 0x162   : > { %1028 = vmatpush1.bf16.msra.mxu0 %v4166_v21 }
 0x163   : > { %3731 = vmatpush3.bf16.msra.mxu1 %v4188_v38  ;;  %3890 = vmatprep.subr.bf16.mxu0 %v4191_v41 }
 0x164   : > { %3732 = vmatprep.subr.bf16.mxu1 %v4189_v39 }
 0x165   : > { %1046 = vmatmul.mubr.bf16.vlgmr.msra.gmra.mrb[0].mxu0 %v4167_v24 }
 0x166   : > { %1055 = vmatprep.mubr.bf16.mxu0 %v4802_v0  ;;  %3891 = vmatpush3.bf16.msra.mxu0 %v4191_v41 }
 0x167   : > { %3733 = vmatpush3.bf16.msra.mxu1 %v4190_v40  ;;  %3892 = vmatprep.subr.bf16.mxu0 %v4192_v42 }
 0x16a   : > { %3893 = vmatpush3.bf16.msra.mxu0 %v4192_v42 }
 0x16b   : > { %3894 = vmatprep.subr.bf16.mxu0 %v4193_v43 }
 0x16d   : > { %1056 = vmatmul.mubr.bf16.gmra.mrb[4].mxu0 %v4168_v28 }
 0x16e   : > { %1065 = vmatprep.mubr.bf16.mxu0 %v4802_v0  ;;  %3895 = vmatpush3.bf16.msra.mxu0 %v4193_v43 }
 0x16f   : > { %3896 = vmatprep.subr.bf16.mxu0 %v4194_v44 }
 0x172   : > { %3897 = vmatpush3.bf16.msra.mxu0 %v4194_v44 }
 0x173   : > { %3898 = vmatprep.subr.bf16.mxu0 %v4195_v45 }
 0x175   : > { %1066 = vmatmul.mubr.bf16.gmra.mrb[8].mxu0 %v4169_v29 }
 0x176   : > { %1075 = vmatprep.mubr.bf16.mxu0 %v4802_v0  ;;  %3899 = vmatpush3.bf16.msra.mxu0 %v4195_v45 }
 0x177   : > { %3900 = vmatprep.subr.bf16.mxu0 %v4196_v46 }
 0x17a   : > { %3901 = vmatpush3.bf16.msra.mxu0 %v4196_v46 }
 0x17d   : > { %1076 = vmatmul.mubr.bf16.gmra.mrb[12].mxu0 %v4170_v30 }
 0x17e   : > { %1085 = vmatprep.mubr.bf16.mxu0 %v4802_v0 }
 0x185   : > { %1086 = vmatmul.mubr.bf16.gmra.mrb[16].mxu0 %v4171_v31 }
 0x186   : > { %1095 = vmatprep.mubr.bf16.mxu0 %v4802_v0 }
 0x18d   : > { %1096 = vmatmul.mubr.bf16.gmra.mrb[20].mxu0 %v4172_v32 }
 0x18e   : > { %1105 = vmatprep.mubr.bf16.mxu0 %v4802_v0 }
 0x195   : > { %1106 = vmatmul.mubr.bf16.gmra.mrb[24].mxu0 %v4173_v33 }
 0x196   : > { %1115 = vmatprep.mubr.bf16.mxu0 %v4802_v0 }
 0x19d   : > { %1116 = vmatmul.mubr.bf16.gmra.mrb[28].mxu0 %v4174_v34 }
 0x238   : > { %v1047_v54 = vpop.f32.mrb[0].mxu0 }
 0x239   : > { %v1048_v55 = vadd.f32 %v1047_v54, %v5308_v52  ;;  %v1049_v56 = vpop.f32.mrb[1].mxu0 }
 0x23a   : > { %v1050_v57 = vadd.f32 %v1049_v56, %v5311_v53  ;;  %v1051_v58 = vpop.f32.mrb[2].mxu0 }
 0x23b   : > { %v1158_v59 = vmul.f32 0.2, %v1048_v55  ;;  %v1052_v60 = vadd.f32 %v1051_v58, %v5308_v52  ;;  %v1053_v61 = vpop.f32.mrb[3].mxu0  ;;  %vm1126_vm0 = vcmp.gt.f32.partialorder %v1048_v55, 0.0 }
 0x23c   : > { %v1159_v62 = vmul.f32 0.2, %v1050_v57  ;;  %v1054_v63 = vadd.f32 %v1053_v61, %v5311_v53  ;;  %vm1127_vm2 = vcmp.gt.f32.partialorder %v1050_v57, 0.0 }
 0x23d   : > { %vm1128_vm1 = vcmp.gt.f32.partialorder %v1052_v60, 0.0  ;;  %v1160_v1 = vmul.f32 0.2, %v1052_v60  ;;  %v1190_v3 = vsel %vm1126_vm0, %v1048_v55, %v1158_v59 }
 0x23e   : > { %v1161_v2 = vmul.f32 0.2, %v1054_v63  ;;  %vm1129_vm3 = vcmp.gt.f32.partialorder %v1054_v63, 0.0  ;;  %v1191_v6 = vsel %vm1127_vm2, %v1050_v57, %v1159_v62 }
 0x23f   : > { %v1192_v4 = vsel %vm1128_vm1, %v1052_v60, %v1160_v1 }
 0x240   : > { %v1057_v5 = vpop.f32.mrb[4].mxu0  ;;  %v1193_v7 = vsel %vm1129_vm3, %v1054_v63, %v1161_v2  ;;  %v1222_v8 = vpack.c.bf16 %v1192_v4, %v1190_v3 }
 0x241   : > { %v1058_v9 = vadd.f32 %v1057_v5, %v5308_v52  ;;  %v1059_v10 = vpop.f32.mrb[5].mxu0  ;;  %v1223_v11 = vpack.c.bf16 %v1193_v7, %v1191_v6 }
 0x242   : > { %v1060_v12 = vadd.f32 %v1059_v10, %v5311_v53  ;;  %v1061_v13 = vpop.f32.mrb[6].mxu0 }
 0x243   : > { %v1162_v14 = vmul.f32 0.2, %v1058_v9  ;;  %v1062_v15 = vadd.f32 %v1061_v13, %v5308_v52  ;;  %v1063_v16 = vpop.f32.mrb[7].mxu0  ;;  %1405 = vmatprep.mubr.bf16.mxu1 %v1223_v11  ;;  %vm1130_vm4 = vcmp.gt.f32.partialorder %v1058_v9, 0.0 }
 0x244   : > { %v1163_v17 = vmul.f32 0.2, %v1060_v12  ;;  %v1064_v18 = vadd.f32 %v1063_v16, %v5311_v53  ;;  %1406 = vmatmul.mubr.bf16.vlgmr.msra.gmra.mrb[0].mxu1 %v1222_v8  ;;  %vm1131_vm5 = vcmp.gt.f32.partialorder %v1060_v12, 0.0 }
 0x245   : > { %vm1132_vm6 = vcmp.gt.f32.partialorder %v1062_v15, 0.0  ;;  %v1164_v19 = vmul.f32 0.2, %v1062_v15  ;;  %v1194_v21 = vsel %vm1130_vm4, %v1058_v9, %v1162_v14 }
 0x246   : > { %vm1133_vm7 = vcmp.gt.f32.partialorder %v1064_v18, 0.0  ;;  %v1165_v20 = vmul.f32 0.2, %v1064_v18  ;;  %v1195_v24 = vsel %vm1131_vm5, %v1060_v12, %v1163_v17 }
 0x247   : > { %v1196_v22 = vsel %vm1132_vm6, %v1062_v15, %v1164_v19 }
 0x248   : > { %v1067_v23 = vpop.f32.mrb[8].mxu0  ;;  %v1197_v25 = vsel %vm1133_vm7, %v1064_v18, %v1165_v20  ;;  %v1224_v26 = vpack.c.bf16 %v1196_v22, %v1194_v21 }
 0x249   : > { %v1068_v27 = vadd.f32 %v1067_v23, %v5308_v52  ;;  %v1069_v28 = vpop.f32.mrb[9].mxu0  ;;  %v1225_v29 = vpack.c.bf16 %v1197_v25, %v1195_v24 }
 0x24a   : > { %v1070_v30 = vadd.f32 %v1069_v28, %v5311_v53  ;;  %v1071_v31 = vpop.f32.mrb[10].mxu0 }
 0x24b   : > { %v1166_v32 = vmul.f32 0.2, %v1068_v27  ;;  %v1072_v33 = vadd.f32 %v1071_v31, %v5308_v52  ;;  %v1073_v34 = vpop.f32.mrb[11].mxu0  ;;  %1413 = vmatprep.mubr.bf16.mxu1 %v1225_v29  ;;  %vm1134_vm8 = vcmp.gt.f32.partialorder %v1068_v27, 0.0 }
 0x24c   : > { %v1167_v35 = vmul.f32 0.2, %v1070_v30  ;;  %v1074_v36 = vadd.f32 %v1073_v34, %v5311_v53  ;;  %1414 = vmatmul.mubr.bf16.gmra.mrb[4].mxu1 %v1224_v26  ;;  %vm1135_vm9 = vcmp.gt.f32.partialorder %v1070_v30, 0.0 }
 0x24d   : > { %vm1136_vm10 = vcmp.gt.f32.partialorder %v1072_v33, 0.0  ;;  %v1168_v37 = vmul.f32 0.2, %v1072_v33  ;;  %v1198_v39 = vsel %vm1134_vm8, %v1068_v27, %v1166_v32 }
 0x24e   : > { %vm1137_vm11 = vcmp.gt.f32.partialorder %v1074_v36, 0.0  ;;  %v1169_v38 = vmul.f32 0.2, %v1074_v36  ;;  %v1199_v42 = vsel %vm1135_vm9, %v1070_v30, %v1167_v35 }
 0x24f   : > { %v1200_v40 = vsel %vm1136_vm10, %v1072_v33, %v1168_v37 }
 0x250   : > { %v1077_v41 = vpop.f32.mrb[12].mxu0  ;;  %v1201_v43 = vsel %vm1137_vm11, %v1074_v36, %v1169_v38  ;;  %v1226_v44 = vpack.c.bf16 %v1200_v40, %v1198_v39 }
 0x251   : > { %v1078_v45 = vadd.f32 %v1077_v41, %v5308_v52  ;;  %v1079_v46 = vpop.f32.mrb[13].mxu0  ;;  %v1227_v47 = vpack.c.bf16 %v1201_v43, %v1199_v42 }
 0x252   : > { %v1080_v48 = vadd.f32 %v1079_v46, %v5311_v53  ;;  %v1081_v50 = vpop.f32.mrb[14].mxu0 }
 0x253   : > { %v1170_v54 = vmul.f32 0.2, %v1078_v45  ;;  %v1082_v55 = vadd.f32 %v1081_v50, %v5308_v52  ;;  %v1083_v56 = vpop.f32.mrb[15].mxu0  ;;  %1421 = vmatprep.mubr.bf16.mxu1 %v1227_v47  ;;  %vm1138_vm12 = vcmp.gt.f32.partialorder %v1078_v45, 0.0 }
 0x254   : > { %v1171_v57 = vmul.f32 0.2, %v1080_v48  ;;  %v1084_v58 = vadd.f32 %v1083_v56, %v5311_v53  ;;  %1422 = vmatmul.mubr.bf16.gmra.mrb[8].mxu1 %v1226_v44  ;;  %vm1139_vm13 = vcmp.gt.f32.partialorder %v1080_v48, 0.0 }
 0x255   : > { %vm1140_vm14 = vcmp.gt.f32.partialorder %v1082_v55, 0.0  ;;  %v1172_v59 = vmul.f32 0.2, %v1082_v55  ;;  %v1202_v61 = vsel %vm1138_vm12, %v1078_v45, %v1170_v54 }
 0x256   : > { %vm1141_vm15 = vcmp.gt.f32.partialorder %v1084_v58, 0.0  ;;  %v1173_v60 = vmul.f32 0.2, %v1084_v58  ;;  %v1203_v1 = vsel %vm1139_vm13, %v1080_v48, %v1171_v57 }
 0x257   : > { %v1204_v62 = vsel %vm1140_vm14, %v1082_v55, %v1172_v59 }
 0x258   : > { %v1087_v63 = vpop.f32.mrb[16].mxu0  ;;  %v1205_v2 = vsel %vm1141_vm15, %v1084_v58, %v1173_v60  ;;  %v1228_v3 = vpack.c.bf16 %v1204_v62, %v1202_v61 }
 0x259   : > { %v1088_v4 = vadd.f32 %v1087_v63, %v5308_v52  ;;  %v1089_v5 = vpop.f32.mrb[17].mxu0  ;;  %v1229_v6 = vpack.c.bf16 %v1205_v2, %v1203_v1 }
 0x25a   : > { %v1090_v7 = vadd.f32 %v1089_v5, %v5311_v53  ;;  %v1091_v8 = vpop.f32.mrb[18].mxu0 }
 0x25b   : > { %v1174_v9 = vmul.f32 0.2, %v1088_v4  ;;  %v1092_v10 = vadd.f32 %v1091_v8, %v5308_v52  ;;  %v1093_v11 = vpop.f32.mrb[19].mxu0  ;;  %1429 = vmatprep.mubr.bf16.mxu1 %v1229_v6  ;;  %vm1142_vm0 = vcmp.gt.f32.partialorder %v1088_v4, 0.0 }
 0x25c   : > { %v1175_v12 = vmul.f32 0.2, %v1090_v7  ;;  %v1094_v13 = vadd.f32 %v1093_v11, %v5311_v53  ;;  %1430 = vmatmul.mubr.bf16.gmra.mrb[12].mxu1 %v1228_v3  ;;  %vm1143_vm1 = vcmp.gt.f32.partialorder %v1090_v7, 0.0 }
 0x25d   : > { %vm1144_vm2 = vcmp.gt.f32.partialorder %v1092_v10, 0.0  ;;  %v1176_v14 = vmul.f32 0.2, %v1092_v10  ;;  %v1206_v16 = vsel %vm1142_vm0, %v1088_v4, %v1174_v9 }
 0x25e   : > { %vm1145_vm3 = vcmp.gt.f32.partialorder %v1094_v13, 0.0  ;;  %v1177_v15 = vmul.f32 0.2, %v1094_v13  ;;  %v1207_v19 = vsel %vm1143_vm1, %v1090_v7, %v1175_v12 }
 0x25f   : > { %v1208_v17 = vsel %vm1144_vm2, %v1092_v10, %v1176_v14 }
 0x260   : > { %v1097_v18 = vpop.f32.mrb[20].mxu0  ;;  %v1209_v20 = vsel %vm1145_vm3, %v1094_v13, %v1177_v15  ;;  %v1230_v21 = vpack.c.bf16 %v1208_v17, %v1206_v16  ;;  %v4199_v17 = vld [vmem:[%s6001_s8] ss:$8 sps:$4 sm:$0xff]  }
 0x261   : > { %v1098_v22 = vadd.f32 %v1097_v18, %v5308_v52  ;;  %v1099_v23 = vpop.f32.mrb[21].mxu0  ;;  %v1231_v24 = vpack.c.bf16 %v1209_v20, %v1207_v19  ;;  %v4201_v18 = vld [vmem:[%s6001_s8 + $0x4] ss:$8 sps:$4 sm:$0xff]   ;;  %v4204_v19 = vld [vmem:[%s6001_s8 + $0x14] ss:$8 sps:$4 sm:$0xff]  }
 0x262   : > { %v1100_v25 = vadd.f32 %v1099_v23, %v5311_v53  ;;  %v1101_v26 = vpop.f32.mrb[22].mxu0  ;;  %1835 = vmatprep.subr.bf16.mxu1 %v4201_v18  ;;  %v4202_v20 = vld [vmem:[%s6001_s8 + $0x10] ss:$8 sps:$4 sm:$0xff]   ;;  %v4210_v23 = vld [vmem:[%s6001_s8 + $0x34] ss:$8 sps:$4 sm:$0xff]  }
 0x263   : > { %v1178_v27 = vmul.f32 0.2, %v1098_v22  ;;  %v1102_v28 = vadd.f32 %v1101_v26, %v5308_v52  ;;  %v1103_v29 = vpop.f32.mrb[23].mxu0  ;;  %1437 = vmatprep.mubr.bf16.mxu1 %v1231_v24  ;;  %vm1146_vm4 = vcmp.gt.f32.partialorder %v1098_v22, 0.0  ;;  %1836 = vmatpush1.bf16.msra.mxu1 %v4199_v17  ;;  %v4208_v24 = vld [vmem:[%s6001_s8 + $0x30] ss:$8 sps:$4 sm:$0xff]  }
 0x264   : > { %v1179_v30 = vmul.f32 0.2, %v1100_v25  ;;  %v1104_v31 = vadd.f32 %v1103_v29, %v5311_v53  ;;  %1438 = vmatmul.mubr.bf16.gmra.mrb[16].mxu1 %v1230_v21  ;;  %vm1147_vm5 = vcmp.gt.f32.partialorder %v1100_v25, 0.0  ;;  %1837 = vmatprep.subr.bf16.mxu1 %v4204_v19  ;;  %v4207_v21 = vld [vmem:[%s6001_s8 + $0x24] ss:$8 sps:$4 sm:$0xff]  }
 0x265   : > { %vm1148_vm6 = vcmp.gt.f32.partialorder %v1102_v28, 0.0  ;;  %v1180_v32 = vmul.f32 0.2, %v1102_v28  ;;  %v1210_v34 = vsel %vm1146_vm4, %v1098_v22, %v1178_v27  ;;  %v4205_v22 = vld [vmem:[%s6001_s8 + $0x20] ss:$8 sps:$4 sm:$0xff]   ;;  %s4613_s8 = scalar_lea.vmem %s5714_s13, 2048 }
 0x266   : > { %vm1149_vm7 = vcmp.gt.f32.partialorder %v1104_v31, 0.0  ;;  %v1181_v33 = vmul.f32 0.2, %v1104_v31  ;;  %v1211_v37 = vsel %vm1147_vm5, %v1100_v25, %v1179_v30  ;;  %v5376_v26 = vld [vmem:[#allocation8] ss:$0 sm:$0xff]  ;;  %p4614_p1 = scmp.ne.s32.totalorder %s5714_s13, %s4613_s8 }
 0x267   : > { %v1212_v35 = vsel %vm1148_vm6, %v1102_v28, %v1180_v32  ;;  %1838 = vmatpush1.bf16.msra.mxu1 %v4202_v20 }
 0x268   : > { %v1107_v36 = vpop.f32.mrb[24].mxu0  ;;  %v1213_v38 = vsel %vm1149_vm7, %v1104_v31, %v1181_v33  ;;  %v1232_v39 = vpack.c.bf16 %v1212_v35, %v1210_v34  ;;  %1839 = vmatprep.subr.bf16.mxu1 %v4207_v21  ;;  %p4615_p0 = pnand %p4614_p1, %p6008_p13 }
 0x269   : > { %v1108_v40 = vadd.f32 %v1107_v36, %v5308_v52  ;;  %v1109_v41 = vpop.f32.mrb[25].mxu0  ;;  %v1233_v42 = vpack.c.bf16 %v1213_v38, %v1211_v37 }
 0x26a   : > { %v1110_v43 = vadd.f32 %v1109_v41, %v5311_v53  ;;  %v1111_v44 = vpop.f32.mrb[26].mxu0  ;;  %p4616_p2 = pneg %p4615_p0 }
 0x26b   : > { %v1182_v45 = vmul.f32 0.2, %v1108_v40  ;;  %v1112_v46 = vadd.f32 %v1111_v44, %v5308_v52  ;;  %v1113_v47 = vpop.f32.mrb[27].mxu0  ;;  %1445 = vmatprep.mubr.bf16.mxu1 %v1233_v42  ;;  %vm1150_vm8 = vcmp.gt.f32.partialorder %v1108_v40, 0.0  ;;  %1840 = vmatpush1.bf16.msra.mxu1 %v4205_v22 }
 0x26c   : > { %v1183_v48 = vmul.f32 0.2, %v1110_v43  ;;  %v1114_v50 = vadd.f32 %v1113_v47, %v5311_v53  ;;  %1446 = vmatmul.mubr.bf16.gmra.mrb[20].mxu1 %v1232_v39  ;;  %vm1151_vm9 = vcmp.gt.f32.partialorder %v1110_v43, 0.0  ;;  %1841 = vmatprep.subr.bf16.mxu1 %v4210_v23 }
 0x26d   : > { %vm1152_vm10 = vcmp.gt.f32.partialorder %v1112_v46, 0.0  ;;  %v1184_v54 = vmul.f32 0.2, %v1112_v46  ;;  %v1214_v56 = vsel %vm1150_vm8, %v1108_v40, %v1182_v45 }
 0x26e   : > { %vm1153_vm11 = vcmp.gt.f32.partialorder %v1114_v50, 0.0  ;;  %v1185_v55 = vmul.f32 0.2, %v1114_v50  ;;  %v1215_v59 = vsel %vm1151_vm9, %v1110_v43, %v1183_v48 }
 0x26f   : > { %v1216_v57 = vsel %vm1152_vm10, %v1112_v46, %v1184_v54  ;;  %1842 = vmatpush1.bf16.msra.mxu1 %v4208_v24 }
 0x270   : > { %v1117_v58 = vpop.f32.mrb[28].mxu0  ;;  %v1217_v60 = vsel %vm1153_vm11, %v1114_v50, %v1185_v55  ;;  %v1234_v61 = vpack.c.bf16 %v1216_v57, %v1214_v56 }
 0x271   : > { %v1118_v62 = vadd.f32 %v1117_v58, %v5308_v52  ;;  %v1119_v63 = vpop.f32.mrb[29].mxu0  ;;  %v1235_v1 = vpack.c.bf16 %v1217_v60, %v1215_v59 }
 0x272   : > { %v1120_v2 = vadd.f32 %v1119_v63, %v5311_v53  ;;  %v1121_v3 = vpop.f32.mrb[30].mxu0 }
 0x273   : > { %v1186_v4 = vmul.f32 0.2, %v1118_v62  ;;  %v1122_v5 = vadd.f32 %v1121_v3, %v5308_v52  ;;  %v1123_v6 = vpop.f32.mrb[31].mxu0  ;;  %1453 = vmatprep.mubr.bf16.mxu1 %v1235_v1  ;;  %vm1154_vm12 = vcmp.gt.f32.partialorder %v1118_v62, 0.0  ;;  %v4197_v52 = vld [vmem:[%s5999_s6 + $0x30] sm:$0xff]  }
 0x274   : > { %v1187_v7 = vmul.f32 0.2, %v1120_v2  ;;  %v1124_v8 = vadd.f32 %v1123_v6, %v5311_v53  ;;  %1454 = vmatmul.mubr.bf16.gmra.mrb[24].mxu1 %v1234_v61  ;;  %vm1155_vm13 = vcmp.gt.f32.partialorder %v1120_v2, 0.0  ;;  %3902 = vmatprep.subr.bf16.mxu0 %v4197_v52  ;;  %v4198_v53 = vld [vmem:[%s5999_s6 + $0x38] sm:$0xff]   ;;  %s6007_s6 = sld [smem:[#allocation51_spill]] }
 0x275   : > { %vm1156_vm14 = vcmp.gt.f32.partialorder %v1122_v5, 0.0  ;;  %v1188_v9 = vmul.f32 0.2, %v1122_v5  ;;  %v1218_v11 = vsel %vm1154_vm12, %v1118_v62, %v1186_v4  ;;  %3903 = vmatpush3.bf16.msra.mxu0 %v4197_v52 }
 0x276   : > { %vm1157_vm15 = vcmp.gt.f32.partialorder %v1124_v8, 0.0  ;;  %v1189_v10 = vmul.f32 0.2, %v1124_v8  ;;  %v1219_v13 = vsel %vm1155_vm13, %v1120_v2, %v1187_v7  ;;  %3904 = vmatprep.subr.bf16.mxu0 %v4198_v53 }
 0x277   : > { %v1220_v12 = vsel %vm1156_vm14, %v1122_v5, %v1188_v9 }
 0x278   : > { %v1221_v14 = vsel %vm1157_vm15, %v1124_v8, %v1189_v10  ;;  %v1236_v15 = vpack.c.bf16 %v1220_v12, %v1218_v11 }
 0x279   : > { %v1237_v16 = vpack.c.bf16 %v1221_v14, %v1219_v13  ;;  %3905 = vmatpush3.bf16.msra.mxu0 %v4198_v53 }
 0x27b   : > { %1461 = vmatprep.mubr.bf16.mxu1 %v1237_v16 }
 0x27c   : > { %1462 = vmatmul.mubr.bf16.gmra.mrb[28].mxu1 %v1236_v15 }
 0x27d   : > { %1867 = vmatprep.mubr.bf16.mxu1 %v4802_v0 }
 0x317   : > { %v3734_v25 = vpop.f32.mrb[0].mxu1 }
 0x318   : > { %v3735_v27 = vpop.f32.mrb[1].mxu1 }
 0x319   : > { %v3736_v28 = vadd.f32 %v3735_v27, %v3734_v25  ;;  %v3737_v29 = vpop.f32.mrb[2].mxu1 }
 0x31a   : > { %v3738_v30 = vpop.f32.mrb[3].mxu1 }
 0x31b   : > { %v1408_v31 = vadd.f32 %v3736_v28, %v5376_v26  ;;  %v3739_v32 = vadd.f32 %v3738_v30, %v3737_v29 }
 0x31d   : > { %v1486_v33 = vmul.f32 0.2, %v1408_v31  ;;  %v1411_v34 = vadd.f32 %v3739_v32, %v5376_v26  ;;  %vm1470_vm0 = vcmp.gt.f32.partialorder %v1408_v31, 0.0 }
 0x31f   : > { %vm1471_vm1 = vcmp.gt.f32.partialorder %v1411_v34, 0.0  ;;  %v1487_v35 = vmul.f32 0.2, %v1411_v34  ;;  %v3740_v36 = vpop.f32.mrb[4].mxu1  ;;  %v1502_v40 = vsel %vm1470_vm0, %v1408_v31, %v1486_v33 }
 0x320   : > { %v3741_v37 = vpop.f32.mrb[5].mxu1 }
 0x321   : > { %v3742_v38 = vadd.f32 %v3741_v37, %v3740_v36  ;;  %v3743_v39 = vpop.f32.mrb[6].mxu1  ;;  %v1503_v41 = vsel %vm1471_vm1, %v1411_v34, %v1487_v35 }
 0x322   : > { %v3744_v42 = vpop.f32.mrb[7].mxu1  ;;  %v1518_v43 = vpack.c.bf16 %v1503_v41, %v1502_v40 }
 0x323   : > { %v1416_v44 = vadd.f32 %v3742_v38, %v5376_v26  ;;  %v3745_v45 = vadd.f32 %v3744_v42, %v3743_v39 }
 0x324   : > { %3906 = vmatprep.mubr.bf16.mxu0 %v1518_v43 }
 0x325   : > { %v1488_v46 = vmul.f32 0.2, %v1416_v44  ;;  %v1419_v47 = vadd.f32 %v3745_v45, %v5376_v26  ;;  %vm1472_vm2 = vcmp.gt.f32.partialorder %v1416_v44, 0.0 }
 0x327   : > { %vm1473_vm3 = vcmp.gt.f32.partialorder %v1419_v47, 0.0  ;;  %v1489_v48 = vmul.f32 0.2, %v1419_v47  ;;  %v3746_v50 = vpop.f32.mrb[8].mxu1  ;;  %v1504_v55 = vsel %vm1472_vm2, %v1416_v44, %v1488_v46 }
 0x328   : > { %v3747_v54 = vpop.f32.mrb[9].mxu1 }
 0x329   : > { %v1505_v56 = vsel %vm1473_vm3, %v1419_v47, %v1489_v48  ;;  %v3748_v57 = vadd.f32 %v3747_v54, %v3746_v50  ;;  %v3749_v58 = vpop.f32.mrb[10].mxu1 }
 0x32a   : > { %v1519_v59 = vpack.c.bf16 %v1505_v56, %v1504_v55  ;;  %v3750_v60 = vpop.f32.mrb[11].mxu1 }
 0x32b   : > { %v1424_v61 = vadd.f32 %v3748_v57, %v5376_v26  ;;  %v3751_v62 = vadd.f32 %v3750_v60, %v3749_v58 }
 0x32c   : > { %3907 = vmatmul.mubr.bf16.vlgmr.msra.gmra.mrb[32].mxu0 %v1519_v59 }
 0x32d   : > { %v1490_v63 = vmul.f32 0.2, %v1424_v61  ;;  %v1427_v1 = vadd.f32 %v3751_v62, %v5376_v26  ;;  %vm1474_vm4 = vcmp.gt.f32.partialorder %v1424_v61, 0.0 }
 0x32f   : > { %vm1475_vm5 = vcmp.gt.f32.partialorder %v1427_v1, 0.0  ;;  %v1491_v2 = vmul.f32 0.2, %v1427_v1  ;;  %v3752_v3 = vpop.f32.mrb[12].mxu1  ;;  %v1506_v7 = vsel %vm1474_vm4, %v1424_v61, %v1490_v63  ;;  %vm1810_vm4 = vcmask 523264  }
 0x330   : > { %v3753_v4 = vpop.f32.mrb[13].mxu1 }
 0x331   : > { %v3754_v5 = vadd.f32 %v3753_v4, %v3752_v3  ;;  %v3755_v6 = vpop.f32.mrb[14].mxu1  ;;  %v1507_v8 = vsel %vm1475_vm5, %v1427_v1, %v1491_v2 }
 0x332   : > { %v3756_v9 = vpop.f32.mrb[15].mxu1  ;;  %v1520_v10 = vpack.c.bf16 %v1507_v8, %v1506_v7 }
 0x333   : > { %v1432_v11 = vadd.f32 %v3754_v5, %v5376_v26  ;;  %v3757_v12 = vadd.f32 %v3756_v9, %v3755_v6 }
 0x334   : > { %3910 = vmatprep.mubr.bf16.mxu0 %v1520_v10 }
 0x335   : > { %v1492_v13 = vmul.f32 0.2, %v1432_v11  ;;  %v1435_v14 = vadd.f32 %v3757_v12, %v5376_v26  ;;  %vm1476_vm6 = vcmp.gt.f32.partialorder %v1432_v11, 0.0 }
 0x337   : > { %vm1477_vm7 = vcmp.gt.f32.partialorder %v1435_v14, 0.0  ;;  %v1493_v15 = vmul.f32 0.2, %v1435_v14  ;;  %v3758_v16 = vpop.f32.mrb[16].mxu1  ;;  %v1508_v18 = vsel %vm1476_vm6, %v1432_v11, %v1492_v13  ;;  %v5394_v11 = vld [vmem:[#allocation10] ss:$0 sm:$0xff] }
 0x338   : > { %v3759_v52 = vpop.f32.mrb[17].mxu1 }
 0x339   : > { %v3760_v53 = vadd.f32 %v3759_v52, %v3758_v16  ;;  %v3761_v17 = vpop.f32.mrb[18].mxu1  ;;  %v1509_v19 = vsel %vm1477_vm7, %v1435_v14, %v1493_v15 }
 0x33a   : > { %v3762_v20 = vpop.f32.mrb[19].mxu1  ;;  %v1521_v21 = vpack.c.bf16 %v1509_v19, %v1508_v18 }
 0x33b   : > { %v1440_v22 = vadd.f32 %v3760_v53, %v5376_v26  ;;  %v3763_v23 = vadd.f32 %v3762_v20, %v3761_v17 }
 0x33c   : > { %3911 = vmatmul.mubr.bf16.gmra.mrb[36].mxu0 %v1521_v21 }
 0x33d   : > { %v1494_v24 = vmul.f32 0.2, %v1440_v22  ;;  %v1443_v25 = vadd.f32 %v3763_v23, %v5376_v26  ;;  %vm1478_vm8 = vcmp.gt.f32.partialorder %v1440_v22, 0.0 }
 0x33f   : > { %vm1479_vm9 = vcmp.gt.f32.partialorder %v1443_v25, 0.0  ;;  %v1495_v27 = vmul.f32 0.2, %v1443_v25  ;;  %v3764_v28 = vpop.f32.mrb[20].mxu1  ;;  %v1510_v32 = vsel %vm1478_vm8, %v1440_v22, %v1494_v24 }
 0x340   : > { %v3765_v29 = vpop.f32.mrb[21].mxu1 }
 0x341   : > { %v3766_v30 = vadd.f32 %v3765_v29, %v3764_v28  ;;  %v3767_v31 = vpop.f32.mrb[22].mxu1  ;;  %v1511_v33 = vsel %vm1479_vm9, %v1443_v25, %v1495_v27 }
 0x342   : > { %v3768_v34 = vpop.f32.mrb[23].mxu1  ;;  %v1522_v35 = vpack.c.bf16 %v1511_v33, %v1510_v32 }
 0x343   : > { %v1448_v36 = vadd.f32 %v3766_v30, %v5376_v26  ;;  %v3769_v37 = vadd.f32 %v3768_v34, %v3767_v31 }
 0x344   : > { %3914 = vmatprep.mubr.bf16.mxu0 %v1522_v35 }
 0x345   : > { %v1496_v38 = vmul.f32 0.2, %v1448_v36  ;;  %v1451_v39 = vadd.f32 %v3769_v37, %v5376_v26  ;;  %vm1480_vm10 = vcmp.gt.f32.partialorder %v1448_v36, 0.0 }
 0x347   : > { %vm1481_vm11 = vcmp.gt.f32.partialorder %v1451_v39, 0.0  ;;  %v1497_v40 = vmul.f32 0.2, %v1451_v39  ;;  %v3770_v41 = vpop.f32.mrb[24].mxu1  ;;  %v1512_v45 = vsel %vm1480_vm10, %v1448_v36, %v1496_v38 }
 0x348   : > { %v3771_v42 = vpop.f32.mrb[25].mxu1 }
 0x349   : > { %v3772_v43 = vadd.f32 %v3771_v42, %v3770_v41  ;;  %v3773_v44 = vpop.f32.mrb[26].mxu1  ;;  %v1513_v46 = vsel %vm1481_vm11, %v1451_v39, %v1497_v40 }
 0x34a   : > { %v3774_v47 = vpop.f32.mrb[27].mxu1  ;;  %v1523_v48 = vpack.c.bf16 %v1513_v46, %v1512_v45 }
 0x34b   : > { %v1456_v50 = vadd.f32 %v3772_v43, %v5376_v26  ;;  %v3775_v54 = vadd.f32 %v3774_v47, %v3773_v44 }
 0x34c   : > { %3915 = vmatmul.mubr.bf16.gmra.mrb[40].mxu0 %v1523_v48 }
 0x34d   : > { %v1498_v55 = vmul.f32 0.2, %v1456_v50  ;;  %v1459_v56 = vadd.f32 %v3775_v54, %v5376_v26  ;;  %vm1482_vm12 = vcmp.gt.f32.partialorder %v1456_v50, 0.0 }
 0x34f   : > { %vm1483_vm13 = vcmp.gt.f32.partialorder %v1459_v56, 0.0  ;;  %v1499_v57 = vmul.f32 0.2, %v1459_v56  ;;  %v3776_v58 = vpop.f32.mrb[28].mxu1  ;;  %v1514_v62 = vsel %vm1482_vm12, %v1456_v50, %v1498_v55 }
 0x350   : > { %v3777_v59 = vpop.f32.mrb[29].mxu1 }
 0x351   : > { %v3778_v60 = vadd.f32 %v3777_v59, %v3776_v58  ;;  %v3779_v61 = vpop.f32.mrb[30].mxu1  ;;  %v1515_v63 = vsel %vm1483_vm13, %v1459_v56, %v1499_v57 }
 0x352   : > { %v3780_v1 = vpop.f32.mrb[31].mxu1  ;;  %v1524_v2 = vpack.c.bf16 %v1515_v63, %v1514_v62 }
 0x353   : > { %v1464_v3 = vadd.f32 %v3778_v60, %v5376_v26  ;;  %v3781_v4 = vadd.f32 %v3780_v1, %v3779_v61 }
 0x354   : > { %3918 = vmatprep.mubr.bf16.mxu0 %v1524_v2 }
 0x355   : > { %v1500_v5 = vmul.f32 0.2, %v1464_v3  ;;  %v1467_v6 = vadd.f32 %v3781_v4, %v5376_v26  ;;  %vm1484_vm14 = vcmp.gt.f32.partialorder %v1464_v3, 0.0 }
 0x357   : > { %vm1485_vm15 = vcmp.gt.f32.partialorder %v1467_v6, 0.0  ;;  %v1501_v7 = vmul.f32 0.2, %v1467_v6  ;;  %v1516_v8 = vsel %vm1484_vm14, %v1464_v3, %v1500_v5 }
 0x359   : > { %v1517_v9 = vsel %vm1485_vm15, %v1467_v6, %v1501_v7 }
 0x35a   : > { %v1525_v10 = vpack.c.bf16 %v1517_v9, %v1516_v8 }
 0x35c   : > { %3919 = vmatmul.mubr.bf16.gmra.mrb[44].mxu0 %v1525_v10 }
 0x3ff   : > { %v3908_v12 = vpop.f32.mrb[32].mxu0 }
 0x400   : > { %v1640_v13 = vadd.f32 %v3908_v12, %v5394_v11  ;;  %v1631_v14 = vpop.f32.mrb[33].mxu0 }
 0x401   : > { %v1632_v15 = vadd.f32 %v5394_v11, %v1631_v14  ;;  %v3909_v16 = vpop.f32.mrb[34].mxu0 }
 0x402   : > { %v1712_v52 = vmul.f32 0.2, %v1640_v13  ;;  %v1643_v53 = vadd.f32 %v3909_v16, %v5394_v11  ;;  %v1634_v26 = vpop.f32.mrb[35].mxu0  ;;  %vm1696_vm0 = vcmp.gt.f32.partialorder %v1640_v13, 0.0 }
 0x403   : > { %v1710_v17 = vmul.f32 0.2, %v1632_v15  ;;  %v1635_v18 = vadd.f32 %v5394_v11, %v1634_v26  ;;  %vm1694_vm1 = vcmp.gt.f32.partialorder %v1632_v15, 0.0 }
 0x404   : > { %vm1697_vm2 = vcmp.gt.f32.partialorder %v1643_v53, 0.0  ;;  %v1713_v19 = vmul.f32 0.2, %v1643_v53  ;;  %v1728_v21 = vsel %vm1696_vm0, %v1640_v13, %v1712_v52 }
 0x405   : > { %vm1695_vm3 = vcmp.gt.f32.partialorder %v1635_v18, 0.0  ;;  %v1711_v20 = vmul.f32 0.2, %v1635_v18  ;;  %v1726_v23 = vsel %vm1694_vm1, %v1632_v15, %v1710_v17 }
 0x406   : > { %v1729_v22 = vsel %vm1697_vm2, %v1643_v53, %v1713_v19 }
 0x407   : > { %v1743_v24 = vpack.c.bf16 %v1729_v22, %v1728_v21  ;;  %v1727_v25 = vsel %vm1695_vm3, %v1635_v18, %v1711_v20  ;;  %v4212_v21 = vld [vmem:[%s6002_s28 + $0x8] sm:$0xff]   ;;  %v4213_v22 = vld [vmem:[%s6002_s28 + $0x10] sm:$0xff]  }
 0x408   : > { %v1742_v27 = vpack.c.bf16 %v1727_v25, %v1726_v23  ;;  %v4214_v23 = vld [vmem:[%s6002_s28 + $0x18] sm:$0xff]   ;;  %v4216_v25 = vld [vmem:[%s6002_s28 + $0x28] sm:$0xff]  }
 0x40a   : > { %3620 = vmatmul.mubr.msk.bf16.vlgmr.msra.gmra.mrb[32].mxu1 %vm1810_vm4, %v1742_v27  ;;  %v4217_v27 = vld [vmem:[%s6002_s28 + $0x30] sm:$0xff]  }
 0x40b   : > { %1877 = vmatprep.mubr.bf16.mxu1 %v4802_v0 }
 0x40f   : > { %v3912_v28 = vpop.f32.mrb[36].mxu0 }
 0x410   : > { %v1656_v29 = vadd.f32 %v3912_v28, %v5394_v11  ;;  %v1647_v30 = vpop.f32.mrb[37].mxu0  ;;  %v4218_v28 = vld [vmem:[%s6002_s28 + $0x38] sm:$0xff]  }
 0x411   : > { %v1648_v31 = vadd.f32 %v5394_v11, %v1647_v30  ;;  %v3913_v32 = vpop.f32.mrb[38].mxu0  ;;  %v1758_v30 = vld [vmem:[#allocation11] sm:$0x3] }
 0x412   : > { %v1716_v33 = vmul.f32 0.2, %v1656_v29  ;;  %v1659_v34 = vadd.f32 %v3913_v32, %v5394_v11  ;;  %v1650_v35 = vpop.f32.mrb[39].mxu0  ;;  %3621 = vmatmul.mubr.msk.bf16.gmra.mrb[36].mxu1 %vm1810_vm4, %v1743_v24  ;;  %vm1700_vm5 = vcmp.gt.f32.partialorder %v1656_v29, 0.0  ;;  %v4215_v24 = vld [vmem:[%s6002_s28 + $0x20] sm:$0xff]   ;;  %v5459_v32 = vrot.slane %v1758_v30, %v5305_v51 }
 0x413   : > { %v1714_v36 = vmul.f32 0.2, %v1648_v31  ;;  %v1651_v37 = vadd.f32 %v5394_v11, %v1650_v35  ;;  %1887 = vmatprep.mubr.bf16.mxu1 %v4802_v0  ;;  %vm1698_vm6 = vcmp.gt.f32.partialorder %v1648_v31, 0.0 }
 0x414   : > { %vm1701_vm7 = vcmp.gt.f32.partialorder %v1659_v34, 0.0  ;;  %v1717_v38 = vmul.f32 0.2, %v1659_v34  ;;  %v1732_v40 = vsel %vm1700_vm5, %v1656_v29, %v1716_v33  ;;  %v5452_v29 = vld [vmem:[#allocation13] sm:$0xff]  }
 0x415   : > { %vm1699_vm8 = vcmp.gt.f32.partialorder %v1651_v37, 0.0  ;;  %v1715_v39 = vmul.f32 0.2, %v1651_v37  ;;  %v1730_v42 = vsel %vm1698_vm6, %v1648_v31, %v1714_v36  ;;  %v5456_v31 = vrot.slane %v1758_v30, %v5300_v49  ;;  %v1984_v30 = vld [vmem:[%s5238_s11 + $0x20] sm:$0xff] }
 0x416   : > { %v1733_v41 = vsel %vm1701_vm7, %v1659_v34, %v1717_v38 }
 0x417   : > { %v1745_v43 = vpack.c.bf16 %v1733_v41, %v1732_v40  ;;  %v1731_v44 = vsel %vm1699_vm8, %v1651_v37, %v1715_v39 }
 0x418   : > { %v1744_v45 = vpack.c.bf16 %v1731_v44, %v1730_v42 }
 0x41a   : > { %3622 = vmatmul.mubr.msk.bf16.gmra.mrb[40].mxu1 %vm1810_vm4, %v1744_v45 }
 0x41b   : > { %1897 = vmatprep.mubr.bf16.mxu1 %v4802_v0 }
 0x41f   : > { %v3916_v46 = vpop.f32.mrb[40].mxu0 }
 0x420   : > { %v1672_v47 = vadd.f32 %v3916_v46, %v5394_v11  ;;  %v1663_v48 = vpop.f32.mrb[41].mxu0 }
 0x421   : > { %v1664_v50 = vadd.f32 %v5394_v11, %v1663_v48  ;;  %v3917_v54 = vpop.f32.mrb[42].mxu0 }
 0x422   : > { %v1720_v55 = vmul.f32 0.2, %v1672_v47  ;;  %v1675_v56 = vadd.f32 %v3917_v54, %v5394_v11  ;;  %v1666_v57 = vpop.f32.mrb[43].mxu0  ;;  %3623 = vmatmul.mubr.msk.bf16.gmra.mrb[44].mxu1 %vm1810_vm4, %v1745_v43  ;;  %vm1704_vm9 = vcmp.gt.f32.partialorder %v1672_v47, 0.0 }
 0x423   : > { %v1718_v58 = vmul.f32 0.2, %v1664_v50  ;;  %v1667_v59 = vadd.f32 %v5394_v11, %v1666_v57  ;;  %1907 = vmatprep.mubr.bf16.mxu1 %v4802_v0  ;;  %vm1702_vm10 = vcmp.gt.f32.partialorder %v1664_v50, 0.0  ;;  %v1980_v57 = vld [vmem:[%s5238_s11] sm:$0xff] }
 0x424   : > { %vm1705_vm11 = vcmp.gt.f32.partialorder %v1675_v56, 0.0  ;;  %v1721_v60 = vmul.f32 0.2, %v1675_v56  ;;  %v1736_v62 = vsel %vm1704_vm9, %v1672_v47, %v1720_v55 }
 0x425   : > { %vm1703_vm12 = vcmp.gt.f32.partialorder %v1667_v59, 0.0  ;;  %v1719_v61 = vmul.f32 0.2, %v1667_v59  ;;  %v1734_v1 = vsel %vm1702_vm10, %v1664_v50, %v1718_v58 }
 0x426   : > { %v1737_v63 = vsel %vm1705_vm11, %v1675_v56, %v1721_v60  ;;  %v1981_v60 = vld [vmem:[%s5238_s11 + $0x8] sm:$0xff] }
 0x427   : > { %v1747_v2 = vpack.c.bf16 %v1737_v63, %v1736_v62  ;;  %v1735_v3 = vsel %vm1703_vm12, %v1667_v59, %v1719_v61 }
 0x428   : > { %v1746_v4 = vpack.c.bf16 %v1735_v3, %v1734_v1 }
 0x42a   : > { %3624 = vmatmul.mubr.msk.bf16.gmra.mrb[48].mxu1 %vm1810_vm4, %v1746_v4 }
 0x42b   : > { %1917 = vmatprep.mubr.bf16.mxu1 %v4802_v0 }
 0x42f   : > { %v3920_v5 = vpop.f32.mrb[44].mxu0 }
 0x430   : > { %v1688_v6 = vadd.f32 %v3920_v5, %v5394_v11  ;;  %v1679_v7 = vpop.f32.mrb[45].mxu0 }
 0x431   : > { %v1680_v8 = vadd.f32 %v5394_v11, %v1679_v7  ;;  %v3921_v9 = vpop.f32.mrb[46].mxu0 }
 0x432   : > { %v1724_v10 = vmul.f32 0.2, %v1688_v6  ;;  %v1691_v12 = vadd.f32 %v3921_v9, %v5394_v11  ;;  %v1682_v13 = vpop.f32.mrb[47].mxu0  ;;  %3625 = vmatmul.mubr.msk.bf16.gmra.mrb[52].mxu1 %vm1810_vm4, %v1747_v2  ;;  %vm1708_vm13 = vcmp.gt.f32.partialorder %v1688_v6, 0.0 }
 0x433   : > { %v1722_v14 = vmul.f32 0.2, %v1680_v8  ;;  %v1683_v15 = vadd.f32 %v5394_v11, %v1682_v13  ;;  %1927 = vmatprep.mubr.bf16.mxu1 %v4802_v0  ;;  %vm1706_vm14 = vcmp.gt.f32.partialorder %v1680_v8, 0.0  ;;  %v4211_v11 = vld [vmem:[%s6002_s28] sm:$0xff]  }
 0x434   : > { %vm1709_vm15 = vcmp.gt.f32.partialorder %v1691_v12, 0.0  ;;  %v1725_v16 = vmul.f32 0.2, %v1691_v12  ;;  %v1740_v53 = vsel %vm1708_vm13, %v1688_v6, %v1724_v10  ;;  %3922 = vmatprep.subr.bf16.mxu0 %v4211_v11 }
 0x435   : > { %vm1707_vm0 = vcmp.gt.f32.partialorder %v1683_v15, 0.0  ;;  %v1723_v52 = vmul.f32 0.2, %v1683_v15  ;;  %v1738_v17 = vsel %vm1706_vm14, %v1680_v8, %v1722_v14  ;;  %3923 = vmatpush3.bf16.msra.mxu0 %v4211_v11 }
 0x436   : > { %v1741_v26 = vsel %vm1709_vm15, %v1691_v12, %v1725_v16  ;;  %3924 = vmatprep.subr.bf16.mxu0 %v4212_v21  ;;  %v1982_v12 = vld [vmem:[%s5238_s11 + $0x10] sm:$0xff]  ;;  %v1983_v16 = vld [vmem:[%s5238_s11 + $0x18] sm:$0xff] }
 0x437   : > { %v1749_v18 = vpack.c.bf16 %v1741_v26, %v1740_v53  ;;  %v1739_v19 = vsel %vm1707_vm0, %v1683_v15, %v1723_v52 }
 0x438   : > { %v1748_v20 = vpack.c.bf16 %v1739_v19, %v1738_v17 }
 0x439   : > { %3925 = vmatpush3.bf16.msra.mxu0 %v4212_v21 }
 0x43a   : > { %3626 = vmatmul.mubr.msk.bf16.gmra.mrb[56].mxu1 %vm1810_vm4, %v1748_v20  ;;  %3926 = vmatprep.subr.bf16.mxu0 %v4213_v22 }
 0x43b   : > { %1937 = vmatprep.mubr.bf16.mxu1 %v4802_v0 }
 0x43d   : > { %3927 = vmatpush3.bf16.msra.mxu0 %v4213_v22 }
 0x43e   : > { %3928 = vmatprep.subr.bf16.mxu0 %v4214_v23 }
 0x441   : > { %3929 = vmatpush3.bf16.msra.mxu0 %v4214_v23 }
 0x442   : > { %3627 = vmatmul.mubr.msk.bf16.gmra.mrb[60].mxu1 %vm1810_vm4, %v1749_v18  ;;  %3930 = vmatprep.subr.bf16.mxu0 %v4215_v24 }
 0x443   : > { %2616 = vmatprep.mubr.bf16.mxu1 %v4802_v0 }
 0x445   : > { %3931 = vmatpush3.bf16.msra.mxu0 %v4215_v24 }
 0x446   : > { %3932 = vmatprep.subr.bf16.mxu0 %v4216_v25 }
 0x449   : > { %3933 = vmatpush3.bf16.msra.mxu0 %v4216_v25 }
 0x44a   : > { %3934 = vmatprep.subr.bf16.mxu0 %v4217_v27 }
 0x44d   : > { %3935 = vmatpush3.bf16.msra.mxu0 %v4217_v27 }
 0x44e   : > { %3936 = vmatprep.subr.bf16.mxu0 %v4218_v28 }
 0x451   : > { %3937 = vmatpush3.bf16.msra.mxu0 %v4218_v28 }
 0x452   : > { %3954 = vmatprep.subr.bf16.mxu0 %v5452_v29 }
 0x4dd   : > { %v1869_v33 = vpop.f32.mrb[32].mxu1 }
 0x4de   : > { %v1870_v34 = vadd.f32 %v1869_v33, %v5456_v31  ;;  %v1871_v35 = vpop.f32.mrb[33].mxu1 }
 0x4df   : > { %v1872_v36 = vadd.f32 %v1871_v35, %v5459_v32  ;;  %v1873_v37 = vpop.f32.mrb[34].mxu1 }
 0x4e0   : > { %3137 = vst [vmem:[%s5464_s18] sm:$0xff] %v1870_v34  ;;  %v1874_v38 = vadd.f32 %v1873_v37, %v5456_v31  ;;  %v1875_v39 = vpop.f32.mrb[35].mxu1  ;;  %v1985_v37 = vld [vmem:[%s5238_s11 + $0x28] sm:$0xff] }
 0x4e1   : > { %v1948_v40 = vmul.f32 1.442695, %v1872_v36  ;;  %3153 = vst [vmem:[%s5469_s1] sm:$0xff] %v1872_v36  ;;  %v1876_v41 = vadd.f32 %v1875_v39, %v5459_v32 }
 0x4e2   : > { %3138 = vst [vmem:[%s5464_s18 + $0x8] sm:$0xff] %v1874_v38 }
 0x4e3   : > { %4263 = vpow2.f32 %v1948_v40  ;;  %v1950_v42 = vmul.f32 1.442695, %v1876_v41  ;;  %3154 = vst [vmem:[%s5469_s1 + $0x8] sm:$0xff] %v1876_v41 }
 0x4e5   : > { %4265 = vpow2.f32 %v1950_v42  ;;  %v1879_v43 = vpop.f32.mrb[36].mxu1 }
 0x4e6   : > { %v1880_v44 = vadd.f32 %v1879_v43, %v5456_v31  ;;  %v1881_v45 = vpop.f32.mrb[37].mxu1 }
 0x4e7   : > { %v1882_v46 = vadd.f32 %v1881_v45, %v5459_v32  ;;  %v1883_v47 = vpop.f32.mrb[38].mxu1 }
 0x4e8   : > { %3139 = vst [vmem:[%s5464_s18 + $0x10] sm:$0xff] %v1880_v44  ;;  %v1884_v48 = vadd.f32 %v1883_v47, %v5456_v31  ;;  %v1885_v50 = vpop.f32.mrb[39].mxu1 }
 0x4e9   : > { %v1952_v54 = vmul.f32 1.442695, %v1882_v46  ;;  %3155 = vst [vmem:[%s5469_s1 + $0x10] sm:$0xff] %v1882_v46  ;;  %v1886_v55 = vadd.f32 %v1885_v50, %v5459_v32 }
 0x4ea   : > { %3140 = vst [vmem:[%s5464_s18 + $0x18] sm:$0xff] %v1884_v48 }
 0x4eb   : > { %4267 = vpow2.f32 %v1952_v54  ;;  %v1954_v56 = vmul.f32 1.442695, %v1886_v55  ;;  %3156 = vst [vmem:[%s5469_s1 + $0x18] sm:$0xff] %v1886_v55 }
 0x4ed   : > { %v4264_v58 = vpop.eup %4263  ;;  %4269 = vpow2.f32 %v1954_v56  ;;  %v1889_v59 = vpop.f32.mrb[40].mxu1  ;;  %v1986_v56 = vld [vmem:[%s5238_s11 + $0x30] sm:$0xff] }
 0x4ee   : > { %v5486_v61 = vadd.f32 %v1889_v59, %v5456_v31  ;;  %v1891_v62 = vpop.f32.mrb[41].mxu1  ;;  %v1996_v63 = vmul.f32 %v4264_v58, %v1980_v57 }
 0x4ef   : > { %v4266_v1 = vpop.eup %4265  ;;  %v1892_v2 = vadd.f32 %v1891_v62, %v5459_v32  ;;  %v1893_v3 = vpop.f32.mrb[42].mxu1 }
 0x4f0   : > { %3141 = vst [vmem:[%s5464_s18 + $0x20] sm:$0xff] %v5486_v61  ;;  %v5492_v4 = vadd.f32 %v1893_v3, %v5456_v31  ;;  %v1895_v5 = vpop.f32.mrb[43].mxu1  ;;  %v1997_v6 = vmul.f32 %v4266_v1, %v1981_v60  ;;  %v2012_v7 = vadd.f32 %v1996_v63, %v1870_v34  ;;  %v4220_v34 = vld [vmem:[#allocation13 + $0x8] sm:$0xff]   ;;  %v1987_v60 = vld [vmem:[%s5238_s11 + $0x38] sm:$0xff] }
 0x4f1   : > { %v1956_v8 = vmul.f32 1.442695, %v1892_v2  ;;  %3157 = vst [vmem:[%s5469_s1 + $0x20] sm:$0xff] %v1892_v2  ;;  %v1896_v9 = vadd.f32 %v1895_v5, %v5459_v32 }
 0x4f2   : > { %3142 = vst [vmem:[%s5464_s18 + $0x28] sm:$0xff] %v5492_v4  ;;  %v2013_v10 = vadd.f32 %v1997_v6, %v1874_v38  ;;  %3169 = vst [vmem:[%s5499_s19] sm:$0xff] %v2012_v7 }
 0x4f3   : > { %4271 = vpow2.f32 %v1956_v8  ;;  %v1958_v13 = vmul.f32 1.442695, %v1896_v9  ;;  %3158 = vst [vmem:[%s5469_s1 + $0x28] sm:$0xff] %v1896_v9 }
 0x4f4   : > { %v2028_v14 = vpack.c.bf16 %v2013_v10, %v2012_v7  ;;  %3170 = vst [vmem:[%s5499_s19 + $0x8] sm:$0xff] %v2013_v10 }
 0x4f5   : > { %v4268_v15 = vpop.eup %4267  ;;  %4273 = vpow2.f32 %v1958_v13  ;;  %v1899_v52 = vpop.f32.mrb[44].mxu1  ;;  %v1988_v13 = vld [vmem:[%s5238_s11 + $0x40] sm:$0xff] }
 0x4f6   : > { %v1998_v53 = vmul.f32 %v4268_v15, %v1982_v12  ;;  %v5507_v26 = vadd.f32 %v1899_v52, %v5456_v31  ;;  %v1901_v17 = vpop.f32.mrb[45].mxu1  ;;  %3938 = vmatprep.mubr.bf16.mxu0 %v2028_v14  ;;  %v1989_v52 = vld [vmem:[%s5238_s11 + $0x48] sm:$0xff] }
 0x4f7   : > { %v4270_v18 = vpop.eup %4269  ;;  %v1902_v19 = vadd.f32 %v1901_v17, %v5459_v32  ;;  %v1903_v20 = vpop.f32.mrb[46].mxu1 }
 0x4f8   : > { %v1999_v11 = vmul.f32 %v4270_v18, %v1983_v16  ;;  %3143 = vst [vmem:[%s5464_s18 + $0x30] sm:$0xff] %v5507_v26  ;;  %v5513_v21 = vadd.f32 %v1903_v20, %v5456_v31  ;;  %v1905_v22 = vpop.f32.mrb[47].mxu1  ;;  %v2014_v23 = vadd.f32 %v1998_v53, %v1880_v44 }
 0x4f9   : > { %v1960_v24 = vmul.f32 1.442695, %v1902_v19  ;;  %3159 = vst [vmem:[%s5469_s1 + $0x30] sm:$0xff] %v1902_v19  ;;  %v1906_v25 = vadd.f32 %v1905_v22, %v5459_v32 }
 0x4fa   : > { %3144 = vst [vmem:[%s5464_s18 + $0x38] sm:$0xff] %v5513_v21  ;;  %v2015_v27 = vadd.f32 %v1999_v11, %v1884_v48  ;;  %3171 = vst [vmem:[%s5499_s19 + $0x10] sm:$0xff] %v2014_v23  ;;  %v4221_v48 = vld [vmem:[#allocation13 + $0x10] sm:$0xff]  }
 0x4fb   : > { %4275 = vpow2.f32 %v1960_v24  ;;  %v1962_v28 = vmul.f32 1.442695, %v1906_v25  ;;  %3160 = vst [vmem:[%s5469_s1 + $0x38] sm:$0xff] %v1906_v25 }
 0x4fc   : > { %v2029_v33 = vpack.c.bf16 %v2015_v27, %v2014_v23  ;;  %3172 = vst [vmem:[%s5499_s19 + $0x18] sm:$0xff] %v2015_v27 }
 0x4fd   : > { %v4272_v35 = vpop.eup %4271  ;;  %4277 = vpow2.f32 %v1962_v28  ;;  %v1909_v36 = vpop.f32.mrb[48].mxu1 }
 0x4fe   : > { %v5525_v38 = vadd.f32 %v1909_v36, %v5456_v31  ;;  %v1911_v39 = vpop.f32.mrb[49].mxu1  ;;  %3939 = vmatmul.mubr.bf16.vlgmr.msra.gmra.mrb[48].mxu0 %v2029_v33  ;;  %v2000_v40 = vmul.f32 %v4272_v35, %v1984_v30  ;;  %v1990_v30 = vld [vmem:[%s5238_s11 + $0x50] sm:$0xff]  ;;  %v1991_v36 = vld [vmem:[%s5238_s11 + $0x58] sm:$0xff] }
 0x4ff   : > { %v4274_v41 = vpop.eup %4273  ;;  %v1912_v42 = vadd.f32 %v1911_v39, %v5459_v32  ;;  %v1913_v43 = vpop.f32.mrb[50].mxu1  ;;  %3955 = vmatpush3.bf16.msra.mxu0 %v5452_v29 }
 0x500   : > { %3145 = vst [vmem:[%s5464_s18 + $0x40] sm:$0xff] %v5525_v38  ;;  %v5532_v44 = vadd.f32 %v1913_v43, %v5456_v31  ;;  %v1915_v45 = vpop.f32.mrb[51].mxu1  ;;  %v2001_v46 = vmul.f32 %v4274_v41, %v1985_v37  ;;  %v2016_v47 = vadd.f32 %v2000_v40, %v5486_v61  ;;  %3956 = vmatprep.subr.bf16.mxu0 %v4220_v34 }
 0x501   : > { %v1964_v50 = vmul.f32 1.442695, %v1912_v42  ;;  %3161 = vst [vmem:[%s5469_s1 + $0x40] sm:$0xff] %v1912_v42  ;;  %v1916_v54 = vadd.f32 %v1915_v45, %v5459_v32 }
 0x502   : > { %3146 = vst [vmem:[%s5464_s18 + $0x48] sm:$0xff] %v5532_v44  ;;  %v2017_v29 = vadd.f32 %v2001_v46, %v5492_v4  ;;  %3173 = vst [vmem:[%s5499_s19 + $0x20] sm:$0xff] %v2016_v47 }
 0x503   : > { %4279 = vpow2.f32 %v1964_v50  ;;  %v1966_v55 = vmul.f32 1.442695, %v1916_v54  ;;  %3162 = vst [vmem:[%s5469_s1 + $0x48] sm:$0xff] %v1916_v54  ;;  %3957 = vmatpush3.bf16.msra.mxu0 %v4220_v34 }
 0x504   : > { %v2030_v57 = vpack.c.bf16 %v2017_v29, %v2016_v47  ;;  %3174 = vst [vmem:[%s5499_s19 + $0x28] sm:$0xff] %v2017_v29  ;;  %3958 = vmatprep.subr.bf16.mxu0 %v4221_v48 }
 0x505   : > { %v4276_v58 = vpop.eup %4275  ;;  %4281 = vpow2.f32 %v1966_v55  ;;  %v1919_v59 = vpop.f32.mrb[52].mxu1 }
 0x506   : > { %v5546_v61 = vadd.f32 %v1919_v59, %v5456_v31  ;;  %v1921_v62 = vpop.f32.mrb[53].mxu1  ;;  %3942 = vmatprep.mubr.bf16.mxu0 %v2030_v57  ;;  %v2002_v63 = vmul.f32 %v4276_v58, %v1986_v56  ;;  %v1993_v56 = vld [vmem:[%s5238_s11 + $0x68] sm:$0xff] }
 0x507   : > { %v4278_v1 = vpop.eup %4277  ;;  %v1922_v2 = vadd.f32 %v1921_v62, %v5459_v32  ;;  %v1923_v3 = vpop.f32.mrb[54].mxu1  ;;  %3959 = vmatpush3.bf16.msra.mxu0 %v4221_v48 }
 0x508   : > { %3147 = vst [vmem:[%s5464_s18 + $0x50] sm:$0xff] %v5546_v61  ;;  %v5552_v4 = vadd.f32 %v1923_v3, %v5456_v31  ;;  %v1925_v5 = vpop.f32.mrb[55].mxu1  ;;  %v2003_v6 = vmul.f32 %v4278_v1, %v1987_v60  ;;  %v2018_v7 = vadd.f32 %v2002_v63, %v5507_v26  ;;  %v1995_v1 = vld [vmem:[%s5238_s11 + $0x78] sm:$0xff] }
 0x509   : > { %v1968_v8 = vmul.f32 1.442695, %v1922_v2  ;;  %3163 = vst [vmem:[%s5469_s1 + $0x50] sm:$0xff] %v1922_v2  ;;  %v1926_v9 = vadd.f32 %v1925_v5, %v5459_v32 }
 0x50a   : > { %3148 = vst [vmem:[%s5464_s18 + $0x58] sm:$0xff] %v5552_v4  ;;  %v2019_v10 = vadd.f32 %v2003_v6, %v5513_v21  ;;  %3175 = vst [vmem:[%s5499_s19 + $0x30] sm:$0xff] %v2018_v7 }
 0x50b   : > { %4283 = vpow2.f32 %v1968_v8  ;;  %v1970_v12 = vmul.f32 1.442695, %v1926_v9  ;;  %3164 = vst [vmem:[%s5469_s1 + $0x58] sm:$0xff] %v1926_v9  ;;  %v4222_v8 = vld [vmem:[#allocation13 + $0x18] sm:$0xff]   ;;  %v4223_v9 = vld [vmem:[#allocation14] ss:$8 sps:$4 sm:$0xff]  }
 0x50c   : > { %v2031_v14 = vpack.c.bf16 %v2019_v10, %v2018_v7  ;;  %3176 = vst [vmem:[%s5499_s19 + $0x38] sm:$0xff] %v2019_v10  ;;  %3960 = vmatprep.subr.bf16.mxu0 %v4222_v8  ;;  %v4225_v10 = vld [vmem:[#allocation14 + $0x4] ss:$8 sps:$4 sm:$0xff]  }
 0x50d   : > { %v4280_v15 = vpop.eup %4279  ;;  %4285 = vpow2.f32 %v1970_v12  ;;  %v1929_v16 = vpop.f32.mrb[56].mxu1  ;;  %3961 = vmatpush3.bf16.msra.mxu0 %v4222_v8  ;;  %v4228_v12 = vld [vmem:[#allocation14 + $0x14] ss:$8 sps:$4 sm:$0xff]   ;;  %2584 = vmatprep.subr.bf16.mxu1 %v4225_v10 }
 0x50e   : > { %v1930_v53 = vadd.f32 %v1929_v16, %v5456_v31  ;;  %v1931_v26 = vpop.f32.mrb[57].mxu1  ;;  %3943 = vmatmul.mubr.bf16.gmra.mrb[52].mxu0 %v2031_v14  ;;  %v2004_v17 = vmul.f32 %v4280_v15, %v1988_v13  ;;  %2585 = vmatpush1.bf16.msra.mxu1 %v4223_v9  ;;  %v4226_v13 = vld [vmem:[#allocation14 + $0x10] ss:$8 sps:$4 sm:$0xff]   ;;  %v4231_v14 = vld [vmem:[#allocation14 + $0x24] ss:$8 sps:$4 sm:$0xff]  }
 0x50f   : > { %v4282_v18 = vpop.eup %4281  ;;  %v1932_v19 = vadd.f32 %v1931_v26, %v5459_v32  ;;  %v1933_v20 = vpop.f32.mrb[58].mxu1  ;;  %2586 = vmatprep.subr.bf16.mxu1 %v4228_v12  ;;  %v4229_v15 = vld [vmem:[#allocation14 + $0x20] ss:$8 sps:$4 sm:$0xff]   ;;  %v4234_v16 = vld [vmem:[#allocation14 + $0x34] ss:$8 sps:$4 sm:$0xff]  }
 0x510   : > { %3149 = vst [vmem:[%s5464_s18 + $0x60] sm:$0xff] %v1930_v53  ;;  %v1934_v11 = vadd.f32 %v1933_v20, %v5456_v31  ;;  %v1935_v21 = vpop.f32.mrb[59].mxu1  ;;  %v2005_v22 = vmul.f32 %v4282_v18, %v1989_v52  ;;  %v2020_v23 = vadd.f32 %v2004_v17, %v5525_v38  ;;  %v4232_v52 = vld [vmem:[#allocation14 + $0x30] ss:$8 sps:$4 sm:$0xff]   ;;  %v4235_v26 = vld [vmem:[#allocation14 + $0x40] ss:$8 sps:$4 sm:$0xff]  }
 0x511   : > { %v1972_v24 = vmul.f32 1.442695, %v1932_v19  ;;  %3165 = vst [vmem:[%s5469_s1 + $0x60] sm:$0xff] %v1932_v19  ;;  %v1936_v25 = vadd.f32 %v1935_v21, %v5459_v32  ;;  %v4240_v17 = vld [vmem:[#allocation14 + $0x54] ss:$8 sps:$4 sm:$0xff]  }
 0x512   : > { %3150 = vst [vmem:[%s5464_s18 + $0x68] sm:$0xff] %v1934_v11  ;;  %v2021_v27 = vadd.f32 %v2005_v22, %v5532_v44  ;;  %3177 = vst [vmem:[%s5499_s19 + $0x40] sm:$0xff] %v2020_v23  ;;  %2587 = vmatpush1.bf16.msra.mxu1 %v4226_v13  ;;  %v4238_v18 = vld [vmem:[#allocation14 + $0x50] ss:$8 sps:$4 sm:$0xff]   ;;  %v4243_v19 = vld [vmem:[#allocation14 + $0x64] ss:$8 sps:$4 sm:$0xff]  }
 0x513   : > { %4287 = vpow2.f32 %v1972_v24  ;;  %v1974_v28 = vmul.f32 1.442695, %v1936_v25  ;;  %3166 = vst [vmem:[%s5469_s1 + $0x68] sm:$0xff] %v1936_v25  ;;  %2588 = vmatprep.subr.bf16.mxu1 %v4231_v14  ;;  %v4241_v20 = vld [vmem:[#allocation14 + $0x60] ss:$8 sps:$4 sm:$0xff]  }
 0x514   : > { %v2032_v33 = vpack.c.bf16 %v2021_v27, %v2020_v23  ;;  %3178 = vst [vmem:[%s5499_s19 + $0x48] sm:$0xff] %v2021_v27 }
 0x515   : > { %v4284_v34 = vpop.eup %4283  ;;  %4289 = vpow2.f32 %v1974_v28  ;;  %v1939_v35 = vpop.f32.mrb[60].mxu1 }
 0x516   : > { %v1940_v37 = vadd.f32 %v1939_v35, %v5456_v31  ;;  %v1941_v38 = vpop.f32.mrb[61].mxu1  ;;  %3946 = vmatprep.mubr.bf16.mxu0 %v2032_v33  ;;  %v2006_v39 = vmul.f32 %v4284_v34, %v1990_v30  ;;  %2589 = vmatpush1.bf16.msra.mxu1 %v4229_v15 }
 0x517   : > { %v4286_v40 = vpop.eup %4285  ;;  %v1942_v41 = vadd.f32 %v1941_v38, %v5459_v32  ;;  %v1943_v42 = vpop.f32.mrb[62].mxu1  ;;  %2590 = vmatprep.subr.bf16.mxu1 %v4234_v16 }
 0x518   : > { %3151 = vst [vmem:[%s5464_s18 + $0x70] sm:$0xff] %v1940_v37  ;;  %v1944_v43 = vadd.f32 %v1943_v42, %v5456_v31  ;;  %v1945_v44 = vpop.f32.mrb[63].mxu1  ;;  %v2007_v45 = vmul.f32 %v4286_v40, %v1991_v36  ;;  %v2022_v46 = vadd.f32 %v2006_v39, %v5546_v61  ;;  %v1992_v31 = vld [vmem:[%s5238_s11 + $0x60] sm:$0xff]  ;;  %v1994_v61 = vld [vmem:[%s5238_s11 + $0x70] sm:$0xff]  ;;  %s6005_s11 = sld [smem:[#allocation46_spill]] }
 0x519   : > { %v1976_v47 = vmul.f32 1.442695, %v1942_v41  ;;  %3167 = vst [vmem:[%s5469_s1 + $0x70] sm:$0xff] %v1942_v41  ;;  %v1946_v48 = vadd.f32 %v1945_v44, %v5459_v32 }
 0x51a   : > { %3152 = vst [vmem:[%s5464_s18 + $0x78] sm:$0xff] %v1944_v43  ;;  %v2023_v50 = vadd.f32 %v2007_v45, %v5552_v4  ;;  %3179 = vst [vmem:[%s5499_s19 + $0x50] sm:$0xff] %v2022_v46  ;;  %2591 = vmatpush1.bf16.msra.mxu1 %v4232_v52 }
 0x51b   : > { %4291 = vpow2.f32 %v1976_v47  ;;  %v1978_v54 = vmul.f32 1.442695, %v1946_v48  ;;  %3168 = vst [vmem:[%s5469_s1 + $0x78] sm:$0xff] %v1946_v48  ;;  %s4619_s1 = scalar_lea.vmem %s4618_s0, 4096 }
 0x51c   : > { %v2033_v29 = vpack.c.bf16 %v2023_v50, %v2022_v46  ;;  %3180 = vst [vmem:[%s5499_s19 + $0x58] sm:$0xff] %v2023_v50  ;;  %p4621_p4 = scmp.lt.s32.totalorder %s4619_s1, %s4613_s8 }
 0x51d   : > { %v4288_v55 = vpop.eup %4287  ;;  %4293 = vpow2.f32 %v1978_v54 }
 0x51e   : > { %3947 = vmatmul.mubr.bf16.gmra.mrb[56].mxu0 %v2033_v29  ;;  %v2008_v57 = vmul.f32 %v4288_v55, %v1992_v31  ;;  %p4622_p10 = por %p4621_p4, %p4620_p8 }
 0x51f   : > { %v4290_v32 = vpop.eup %4289 }
 0x520   : > { %v2009_v58 = vmul.f32 %v4290_v32, %v1993_v56  ;;  %v2024_v59 = vadd.f32 %v2008_v57, %v1930_v53  ;;  %v4237_v53 = vld [vmem:[#allocation14 + $0x44] ss:$8 sps:$4 sm:$0xff]   ;;  %p4623_p11 = pnand %p4622_p10, %p4616_p2 }
 0x521   : > { %2592 = vmatprep.subr.bf16.mxu1 %v4237_v53 }
 0x522   : > { %v2025_v60 = vadd.f32 %v2009_v58, %v1934_v11  ;;  %3181 = vst [vmem:[%s5499_s19 + $0x60] sm:$0xff] %v2024_v59  ;;  %2593 = vmatpush1.bf16.msra.mxu1 %v4235_v26  ;;  %v5602_v11 = vld [vmem:[%s6003_s17] ss:$0 sm:$0xff]  ;;  %s5699_s17 = sshll.u32 %s4940_s29, 11  ;;  %s5716_s29 = scalar_lea.sflag [#allocation19], %s3206_s20 }
 0x523   : > { %2594 = vmatprep.subr.bf16.mxu1 %v4240_v17  ;;  %s5712_s7 = scalar_lea.hbm %s6007_s6, %s5699_s17 }
 0x524   : > { %v2034_v62 = vpack.c.bf16 %v2025_v60, %v2024_v59  ;;  %3182 = vst [vmem:[%s5499_s19 + $0x68] sm:$0xff] %v2025_v60 }
 0x525   : > { %v4292_v63 = vpop.eup %4291 }
 0x526   : > { %3950 = vmatprep.mubr.bf16.mxu0 %v2034_v62  ;;  %v2010_v2 = vmul.f32 %v4292_v63, %v1994_v61  ;;  %2595 = vmatpush1.bf16.msra.mxu1 %v4238_v18 }
 0x527   : > { %v4294_v3 = vpop.eup %4293  ;;  %2596 = vmatprep.subr.bf16.mxu1 %v4243_v19 }
 0x528   : > { %v2011_v4 = vmul.f32 %v4294_v3, %v1995_v1  ;;  %v2026_v5 = vadd.f32 %v2010_v2, %v1940_v37 }
 0x52a   : > { %v2027_v6 = vadd.f32 %v2011_v4, %v1944_v43  ;;  %3183 = vst [vmem:[%s5499_s19 + $0x70] sm:$0xff] %v2026_v5  ;;  %2597 = vmatpush1.bf16.msra.mxu1 %v4241_v20 }
 0x52c   : > { %v2035_v7 = vpack.c.bf16 %v2027_v6, %v2026_v5  ;;  %3184 = vst [vmem:[%s5499_s19 + $0x78] sm:$0xff] %v2027_v6 }
 0x52e   : > { %3951 = vmatmul.mubr.bf16.gmra.mrb[60].mxu0 %v2035_v7 }
 0x5d1   : > { %v3940_v21 = vpop.f32.mrb[48].mxu0 }
 0x5d2   : > { %v2150_v22 = vadd.f32 %v3940_v21, %v5602_v11  ;;  %v2141_v23 = vpop.f32.mrb[49].mxu0 }
 0x5d3   : > { %v2142_v24 = vadd.f32 %v5602_v11, %v2141_v23  ;;  %v3941_v25 = vpop.f32.mrb[50].mxu0 }
 0x5d4   : > { %v2222_v27 = vmul.f32 0.2, %v2150_v22  ;;  %v2153_v28 = vadd.f32 %v3941_v25, %v5602_v11  ;;  %v2144_v30 = vpop.f32.mrb[51].mxu0  ;;  %vm2206_vm1 = vcmp.gt.f32.partialorder %v2150_v22, 0.0 }
 0x5d5   : > { %v2220_v33 = vmul.f32 0.2, %v2142_v24  ;;  %v2145_v34 = vadd.f32 %v5602_v11, %v2144_v30  ;;  %vm2204_vm2 = vcmp.gt.f32.partialorder %v2142_v24, 0.0 }
 0x5d6   : > { %vm2207_vm3 = vcmp.gt.f32.partialorder %v2153_v28, 0.0  ;;  %v2223_v35 = vmul.f32 0.2, %v2153_v28  ;;  %v2238_v37 = vsel %vm2206_vm1, %v2150_v22, %v2222_v27 }
 0x5d7   : > { %vm2205_vm5 = vcmp.gt.f32.partialorder %v2145_v34, 0.0  ;;  %v2221_v36 = vmul.f32 0.2, %v2145_v34  ;;  %v2236_v39 = vsel %vm2204_vm2, %v2142_v24, %v2220_v33 }
 0x5d8   : > { %v2239_v38 = vsel %vm2207_vm3, %v2153_v28, %v2223_v35 }
 0x5d9   : > { %v2253_v40 = vpack.c.bf16 %v2239_v38, %v2238_v37  ;;  %v2237_v41 = vsel %vm2205_vm5, %v2145_v34, %v2221_v36  ;;  %v4246_v37 = vld [vmem:[#allocation14 + $0x74] ss:$8 sps:$4 sm:$0xff]   ;;  %v4244_v38 = vld [vmem:[#allocation14 + $0x70] ss:$8 sps:$4 sm:$0xff]  }
 0x5da   : > { %v2252_v42 = vpack.c.bf16 %v2237_v41, %v2236_v39  ;;  %2598 = vmatprep.subr.bf16.mxu1 %v4246_v37  ;;  %v4248_v39 = vld [vmem:[#allocation16] sm:$0xff]   ;;  %v4250_v41 = vld [vmem:[#allocation16 + $0x8] sm:$0xff]  }
 0x5db   : > { %2599 = vmatpush1.bf16.msra.mxu1 %v4244_v38 }
 0x5dc   : > { %3962 = vmatprep.mubr.msk.bf16.mxu0 %vm1810_vm4, %v2252_v42  ;;  %v4251_v42 = vld [vmem:[#allocation16 + $0x50] sm:$0xff]  }
 0x5dd   : > { %3963 = vmatmul.mubr.msk.bf16.vlgmr.msra.gmra.mrb[64].mxu0 %vm1810_vm4, %v2253_v40  ;;  %v4249_v40 = vld [vmem:[#allocation16 + $0x48] sm:$0xff]  }
 0x5e1   : > { %v3944_v43 = vpop.f32.mrb[52].mxu0 }
 0x5e2   : > { %v2166_v44 = vadd.f32 %v3944_v43, %v5602_v11  ;;  %v2157_v45 = vpop.f32.mrb[53].mxu0  ;;  %v4252_v43 = vld [vmem:[#allocation16 + $0x10] sm:$0xff]  }
 0x5e3   : > { %v2158_v46 = vadd.f32 %v5602_v11, %v2157_v45  ;;  %v3945_v47 = vpop.f32.mrb[54].mxu0  ;;  %v4254_v45 = vld [vmem:[#allocation16 + $0x18] sm:$0xff]  }
 0x5e4   : > { %v2226_v48 = vmul.f32 0.2, %v2166_v44  ;;  %v2169_v50 = vadd.f32 %v3945_v47, %v5602_v11  ;;  %v2160_v54 = vpop.f32.mrb[55].mxu0  ;;  %vm2210_vm6 = vcmp.gt.f32.partialorder %v2166_v44, 0.0  ;;  %v4256_v47 = vld [vmem:[#allocation16 + $0x20] sm:$0xff]  }
 0x5e5   : > { %v2224_v31 = vmul.f32 0.2, %v2158_v46  ;;  %v2161_v29 = vadd.f32 %v5602_v11, %v2160_v54  ;;  %vm2208_vm7 = vcmp.gt.f32.partialorder %v2158_v46, 0.0 }
 0x5e6   : > { %vm2211_vm8 = vcmp.gt.f32.partialorder %v2169_v50, 0.0  ;;  %v2227_v55 = vmul.f32 0.2, %v2169_v50  ;;  %v2242_v57 = vsel %vm2210_vm6, %v2166_v44, %v2226_v48  ;;  %v4253_v44 = vld [vmem:[#allocation16 + $0x58] sm:$0xff]  }
 0x5e7   : > { %vm2209_vm9 = vcmp.gt.f32.partialorder %v2161_v29, 0.0  ;;  %v2225_v56 = vmul.f32 0.2, %v2161_v29  ;;  %v2240_v58 = vsel %vm2208_vm7, %v2158_v46, %v2224_v31  ;;  %v4255_v46 = vld [vmem:[#allocation16 + $0x60] sm:$0xff]   ;;  %v5631_v48 = vld [vmem:[%s6004_s10] ss:$0 sm:$0xff] }
 0x5e8   : > { %v2243_v32 = vsel %vm2211_vm8, %v2169_v50, %v2227_v55  ;;  %s6006_s10 = sld [smem:[#allocation50_spill]] }
 0x5e9   : > { %v2255_v59 = vpack.c.bf16 %v2243_v32, %v2242_v57  ;;  %v2241_v60 = vsel %vm2209_vm9, %v2161_v29, %v2225_v56 }
 0x5ea   : > { %v2254_v61 = vpack.c.bf16 %v2241_v60, %v2240_v58 }
 0x5ec   : > { %3966 = vmatprep.mubr.msk.bf16.mxu0 %vm1810_vm4, %v2254_v61 }
 0x5ed   : > { %3967 = vmatmul.mubr.msk.bf16.gmra.mrb[68].mxu0 %vm1810_vm4, %v2255_v59 }
 0x5ee   : > { %s5705_s15 = scalar_lea.hbm %s6006_s10, %s5699_s17 }
 0x5f1   : > { %v3948_v62 = vpop.f32.mrb[56].mxu0 }
 0x5f2   : > { %v2182_v63 = vadd.f32 %v3948_v62, %v5602_v11  ;;  %v2173_v1 = vpop.f32.mrb[57].mxu0 }
 0x5f3   : > { %v2174_v2 = vadd.f32 %v5602_v11, %v2173_v1  ;;  %v3949_v3 = vpop.f32.mrb[58].mxu0 }
 0x5f4   : > { %v2230_v4 = vmul.f32 0.2, %v2182_v63  ;;  %v2185_v5 = vadd.f32 %v3949_v3, %v5602_v11  ;;  %v2176_v6 = vpop.f32.mrb[59].mxu0  ;;  %vm2214_vm10 = vcmp.gt.f32.partialorder %v2182_v63, 0.0 }
 0x5f5   : > { %v2228_v7 = vmul.f32 0.2, %v2174_v2  ;;  %v2177_v8 = vadd.f32 %v5602_v11, %v2176_v6  ;;  %vm2212_vm11 = vcmp.gt.f32.partialorder %v2174_v2, 0.0 }
 0x5f6   : > { %vm2215_vm12 = vcmp.gt.f32.partialorder %v2185_v5, 0.0  ;;  %v2231_v9 = vmul.f32 0.2, %v2185_v5  ;;  %v2246_v12 = vsel %vm2214_vm10, %v2182_v63, %v2230_v4 }
 0x5f7   : > { %vm2213_vm13 = vcmp.gt.f32.partialorder %v2177_v8, 0.0  ;;  %v2229_v10 = vmul.f32 0.2, %v2177_v8  ;;  %v2244_v14 = vsel %vm2212_vm11, %v2174_v2, %v2228_v7 }
 0x5f8   : > { %v2247_v13 = vsel %vm2215_vm12, %v2185_v5, %v2231_v9 }
 0x5f9   : > { %v2257_v15 = vpack.c.bf16 %v2247_v13, %v2246_v12  ;;  %v2245_v16 = vsel %vm2213_vm13, %v2177_v8, %v2229_v10 }
 0x5fa   : > { %v2256_v52 = vpack.c.bf16 %v2245_v16, %v2244_v14 }
 0x5fc   : > { %3970 = vmatprep.mubr.msk.bf16.mxu0 %vm1810_vm4, %v2256_v52 }
 0x5fd   : > { %3971 = vmatmul.mubr.msk.bf16.gmra.mrb[72].mxu0 %vm1810_vm4, %v2257_v15 }
 0x601   : > { %v3952_v53 = vpop.f32.mrb[60].mxu0 }
 0x602   : > { %v2198_v26 = vadd.f32 %v3952_v53, %v5602_v11  ;;  %v2189_v17 = vpop.f32.mrb[61].mxu0 }
 0x603   : > { %v2190_v18 = vadd.f32 %v5602_v11, %v2189_v17  ;;  %v3953_v19 = vpop.f32.mrb[62].mxu0 }
 0x604   : > { %v2234_v20 = vmul.f32 0.2, %v2198_v26  ;;  %v2201_v21 = vadd.f32 %v3953_v19, %v5602_v11  ;;  %v2192_v22 = vpop.f32.mrb[63].mxu0  ;;  %vm2218_vm14 = vcmp.gt.f32.partialorder %v2198_v26, 0.0 }
 0x605   : > { %v2232_v23 = vmul.f32 0.2, %v2190_v18  ;;  %v2193_v24 = vadd.f32 %v5602_v11, %v2192_v22  ;;  %vm2216_vm15 = vcmp.gt.f32.partialorder %v2190_v18, 0.0  ;;  %v4247_v11 = vld [vmem:[#allocation16 + $0x40] sm:$0xff]  }
 0x606   : > { %vm2219_vm0 = vcmp.gt.f32.partialorder %v2201_v21, 0.0  ;;  %v2235_v25 = vmul.f32 0.2, %v2201_v21  ;;  %v2250_v28 = vsel %vm2218_vm14, %v2198_v26, %v2234_v20  ;;  %3826 = vmatprep.subr.bf16.mxu0 %v4247_v11  ;;  %3978 = vmatprep.subr.bf16.mxu1 %v4247_v11 }
 0x607   : > { %vm2217_vm1 = vcmp.gt.f32.partialorder %v2193_v24, 0.0  ;;  %v2233_v27 = vmul.f32 0.2, %v2193_v24  ;;  %v2248_v33 = vsel %vm2216_vm15, %v2190_v18, %v2232_v23  ;;  %3827 = vmatpush3.bf16.msra.mxu0 %v4248_v39 }
 0x608   : > { %v2251_v30 = vsel %vm2219_vm0, %v2201_v21, %v2235_v25  ;;  %3828 = vmatprep.subr.bf16.mxu0 %v4249_v40 }
 0x609   : > { %v2259_v34 = vpack.c.bf16 %v2251_v30, %v2250_v28  ;;  %v2249_v35 = vsel %vm2217_vm1, %v2193_v24, %v2233_v27 }
 0x60a   : > { %v2258_v36 = vpack.c.bf16 %v2249_v35, %v2248_v33 }
 0x60b   : > { %3829 = vmatpush3.bf16.msra.mxu0 %v4250_v41 }
 0x60c   : > { %3974 = vmatprep.mubr.msk.bf16.mxu0 %vm1810_vm4, %v2258_v36  ;;  %3830 = vmatprep.subr.bf16.mxu0 %v4251_v42 }
 0x60d   : > { %3975 = vmatmul.mubr.msk.bf16.gmra.mrb[76].mxu0 %vm1810_vm4, %v2259_v34 }
 0x60f   : > { %3831 = vmatpush3.bf16.msra.mxu0 %v4252_v43 }
 0x610   : > { %3832 = vmatprep.subr.bf16.mxu0 %v4253_v44 }
 0x613   : > { %3833 = vmatpush3.bf16.msra.mxu0 %v4254_v45 }
 0x614   : > { %3834 = vmatprep.subr.bf16.mxu0 %v4255_v46 }
 0x617   : > { %3835 = vmatpush3.bf16.msra.mxu0 %v4256_v47 }
 0x6b0   : > { %v3964_v50 = vpop.f32.mrb[64].mxu0 }
 0x6b1   : > { %v2366_v54 = vadd.f32 %v3964_v50, %v5631_v48  ;;  %v2357_v31 = vpop.f32.mrb[65].mxu0 }
 0x6b2   : > { %v2358_v29 = vadd.f32 %v5631_v48, %v2357_v31  ;;  %v3965_v55 = vpop.f32.mrb[66].mxu0 }
 0x6b3   : > { %v2438_v56 = vmul.f32 0.2, %v2366_v54  ;;  %v2369_v57 = vadd.f32 %v3965_v55, %v5631_v48  ;;  %v2360_v32 = vpop.f32.mrb[67].mxu0  ;;  %vm2422_vm4 = vcmp.gt.f32.partialorder %v2366_v54, 0.0 }
 0x6b4   : > { %v2436_v58 = vmul.f32 0.2, %v2358_v29  ;;  %v2361_v59 = vadd.f32 %v5631_v48, %v2360_v32  ;;  %vm2420_vm2 = vcmp.gt.f32.partialorder %v2358_v29, 0.0 }
 0x6b5   : > { %vm2423_vm3 = vcmp.gt.f32.partialorder %v2369_v57, 0.0  ;;  %v2439_v60 = vmul.f32 0.2, %v2369_v57  ;;  %v2454_v62 = vsel %vm2422_vm4, %v2366_v54, %v2438_v56 }
 0x6b6   : > { %vm2421_vm5 = vcmp.gt.f32.partialorder %v2361_v59, 0.0  ;;  %v2437_v61 = vmul.f32 0.2, %v2361_v59  ;;  %v2452_v1 = vsel %vm2420_vm2, %v2358_v29, %v2436_v58 }
 0x6b7   : > { %v2455_v63 = vsel %vm2423_vm3, %v2369_v57, %v2439_v60 }
 0x6b8   : > { %v2453_v2 = vsel %vm2421_vm5, %v2361_v59, %v2437_v61  ;;  %v2469_v3 = vpack.c.bf16 %v2455_v63, %v2454_v62  ;;  %v4257_v62 = vld [vmem:[#allocation16 + $0x68] sm:$0xff]  }
 0x6b9   : > { %v2468_v4 = vpack.c.bf16 %v2453_v2, %v2452_v1  ;;  %v4258_v63 = vld [vmem:[#allocation16 + $0x28] sm:$0xff]   ;;  %3836 = vmatprep.subr.bf16.mxu0 %v4257_v62  ;;  %v4260_v1 = vld [vmem:[#allocation16 + $0x30] sm:$0xff]   ;;  %v4261_v2 = vld [vmem:[#allocation16 + $0x78] sm:$0xff]  }
 0x6ba   : > { %3837 = vmatpush3.bf16.msra.mxu0 %v4258_v63 }
 0x6bb   : > { %2617 = vmatmul.mubr.bf16.vlgmr.msra.gmra.mrb[64].mxu1 %v2468_v4 }
 0x6bc   : > { %2626 = vmatprep.mubr.bf16.mxu1 %v4802_v0  ;;  %3986 = vmatpush3.bf16.msra.mxu1 %v4248_v39 }
 0x6bd   : > { %3979 = vmatprep.subr.bf16.mxu1 %v4249_v40 }
 0x6c0   : > { %v3968_v5 = vpop.f32.mrb[68].mxu0  ;;  %3987 = vmatpush3.bf16.msra.mxu1 %v4250_v41 }
 0x6c1   : > { %v2382_v6 = vadd.f32 %v3968_v5, %v5631_v48  ;;  %v2373_v7 = vpop.f32.mrb[69].mxu0  ;;  %3980 = vmatprep.subr.bf16.mxu1 %v4251_v42 }
 0x6c2   : > { %v2374_v8 = vadd.f32 %v5631_v48, %v2373_v7  ;;  %v3969_v9 = vpop.f32.mrb[70].mxu0 }
 0x6c3   : > { %v2442_v10 = vmul.f32 0.2, %v2382_v6  ;;  %v2385_v12 = vadd.f32 %v3969_v9, %v5631_v48  ;;  %v2376_v13 = vpop.f32.mrb[71].mxu0  ;;  %2627 = vmatmul.mubr.bf16.gmra.mrb[68].mxu1 %v2469_v3  ;;  %vm2426_vm6 = vcmp.gt.f32.partialorder %v2382_v6, 0.0  ;;  %v4262_v3 = vld [vmem:[#allocation16 + $0x38] sm:$0xff]  }
 0x6c4   : > { %v2440_v14 = vmul.f32 0.2, %v2374_v8  ;;  %v2377_v15 = vadd.f32 %v5631_v48, %v2376_v13  ;;  %2636 = vmatprep.mubr.bf16.mxu1 %v4802_v0  ;;  %3988 = vmatpush3.bf16.msra.mxu1 %v4252_v43  ;;  %vm2424_vm7 = vcmp.gt.f32.partialorder %v2374_v8, 0.0 }
 0x6c5   : > { %vm2427_vm8 = vcmp.gt.f32.partialorder %v2385_v12, 0.0  ;;  %v2443_v16 = vmul.f32 0.2, %v2385_v12  ;;  %3981 = vmatprep.subr.bf16.mxu1 %v4253_v44  ;;  %v2458_v53 = vsel %vm2426_vm6, %v2382_v6, %v2442_v10 }
 0x6c6   : > { %vm2425_vm9 = vcmp.gt.f32.partialorder %v2377_v15, 0.0  ;;  %v2441_v52 = vmul.f32 0.2, %v2377_v15  ;;  %v2456_v17 = vsel %vm2424_vm7, %v2374_v8, %v2440_v14 }
 0x6c7   : > { %v2459_v26 = vsel %vm2427_vm8, %v2385_v12, %v2443_v16 }
 0x6c8   : > { %v2457_v18 = vsel %vm2425_vm9, %v2377_v15, %v2441_v52  ;;  %v2471_v19 = vpack.c.bf16 %v2459_v26, %v2458_v53  ;;  %3989 = vmatpush3.bf16.msra.mxu1 %v4254_v45 }
 0x6c9   : > { %v2470_v20 = vpack.c.bf16 %v2457_v18, %v2456_v17  ;;  %3982 = vmatprep.subr.bf16.mxu1 %v4255_v46 }
 0x6cb   : > { %2637 = vmatmul.mubr.bf16.gmra.mrb[72].mxu1 %v2470_v20 }
 0x6cc   : > { %2646 = vmatprep.mubr.bf16.mxu1 %v4802_v0  ;;  %3990 = vmatpush3.bf16.msra.mxu1 %v4256_v47 }
 0x6cd   : > { %3983 = vmatprep.subr.bf16.mxu1 %v4257_v62 }
 0x6d0   : > { %v3972_v21 = vpop.f32.mrb[72].mxu0  ;;  %3991 = vmatpush3.bf16.msra.mxu1 %v4258_v63 }
 0x6d1   : > { %v2398_v22 = vadd.f32 %v3972_v21, %v5631_v48  ;;  %v2389_v23 = vpop.f32.mrb[73].mxu0 }
 0x6d2   : > { %v2390_v24 = vadd.f32 %v5631_v48, %v2389_v23  ;;  %v3973_v25 = vpop.f32.mrb[74].mxu0 }
 0x6d3   : > { %v2446_v27 = vmul.f32 0.2, %v2398_v22  ;;  %v2401_v28 = vadd.f32 %v3973_v25, %v5631_v48  ;;  %v2392_v30 = vpop.f32.mrb[75].mxu0  ;;  %2647 = vmatmul.mubr.bf16.gmra.mrb[76].mxu1 %v2471_v19  ;;  %vm2430_vm10 = vcmp.gt.f32.partialorder %v2398_v22, 0.0 }
 0x6d4   : > { %v2444_v33 = vmul.f32 0.2, %v2390_v24  ;;  %v2393_v34 = vadd.f32 %v5631_v48, %v2392_v30  ;;  %2656 = vmatprep.mubr.bf16.mxu1 %v4802_v0  ;;  %vm2428_vm11 = vcmp.gt.f32.partialorder %v2390_v24, 0.0 }
 0x6d5   : > { %vm2431_vm12 = vcmp.gt.f32.partialorder %v2401_v28, 0.0  ;;  %v2447_v35 = vmul.f32 0.2, %v2401_v28  ;;  %v2462_v37 = vsel %vm2430_vm10, %v2398_v22, %v2446_v27 }
 0x6d6   : > { %vm2429_vm13 = vcmp.gt.f32.partialorder %v2393_v34, 0.0  ;;  %v2445_v36 = vmul.f32 0.2, %v2393_v34  ;;  %v2460_v11 = vsel %vm2428_vm11, %v2390_v24, %v2444_v33 }
 0x6d7   : > { %v2463_v38 = vsel %vm2431_vm12, %v2401_v28, %v2447_v35 }
 0x6d8   : > { %v2461_v39 = vsel %vm2429_vm13, %v2393_v34, %v2445_v36  ;;  %v2473_v40 = vpack.c.bf16 %v2463_v38, %v2462_v37 }
 0x6d9   : > { %v2472_v41 = vpack.c.bf16 %v2461_v39, %v2460_v11 }
 0x6db   : > { %2657 = vmatmul.mubr.bf16.gmra.mrb[80].mxu1 %v2472_v41 }
 0x6dc   : > { %2666 = vmatprep.mubr.bf16.mxu1 %v4802_v0 }
 0x6e0   : > { %v3976_v42 = vpop.f32.mrb[76].mxu0 }
 0x6e1   : > { %v2414_v43 = vadd.f32 %v3976_v42, %v5631_v48  ;;  %v2405_v44 = vpop.f32.mrb[77].mxu0 }
 0x6e2   : > { %v2406_v45 = vadd.f32 %v5631_v48, %v2405_v44  ;;  %v3977_v46 = vpop.f32.mrb[78].mxu0 }
 0x6e3   : > { %v2450_v47 = vmul.f32 0.2, %v2414_v43  ;;  %v2417_v50 = vadd.f32 %v3977_v46, %v5631_v48  ;;  %v2408_v54 = vpop.f32.mrb[79].mxu0  ;;  %2667 = vmatmul.mubr.bf16.gmra.mrb[84].mxu1 %v2473_v40  ;;  %vm2434_vm14 = vcmp.gt.f32.partialorder %v2414_v43, 0.0 }
 0x6e4   : > { %v2448_v31 = vmul.f32 0.2, %v2406_v45  ;;  %v2409_v29 = vadd.f32 %v5631_v48, %v2408_v54  ;;  %2676 = vmatprep.mubr.bf16.mxu1 %v4802_v0  ;;  %vm2432_vm15 = vcmp.gt.f32.partialorder %v2406_v45, 0.0  ;;  %v4259_v48 = vld [vmem:[#allocation16 + $0x70] sm:$0xff]  }
 0x6e5   : > { %vm2435_vm0 = vcmp.gt.f32.partialorder %v2417_v50, 0.0  ;;  %v2451_v55 = vmul.f32 0.2, %v2417_v50  ;;  %v2466_v57 = vsel %vm2434_vm14, %v2414_v43, %v2450_v47  ;;  %3838 = vmatprep.subr.bf16.mxu0 %v4259_v48  ;;  %3984 = vmatprep.subr.bf16.mxu1 %v4259_v48 }
 0x6e6   : > { %vm2433_vm1 = vcmp.gt.f32.partialorder %v2409_v29, 0.0  ;;  %v2449_v56 = vmul.f32 0.2, %v2409_v29  ;;  %v2464_v58 = vsel %vm2432_vm15, %v2406_v45, %v2448_v31  ;;  %3839 = vmatpush3.bf16.msra.mxu0 %v4260_v1  ;;  %3992 = vmatpush3.bf16.msra.mxu1 %v4260_v1 }
 0x6e7   : > { %v2467_v32 = vsel %vm2435_vm0, %v2417_v50, %v2451_v55  ;;  %3840 = vmatprep.subr.bf16.mxu0 %v4261_v2  ;;  %3985 = vmatprep.subr.bf16.mxu1 %v4261_v2 }
 0x6e8   : > { %v2465_v59 = vsel %vm2433_vm1, %v2409_v29, %v2449_v56  ;;  %v2475_v60 = vpack.c.bf16 %v2467_v32, %v2466_v57 }
 0x6e9   : > { %v2474_v61 = vpack.c.bf16 %v2465_v59, %v2464_v58 }
 0x6ea   : > { %3841 = vmatpush3.bf16.msra.mxu0 %v4262_v3  ;;  %3993 = vmatpush3.bf16.msra.mxu1 %v4262_v3 }
 0x6eb   : > { %2677 = vmatmul.mubr.bf16.gmra.mrb[88].mxu1 %v2474_v61 }
 0x6ec   : > { %2686 = vmatprep.mubr.bf16.mxu1 %v4802_v0  ;;  %v2492_v0 = vld [vmem:[%s6005_s11] sm:$0x3] }
 0x6ed   : > { %v5660_v4 = vrot.slane %v2492_v0, %v5300_v49  ;;  %v5663_v5 = vrot.slane %v2492_v0, %v5305_v51 }
 0x6f3   : > { %2687 = vmatmul.mubr.bf16.gmra.mrb[92].mxu1 %v2475_v60 }
 0x78e   : > { %v2618_v6 = vpop.f32.mrb[64].mxu1 }
 0x78f   : > { %v2619_v7 = vadd.f32 %v2618_v6, %v5660_v4  ;;  %v2620_v8 = vpop.f32.mrb[65].mxu1 }
 0x790   : > { %v2621_v9 = vadd.f32 %v2620_v8, %v5663_v5  ;;  %v2622_v10 = vpop.f32.mrb[66].mxu1 }
 0x791   : > { %v2729_v12 = vmul.f32 0.2, %v2619_v7  ;;  %v2623_v13 = vadd.f32 %v2622_v10, %v5660_v4  ;;  %v2624_v14 = vpop.f32.mrb[67].mxu1  ;;  %vm2697_vm4 = vcmp.gt.f32.partialorder %v2619_v7, 0.0 }
 0x792   : > { %v2730_v15 = vmul.f32 0.2, %v2621_v9  ;;  %v2625_v16 = vadd.f32 %v2624_v14, %v5663_v5  ;;  %vm2698_vm2 = vcmp.gt.f32.partialorder %v2621_v9, 0.0 }
 0x793   : > { %vm2699_vm3 = vcmp.gt.f32.partialorder %v2623_v13, 0.0  ;;  %v2731_v49 = vmul.f32 0.2, %v2623_v13  ;;  %v2761_v52 = vsel %vm2697_vm4, %v2619_v7, %v2729_v12 }
 0x794   : > { %vm2700_vm5 = vcmp.gt.f32.partialorder %v2625_v16, 0.0  ;;  %v2732_v51 = vmul.f32 0.2, %v2625_v16  ;;  %v2762_v18 = vsel %vm2698_vm2, %v2621_v9, %v2730_v15 }
 0x795   : > { %v2763_v53 = vsel %vm2699_vm3, %v2623_v13, %v2731_v49 }
 0x796   : > { %v2793_v26 = vpack.c.bf16 %v2763_v53, %v2761_v52  ;;  %v2628_v17 = vpop.f32.mrb[68].mxu1  ;;  %v2764_v19 = vsel %vm2700_vm5, %v2625_v16, %v2732_v51 }
 0x797   : > { %v2629_v20 = vadd.f32 %v2628_v17, %v5660_v4  ;;  %v2630_v21 = vpop.f32.mrb[69].mxu1  ;;  %v2794_v22 = vpack.c.bf16 %v2764_v19, %v2762_v18 }
 0x798   : > { %v2631_v23 = vadd.f32 %v2630_v21, %v5663_v5  ;;  %v2632_v24 = vpop.f32.mrb[70].mxu1 }
 0x799   : > { %v2733_v25 = vmul.f32 0.2, %v2629_v20  ;;  %v2633_v27 = vadd.f32 %v2632_v24, %v5660_v4  ;;  %v2634_v28 = vpop.f32.mrb[71].mxu1  ;;  %2976 = vmatprep.mubr.bf16.mxu0 %v2794_v22  ;;  %vm2701_vm6 = vcmp.gt.f32.partialorder %v2629_v20, 0.0 }
 0x79a   : > { %v2734_v30 = vmul.f32 0.2, %v2631_v23  ;;  %v2635_v33 = vadd.f32 %v2634_v28, %v5663_v5  ;;  %2977 = vmatmul.mubr.bf16.vlgmr.msra.gmra.mrb[80].mxu0 %v2793_v26  ;;  %vm2702_vm7 = vcmp.gt.f32.partialorder %v2631_v23, 0.0 }
 0x79b   : > { %vm2703_vm8 = vcmp.gt.f32.partialorder %v2633_v27, 0.0  ;;  %v2735_v34 = vmul.f32 0.2, %v2633_v27  ;;  %v2765_v36 = vsel %vm2701_vm6, %v2629_v20, %v2733_v25 }
 0x79c   : > { %vm2704_vm9 = vcmp.gt.f32.partialorder %v2635_v33, 0.0  ;;  %v2736_v35 = vmul.f32 0.2, %v2635_v33  ;;  %v2766_v11 = vsel %vm2702_vm7, %v2631_v23, %v2734_v30 }
 0x79d   : > { %v2767_v37 = vsel %vm2703_vm8, %v2633_v27, %v2735_v34 }
 0x79e   : > { %v2638_v38 = vpop.f32.mrb[72].mxu1  ;;  %v2768_v39 = vsel %vm2704_vm9, %v2635_v33, %v2736_v35  ;;  %v2795_v40 = vpack.c.bf16 %v2767_v37, %v2765_v36 }
 0x79f   : > { %v2639_v41 = vadd.f32 %v2638_v38, %v5660_v4  ;;  %v2640_v42 = vpop.f32.mrb[73].mxu1  ;;  %v2796_v43 = vpack.c.bf16 %v2768_v39, %v2766_v11 }
 0x7a0   : > { %v2641_v44 = vadd.f32 %v2640_v42, %v5663_v5  ;;  %v2642_v45 = vpop.f32.mrb[74].mxu1 }
 0x7a1   : > { %v2737_v46 = vmul.f32 0.2, %v2639_v41  ;;  %v2643_v47 = vadd.f32 %v2642_v45, %v5660_v4  ;;  %v2644_v50 = vpop.f32.mrb[75].mxu1  ;;  %2984 = vmatprep.mubr.bf16.mxu0 %v2796_v43  ;;  %vm2705_vm10 = vcmp.gt.f32.partialorder %v2639_v41, 0.0 }
 0x7a2   : > { %v2738_v54 = vmul.f32 0.2, %v2641_v44  ;;  %v2645_v31 = vadd.f32 %v2644_v50, %v5663_v5  ;;  %2985 = vmatmul.mubr.bf16.gmra.mrb[84].mxu0 %v2795_v40  ;;  %vm2706_vm11 = vcmp.gt.f32.partialorder %v2641_v44, 0.0 }
 0x7a3   : > { %vm2707_vm12 = vcmp.gt.f32.partialorder %v2643_v47, 0.0  ;;  %v2739_v29 = vmul.f32 0.2, %v2643_v47  ;;  %v2769_v56 = vsel %vm2705_vm10, %v2639_v41, %v2737_v46 }
 0x7a4   : > { %vm2708_vm13 = vcmp.gt.f32.partialorder %v2645_v31, 0.0  ;;  %v2740_v55 = vmul.f32 0.2, %v2645_v31  ;;  %v2770_v58 = vsel %vm2706_vm11, %v2641_v44, %v2738_v54 }
 0x7a5   : > { %v2771_v57 = vsel %vm2707_vm12, %v2643_v47, %v2739_v29 }
 0x7a6   : > { %v2648_v32 = vpop.f32.mrb[76].mxu1  ;;  %v2772_v59 = vsel %vm2708_vm13, %v2645_v31, %v2740_v55  ;;  %v2797_v60 = vpack.c.bf16 %v2771_v57, %v2769_v56 }
 0x7a7   : > { %v2649_v61 = vadd.f32 %v2648_v32, %v5660_v4  ;;  %v2650_v62 = vpop.f32.mrb[77].mxu1  ;;  %v2798_v63 = vpack.c.bf16 %v2772_v59, %v2770_v58 }
 0x7a8   : > { %v2651_v48 = vadd.f32 %v2650_v62, %v5663_v5  ;;  %v2652_v1 = vpop.f32.mrb[78].mxu1 }
 0x7a9   : > { %v2741_v2 = vmul.f32 0.2, %v2649_v61  ;;  %v2653_v3 = vadd.f32 %v2652_v1, %v5660_v4  ;;  %v2654_v0 = vpop.f32.mrb[79].mxu1  ;;  %2992 = vmatprep.mubr.bf16.mxu0 %v2798_v63  ;;  %vm2709_vm14 = vcmp.gt.f32.partialorder %v2649_v61, 0.0 }
 0x7aa   : > { %v2742_v6 = vmul.f32 0.2, %v2651_v48  ;;  %v2655_v7 = vadd.f32 %v2654_v0, %v5663_v5  ;;  %2993 = vmatmul.mubr.bf16.gmra.mrb[88].mxu0 %v2797_v60  ;;  %vm2710_vm15 = vcmp.gt.f32.partialorder %v2651_v48, 0.0 }
 0x7ab   : > { %vm2711_vm0 = vcmp.gt.f32.partialorder %v2653_v3, 0.0  ;;  %v2743_v8 = vmul.f32 0.2, %v2653_v3  ;;  %v2773_v10 = vsel %vm2709_vm14, %v2649_v61, %v2741_v2 }
 0x7ac   : > { %vm2712_vm1 = vcmp.gt.f32.partialorder %v2655_v7, 0.0  ;;  %v2744_v9 = vmul.f32 0.2, %v2655_v7  ;;  %v2774_v14 = vsel %vm2710_vm15, %v2651_v48, %v2742_v6 }
 0x7ad   : > { %v2775_v12 = vsel %vm2711_vm0, %v2653_v3, %v2743_v8 }
 0x7ae   : > { %v2658_v13 = vpop.f32.mrb[80].mxu1  ;;  %v2776_v15 = vsel %vm2712_vm1, %v2655_v7, %v2744_v9  ;;  %v2799_v16 = vpack.c.bf16 %v2775_v12, %v2773_v10 }
 0x7af   : > { %v2659_v49 = vadd.f32 %v2658_v13, %v5660_v4  ;;  %v2660_v51 = vpop.f32.mrb[81].mxu1  ;;  %v2800_v52 = vpack.c.bf16 %v2776_v15, %v2774_v14 }
 0x7b0   : > { %v2661_v53 = vadd.f32 %v2660_v51, %v5663_v5  ;;  %v2662_v26 = vpop.f32.mrb[82].mxu1 }
 0x7b1   : > { %v2745_v17 = vmul.f32 0.2, %v2659_v49  ;;  %v2663_v18 = vadd.f32 %v2662_v26, %v5660_v4  ;;  %v2664_v19 = vpop.f32.mrb[83].mxu1  ;;  %3000 = vmatprep.mubr.bf16.mxu0 %v2800_v52  ;;  %vm2713_vm4 = vcmp.gt.f32.partialorder %v2659_v49, 0.0 }
 0x7b2   : > { %v2746_v20 = vmul.f32 0.2, %v2661_v53  ;;  %v2665_v21 = vadd.f32 %v2664_v19, %v5663_v5  ;;  %3001 = vmatmul.mubr.bf16.gmra.mrb[92].mxu0 %v2799_v16  ;;  %vm2714_vm2 = vcmp.gt.f32.partialorder %v2661_v53, 0.0 }
 0x7b3   : > { %vm2715_vm3 = vcmp.gt.f32.partialorder %v2663_v18, 0.0  ;;  %v2747_v22 = vmul.f32 0.2, %v2663_v18  ;;  %v2777_v24 = vsel %vm2713_vm4, %v2659_v49, %v2745_v17 }
 0x7b4   : > { %vm2716_vm5 = vcmp.gt.f32.partialorder %v2665_v21, 0.0  ;;  %v2748_v23 = vmul.f32 0.2, %v2665_v21  ;;  %v2778_v28 = vsel %vm2714_vm2, %v2661_v53, %v2746_v20 }
 0x7b5   : > { %v2779_v25 = vsel %vm2715_vm3, %v2663_v18, %v2747_v22 }
 0x7b6   : > { %v2668_v27 = vpop.f32.mrb[84].mxu1  ;;  %v2780_v30 = vsel %vm2716_vm5, %v2665_v21, %v2748_v23  ;;  %v2801_v33 = vpack.c.bf16 %v2779_v25, %v2777_v24 }
 0x7b7   : > { %v2669_v34 = vadd.f32 %v2668_v27, %v5660_v4  ;;  %v2670_v35 = vpop.f32.mrb[85].mxu1  ;;  %v2802_v36 = vpack.c.bf16 %v2780_v30, %v2778_v28 }
 0x7b8   : > { %v2671_v37 = vadd.f32 %v2670_v35, %v5663_v5  ;;  %v2672_v38 = vpop.f32.mrb[86].mxu1 }
 0x7b9   : > { %v2749_v11 = vmul.f32 0.2, %v2669_v34  ;;  %v2673_v39 = vadd.f32 %v2672_v38, %v5660_v4  ;;  %v2674_v40 = vpop.f32.mrb[87].mxu1  ;;  %3008 = vmatprep.mubr.bf16.mxu0 %v2802_v36  ;;  %vm2717_vm6 = vcmp.gt.f32.partialorder %v2669_v34, 0.0 }
 0x7ba   : > { %v2750_v41 = vmul.f32 0.2, %v2671_v37  ;;  %v2675_v42 = vadd.f32 %v2674_v40, %v5663_v5  ;;  %3009 = vmatmul.mubr.bf16.gmra.mrb[96].mxu0 %v2801_v33  ;;  %vm2718_vm7 = vcmp.gt.f32.partialorder %v2671_v37, 0.0 }
 0x7bb   : > { %vm2719_vm8 = vcmp.gt.f32.partialorder %v2673_v39, 0.0  ;;  %v2751_v43 = vmul.f32 0.2, %v2673_v39  ;;  %v2781_v45 = vsel %vm2717_vm6, %v2669_v34, %v2749_v11 }
 0x7bc   : > { %vm2720_vm9 = vcmp.gt.f32.partialorder %v2675_v42, 0.0  ;;  %v2752_v44 = vmul.f32 0.2, %v2675_v42  ;;  %v2782_v50 = vsel %vm2718_vm7, %v2671_v37, %v2750_v41 }
 0x7bd   : > { %v2783_v46 = vsel %vm2719_vm8, %v2673_v39, %v2751_v43 }
 0x7be   : > { %v2678_v47 = vpop.f32.mrb[88].mxu1  ;;  %v2784_v54 = vsel %vm2720_vm9, %v2675_v42, %v2752_v44  ;;  %v2803_v31 = vpack.c.bf16 %v2783_v46, %v2781_v45 }
 0x7bf   : > { %v2679_v29 = vadd.f32 %v2678_v47, %v5660_v4  ;;  %v2680_v55 = vpop.f32.mrb[89].mxu1  ;;  %v2804_v56 = vpack.c.bf16 %v2784_v54, %v2782_v50 }
 0x7c0   : > { %v2681_v57 = vadd.f32 %v2680_v55, %v5663_v5  ;;  %v2682_v32 = vpop.f32.mrb[90].mxu1 }
 0x7c1   : > { %v2753_v58 = vmul.f32 0.2, %v2679_v29  ;;  %v2683_v59 = vadd.f32 %v2682_v32, %v5660_v4  ;;  %v2684_v60 = vpop.f32.mrb[91].mxu1  ;;  %3016 = vmatprep.mubr.bf16.mxu0 %v2804_v56  ;;  %vm2721_vm10 = vcmp.gt.f32.partialorder %v2679_v29, 0.0 }
 0x7c2   : > { %v2754_v61 = vmul.f32 0.2, %v2681_v57  ;;  %v2685_v62 = vadd.f32 %v2684_v60, %v5663_v5  ;;  %3017 = vmatmul.mubr.bf16.gmra.mrb[100].mxu0 %v2803_v31  ;;  %vm2722_vm11 = vcmp.gt.f32.partialorder %v2681_v57, 0.0 }
 0x7c3   : > { %vm2723_vm12 = vcmp.gt.f32.partialorder %v2683_v59, 0.0  ;;  %v2755_v63 = vmul.f32 0.2, %v2683_v59  ;;  %v2785_v1 = vsel %vm2721_vm10, %v2679_v29, %v2753_v58 }
 0x7c4   : > { %vm2724_vm13 = vcmp.gt.f32.partialorder %v2685_v62, 0.0  ;;  %v2756_v48 = vmul.f32 0.2, %v2685_v62  ;;  %v2786_v6 = vsel %vm2722_vm11, %v2681_v57, %v2754_v61 }
 0x7c5   : > { %v2787_v2 = vsel %vm2723_vm12, %v2683_v59, %v2755_v63 }
 0x7c6   : > { %v2805_v3 = vpack.c.bf16 %v2787_v2, %v2785_v1  ;;  %v2688_v0 = vpop.f32.mrb[92].mxu1  ;;  %v2788_v7 = vsel %vm2724_vm13, %v2685_v62, %v2756_v48 }
 0x7c7   : > { %v2689_v8 = vadd.f32 %v2688_v0, %v5660_v4  ;;  %v2690_v9 = vpop.f32.mrb[93].mxu1  ;;  %v2806_v10 = vpack.c.bf16 %v2788_v7, %v2786_v6 }
 0x7c8   : > { %v2691_v12 = vadd.f32 %v2690_v9, %v5663_v5  ;;  %v2692_v13 = vpop.f32.mrb[94].mxu1 }
 0x7c9   : > { %v2757_v14 = vmul.f32 0.2, %v2689_v8  ;;  %v2693_v15 = vadd.f32 %v2692_v13, %v5660_v4  ;;  %v2694_v16 = vpop.f32.mrb[95].mxu1  ;;  %3024 = vmatprep.mubr.bf16.mxu1 %v2806_v10  ;;  %vm2725_vm14 = vcmp.gt.f32.partialorder %v2689_v8, 0.0 }
 0x7ca   : > { %v2758_v49 = vmul.f32 0.2, %v2691_v12  ;;  %v2695_v51 = vadd.f32 %v2694_v16, %v5663_v5  ;;  %3025 = vmatmul.mubr.bf16.vlgmr.msra.gmra.mrb[96].mxu1 %v2805_v3  ;;  %vm2726_vm15 = vcmp.gt.f32.partialorder %v2691_v12, 0.0 }
 0x7cb   : > { %vm2727_vm0 = vcmp.gt.f32.partialorder %v2693_v15, 0.0  ;;  %v2759_v52 = vmul.f32 0.2, %v2693_v15  ;;  %v2789_v26 = vsel %vm2725_vm14, %v2689_v8, %v2757_v14 }
 0x7cc   : > { %vm2728_vm1 = vcmp.gt.f32.partialorder %v2695_v51, 0.0  ;;  %v2760_v53 = vmul.f32 0.2, %v2695_v51  ;;  %v2790_v18 = vsel %vm2726_vm15, %v2691_v12, %v2758_v49 }
 0x7cd   : > { %v2791_v17 = vsel %vm2727_vm0, %v2693_v15, %v2759_v52 }
 0x7ce   : > { %v2792_v4 = vsel %vm2728_vm1, %v2695_v51, %v2760_v53  ;;  %v2807_v19 = vpack.c.bf16 %v2791_v17, %v2789_v26 }
 0x7cf   : > { %v2808_v20 = vpack.c.bf16 %v2792_v4, %v2790_v18 }
 0x7d1   : > { %3032 = vmatprep.mubr.bf16.mxu1 %v2808_v20 }
 0x7d2   : > { %3033 = vmatmul.mubr.bf16.gmra.mrb[100].mxu1 %v2807_v19 }
 0x7d3   : > { %4626 = shalt.err (!%p4623_p11)
}
 0x7d4   : > { %s4627_s5 = scalar_lea.hbm %s5705_s15, 2048  ;;  %s4631_s24 = scalar_lea.hbm %s6006_s10, 4096 }
 0x7d5   : > { %p4628_p3 = scmp.ne.s32.totalorder %s5705_s15, %s4627_s5  ;;  %p4632_p6 = scmp.lt.u32.totalorder %s5705_s15, %s6006_s10 }
 0x7d6   : > { %p4633_p9 = scmp.lt.u32.totalorder %s4631_s24, %s4627_s5  ;;  %p4635_p1 = scmp.lt.u32.totalorder %s4627_s5, %s5705_s15 }
 0x7d7   : > { %p4629_p5 = pnand %p4628_p3, %p6008_p13 }
 0x7d8   : > { %p4634_p12 = por %p4633_p9, %p4632_p6 }
 0x7d9   : > { %p4630_p7 = pneg %p4629_p5 }
 0x7da   : > { %p4636_p0 = por %p4635_p1, %p4634_p12 }
 0x7dc   : > { %p4637_p2 = pnand %p4636_p0, %p4630_p7 }
 0x7de   : > { %4640 = shalt.err (!%p4637_p2)
}
 0x7df   : > { %s4804_s8 = smov 128   ;;  %s4805_s1 = smov 8  }
 0x7e0   : > { %4029 = dma.vmem_to_hbm [thread:$0]  (%p6008_p13), %s5714_s13, 2048, %s5705_s15, %s5716_s29, %s4804_s8, %s4804_s8, %s4805_s1  }
 0x7e1   : > { %s6009_s20 = sld [smem:[#allocation49_spill]]  ;;  %s3230_s24 = sshll.u32 %s5464_s18, 4  ;;  %s5750_s24 = int_to_ptr.vmem [resolvable:$true] %s3230_s24 }
 0x7e2   : > { %s3202_s10 = scalar_lea.sflag [#allocation4], %s5231_s3  ;;  %s4641_s16 = scalar_lea.vmem %s5750_s24, 2048 }
 0x7e3   : > { %p4642_p8 = scmp.ne.s32.totalorder %s5750_s24, %s4641_s16  ;;  %s4806_s22 = smov [#allocation17]  }
 0x7e4   : > { %s4645_s15 = sshll.u32 %s4806_s22, 4  ;;  %s4646_s15 = int_to_ptr.vmem [resolvable:$false] %s4645_s15 }
 0x7e5   : > { %p4643_p4 = pnand %p4642_p8, %p6008_p13  ;;  %s4647_s13 = scalar_lea.vmem %s4646_s15, 4096 }
 0x7e6   : > { %p4648_p11 = scmp.lt.s32.totalorder %s5750_s24, %s4646_s15  ;;  %p4649_p3 = scmp.lt.s32.totalorder %s4647_s13, %s4641_s16 }
 0x7e7   : > { %s5747_s11 = scalar_lea.hbm %s6009_s20, %s5699_s17  ;;  %p4644_p10 = pneg %p4643_p4 }
 0x7e8   : > { %p4650_p5 = por %p4649_p3, %p4648_p11 }
 0x7ea   : > { %p4651_p7 = pnand %p4650_p5, %p4644_p10 }
 0x7ec   : > { %4654 = shalt.err (!%p4651_p7)
}
 0x7ed   : > { %s4655_s18 = scalar_lea.hbm %s5747_s11, 2048  ;;  %s4659_s22 = scalar_lea.hbm %s6009_s20, 4096 }
 0x7ee   : > { %p4656_p6 = scmp.ne.s32.totalorder %s5747_s11, %s4655_s18  ;;  %p4660_p1 = scmp.lt.u32.totalorder %s5747_s11, %s6009_s20 }
 0x7ef   : > { %p4661_p0 = scmp.lt.u32.totalorder %s4659_s22, %s4655_s18  ;;  %p4663_p8 = scmp.lt.u32.totalorder %s4655_s18, %s5747_s11 }
 0x7f0   : > { %p4657_p9 = pnand %p4656_p6, %p6008_p13 }
 0x7f1   : > { %p4662_p2 = por %p4661_p0, %p4660_p1 }
 0x7f2   : > { %p4658_p12 = pneg %p4657_p9 }
 0x7f3   : > { %p4664_p4 = por %p4663_p8, %p4662_p2 }
 0x7f5   : > { %p4665_p10 = pnand %p4664_p4, %p4658_p12 }
 0x7f7   : > { %4668 = shalt.err (!%p4665_p10)
}
 0x7f8   : > { %4028 = dma.vmem_to_hbm [thread:$0]  (%p6008_p13), %s5750_s24, 2048, %s5747_s11, %s3202_s10, %s4804_s8, %s4804_s8, %s4805_s1  }
 0x7f9   : > { %s6010_s16 = sshll.u32 %s5499_s19, 4  ;;  %s4807_s13 = smov [#allocation20]   ;;  %s5782_s16 = int_to_ptr.vmem [resolvable:$true] %s6010_s16 }
 0x7fa   : > { %s4669_s0 = scalar_lea.vmem %s5782_s16, 2048  ;;  %s4673_s18 = sshll.u32 %s4807_s13, 4  ;;  %s4674_s18 = int_to_ptr.vmem [resolvable:$false] %s4673_s18 }
 0x7fb   : > { %p4670_p11 = scmp.ne.s32.totalorder %s5782_s16, %s4669_s0  ;;  %s4675_s12 = scalar_lea.vmem %s4674_s18, 4096 }
 0x7fc   : > { %p4676_p7 = scmp.lt.s32.totalorder %s5782_s16, %s4674_s18  ;;  %p4677_p6 = scmp.lt.s32.totalorder %s4675_s12, %s4669_s0 }
 0x7fd   : > { %p4671_p3 = pnand %p4670_p11, %p6008_p13 }
 0x7fe   : > { %p4678_p9 = por %p4677_p6, %p4676_p7 }
 0x7ff   : > { %p4672_p5 = pneg %p4671_p3 }
 0x801   : > { %p4679_p12 = pnand %p4678_p9, %p4672_p5 }
 0x803   : > { %4682 = shalt.err (!%p4679_p12)
}
 0x804   : > { %s4683_s19 = scalar_lea.hbm %s5712_s7, 2048  ;;  %s4687_s24 = scalar_lea.hbm %s6007_s6, 4096 }
 0x805   : > { %p4684_p1 = scmp.ne.s32.totalorder %s5712_s7, %s4683_s19  ;;  %p4688_p8 = scmp.lt.u32.totalorder %s5712_s7, %s6007_s6 }
 0x806   : > { %p4689_p4 = scmp.lt.u32.totalorder %s4687_s24, %s4683_s19  ;;  %p4691_p11 = scmp.lt.u32.totalorder %s4683_s19, %s5712_s7 }
 0x807   : > { %p4685_p0 = pnand %p4684_p1, %p6008_p13 }
 0x808   : > { %p4690_p10 = por %p4689_p4, %p4688_p8 }
 0x809   : > { %p4686_p2 = pneg %p4685_p0 }
 0x80a   : > { %p4692_p3 = por %p4691_p11, %p4690_p10 }
 0x80c   : > { %p4693_p5 = pnand %p4692_p3, %p4686_p2 }
 0x80e   : > { %4696 = shalt.err (!%p4693_p5)
}
 0x80f   : > { %4030 = dma.vmem_to_hbm [thread:$0]  (%p6008_p13), %s5782_s16, 2048, %s5712_s7, %s5716_s29, %s4804_s8, %s4804_s8, %s4805_s1  }
 0x810   : > { %s6011_s13 = sld [smem:[#allocation48_spill]]  ;;  %s5823_s7 = scalar_lea.vmem [#allocation21], %s5234_s23 }
 0x811   : > { %s3278_s23 = sshll.u32 %s5823_s7, 4  ;;  %s6012_s18 = sld [smem:[#allocation52_spill]]  ;;  %s5855_s23 = int_to_ptr.vmem [resolvable:$true] %s3278_s23 }
 0x812   : > { %s3217_s19 = scalar_lea.sflag [#allocation22], %s5231_s3  ;;  %s4697_s10 = scalar_lea.vmem %s5855_s23, 2048 }
 0x813   : > { %p4698_p7 = scmp.ne.s32.totalorder %s5855_s23, %s4697_s10  ;;  %s4808_s11 = smov [#allocation21]  }
 0x814   : > { %s4701_s24 = sshll.u32 %s4808_s11, 4  ;;  %s4702_s24 = int_to_ptr.vmem [resolvable:$false] %s4701_s24 }
 0x815   : > { %p4699_p6 = pnand %p4698_p7, %p6008_p13  ;;  %s4703_s5 = scalar_lea.vmem %s4702_s24, 4096 }
 0x816   : > { %v5812_v21 = vld [vmem:[%s6011_s13] ss:$0 sm:$0xff]  ;;  %p4704_p12 = scmp.lt.s32.totalorder %s5855_s23, %s4702_s24  ;;  %p4705_p1 = scmp.lt.s32.totalorder %s4703_s5, %s4697_s10 }
 0x817   : > { %s5853_s12 = scalar_lea.hbm %s6012_s18, %s5699_s17  ;;  %p4700_p9 = pneg %p4699_p6 }
 0x818   : > { %p4706_p0 = por %p4705_p1, %p4704_p12 }
 0x81a   : > { %p4707_p2 = pnand %p4706_p0, %p4700_p9 }
 0x86d   : > { %v3842_v5 = vpop.f32.mrb[80].mxu0 }
 0x86e   : > { %v3843_v22 = vpop.f32.mrb[81].mxu0 }
 0x86f   : > { %v3844_v23 = vadd.f32 %v3843_v22, %v3842_v5  ;;  %v3845_v24 = vpop.f32.mrb[82].mxu0 }
 0x870   : > { %v3846_v25 = vpop.f32.mrb[83].mxu0 }
 0x871   : > { %v2979_v27 = vadd.f32 %v3844_v23, %v5812_v21  ;;  %v3847_v28 = vadd.f32 %v3846_v25, %v3845_v24 }
 0x873   : > { %v3683_v30 = vmul.f32 -1.442695, %v2979_v27  ;;  %v2982_v33 = vadd.f32 %v3847_v28, %v5812_v21 }
 0x875   : > { %4295 = vpow2.f32 %v3683_v30  ;;  %v3684_v34 = vmul.f32 -1.442695, %v2982_v33  ;;  %v3848_v35 = vpop.f32.mrb[84].mxu0 }
 0x876   : > { %v3849_v36 = vpop.f32.mrb[85].mxu0 }
 0x877   : > { %4297 = vpow2.f32 %v3684_v34  ;;  %v3850_v37 = vadd.f32 %v3849_v36, %v3848_v35  ;;  %v3851_v38 = vpop.f32.mrb[86].mxu0 }
 0x878   : > { %v3852_v11 = vpop.f32.mrb[87].mxu0 }
 0x879   : > { %v2987_v39 = vadd.f32 %v3850_v37, %v5812_v21  ;;  %v3853_v40 = vadd.f32 %v3852_v11, %v3851_v38 }
 0x87b   : > { %v3685_v41 = vmul.f32 -1.442695, %v2987_v39  ;;  %v2990_v42 = vadd.f32 %v3853_v40, %v5812_v21 }
 0x87d   : > { %4299 = vpow2.f32 %v3685_v41  ;;  %v3686_v43 = vmul.f32 -1.442695, %v2990_v42  ;;  %v3854_v44 = vpop.f32.mrb[88].mxu0 }
 0x87e   : > { %v3855_v45 = vpop.f32.mrb[89].mxu0 }
 0x87f   : > { %v4296_v46 = vpop.eup %4295  ;;  %4301 = vpow2.f32 %v3686_v43  ;;  %v3856_v47 = vadd.f32 %v3855_v45, %v3854_v44  ;;  %v3857_v50 = vpop.f32.mrb[90].mxu0 }
 0x880   : > { %v3089_v54 = vadd.f32 1.0, %v4296_v46  ;;  %v3858_v31 = vpop.f32.mrb[91].mxu0 }
 0x881   : > { %v4298_v29 = vpop.eup %4297  ;;  %v2995_v55 = vadd.f32 %v3856_v47, %v5812_v21  ;;  %v3859_v56 = vadd.f32 %v3858_v31, %v3857_v50 }
 0x882   : > { %4303 = vrcp.f32 %v3089_v54  ;;  %v3090_v57 = vadd.f32 1.0, %v4298_v29 }
 0x883   : > { %v3687_v32 = vmul.f32 -1.442695, %v2995_v55  ;;  %v2998_v58 = vadd.f32 %v3859_v56, %v5812_v21 }
 0x884   : > { %4305 = vrcp.f32 %v3090_v57 }
 0x885   : > { %4307 = vpow2.f32 %v3687_v32  ;;  %v3688_v59 = vmul.f32 -1.442695, %v2998_v58  ;;  %v3860_v60 = vpop.f32.mrb[92].mxu0 }
 0x886   : > { %v3861_v61 = vpop.f32.mrb[93].mxu0 }
 0x887   : > { %v4300_v62 = vpop.eup %4299  ;;  %4309 = vpow2.f32 %v3688_v59  ;;  %v3862_v63 = vadd.f32 %v3861_v61, %v3860_v60  ;;  %v3863_v48 = vpop.f32.mrb[94].mxu0 }
 0x888   : > { %v3091_v1 = vadd.f32 1.0, %v4300_v62  ;;  %v3864_v2 = vpop.f32.mrb[95].mxu0 }
 0x889   : > { %v4302_v3 = vpop.eup %4301  ;;  %v3003_v0 = vadd.f32 %v3862_v63, %v5812_v21  ;;  %v3865_v6 = vadd.f32 %v3864_v2, %v3863_v48 }
 0x88a   : > { %4311 = vrcp.f32 %v3091_v1  ;;  %v3092_v7 = vadd.f32 1.0, %v4302_v3 }
 0x88b   : > { %v3689_v8 = vmul.f32 -1.442695, %v3003_v0  ;;  %v3006_v9 = vadd.f32 %v3865_v6, %v5812_v21 }
 0x88c   : > { %v4304_v10 = vpop.eup %4303  ;;  %4313 = vrcp.f32 %v3092_v7 }
 0x88d   : > { %3185 = vst [vmem:[%s5823_s7] sm:$0xff] %v4304_v10  ;;  %4315 = vpow2.f32 %v3689_v8  ;;  %v3690_v12 = vmul.f32 -1.442695, %v3006_v9  ;;  %v3866_v13 = vpop.f32.mrb[96].mxu0 }
 0x88e   : > { %v4306_v14 = vpop.eup %4305  ;;  %v3867_v15 = vpop.f32.mrb[97].mxu0 }
 0x88f   : > { %v4308_v16 = vpop.eup %4307  ;;  %3186 = vst [vmem:[%s5823_s7 + $0x8] sm:$0xff] %v4306_v14  ;;  %4317 = vpow2.f32 %v3690_v12  ;;  %v3868_v49 = vadd.f32 %v3867_v15, %v3866_v13  ;;  %v3869_v51 = vpop.f32.mrb[98].mxu0 }
 0x890   : > { %v3093_v52 = vadd.f32 1.0, %v4308_v16  ;;  %v3870_v53 = vpop.f32.mrb[99].mxu0 }
 0x891   : > { %v4310_v26 = vpop.eup %4309  ;;  %v3011_v17 = vadd.f32 %v3868_v49, %v5812_v21  ;;  %v3871_v18 = vadd.f32 %v3870_v53, %v3869_v51 }
 0x892   : > { %4319 = vrcp.f32 %v3093_v52  ;;  %v3094_v4 = vadd.f32 1.0, %v4310_v26 }
 0x893   : > { %v3691_v19 = vmul.f32 -1.442695, %v3011_v17  ;;  %v3014_v20 = vadd.f32 %v3871_v18, %v5812_v21 }
 0x894   : > { %v4312_v5 = vpop.eup %4311  ;;  %4321 = vrcp.f32 %v3094_v4 }
 0x895   : > { %3187 = vst [vmem:[%s5823_s7 + $0x10] sm:$0xff] %v4312_v5  ;;  %4323 = vpow2.f32 %v3691_v19  ;;  %v3692_v22 = vmul.f32 -1.442695, %v3014_v20  ;;  %v3872_v23 = vpop.f32.mrb[100].mxu0 }
 0x896   : > { %v4314_v24 = vpop.eup %4313  ;;  %v3873_v25 = vpop.f32.mrb[101].mxu0 }
 0x897   : > { %v4316_v27 = vpop.eup %4315  ;;  %3188 = vst [vmem:[%s5823_s7 + $0x18] sm:$0xff] %v4314_v24  ;;  %4325 = vpow2.f32 %v3692_v22  ;;  %v3874_v28 = vadd.f32 %v3873_v25, %v3872_v23  ;;  %v3875_v30 = vpop.f32.mrb[102].mxu0 }
 0x898   : > { %v3095_v33 = vadd.f32 1.0, %v4316_v27  ;;  %v3876_v34 = vpop.f32.mrb[103].mxu0 }
 0x899   : > { %v4318_v35 = vpop.eup %4317  ;;  %v3019_v36 = vadd.f32 %v3874_v28, %v5812_v21  ;;  %v3877_v37 = vadd.f32 %v3876_v34, %v3875_v30 }
 0x89a   : > { %4327 = vrcp.f32 %v3095_v33  ;;  %v3096_v38 = vadd.f32 1.0, %v4318_v35 }
 0x89b   : > { %v3693_v11 = vmul.f32 -1.442695, %v3019_v36  ;;  %v3022_v39 = vadd.f32 %v3877_v37, %v5812_v21 }
 0x89c   : > { %v4320_v40 = vpop.eup %4319  ;;  %4329 = vrcp.f32 %v3096_v38 }
 0x89d   : > { %3189 = vst [vmem:[%s5823_s7 + $0x20] sm:$0xff] %v4320_v40  ;;  %4331 = vpow2.f32 %v3693_v11  ;;  %v3694_v41 = vmul.f32 -1.442695, %v3022_v39  ;;  %v3878_v42 = vpop.f32.mrb[96].mxu1 }
 0x89e   : > { %v4322_v43 = vpop.eup %4321  ;;  %v3879_v44 = vpop.f32.mrb[97].mxu1 }
 0x89f   : > { %v4324_v45 = vpop.eup %4323  ;;  %3190 = vst [vmem:[%s5823_s7 + $0x28] sm:$0xff] %v4322_v43  ;;  %4333 = vpow2.f32 %v3694_v41  ;;  %v3880_v46 = vadd.f32 %v3879_v44, %v3878_v42  ;;  %v3881_v47 = vpop.f32.mrb[98].mxu1 }
 0x8a0   : > { %v3097_v50 = vadd.f32 1.0, %v4324_v45  ;;  %v3882_v54 = vpop.f32.mrb[99].mxu1 }
 0x8a1   : > { %v4326_v31 = vpop.eup %4325  ;;  %v3027_v29 = vadd.f32 %v3880_v46, %v5812_v21  ;;  %v3883_v55 = vadd.f32 %v3882_v54, %v3881_v47 }
 0x8a2   : > { %4335 = vrcp.f32 %v3097_v50  ;;  %v3098_v56 = vadd.f32 1.0, %v4326_v31 }
 0x8a3   : > { %v3695_v57 = vmul.f32 -1.442695, %v3027_v29  ;;  %v3030_v32 = vadd.f32 %v3883_v55, %v5812_v21 }
 0x8a4   : > { %v4328_v58 = vpop.eup %4327  ;;  %4337 = vrcp.f32 %v3098_v56 }
 0x8a5   : > { %3191 = vst [vmem:[%s5823_s7 + $0x30] sm:$0xff] %v4328_v58  ;;  %4339 = vpow2.f32 %v3695_v57  ;;  %v3696_v59 = vmul.f32 -1.442695, %v3030_v32  ;;  %v3884_v60 = vpop.f32.mrb[100].mxu1 }
 0x8a6   : > { %v4330_v61 = vpop.eup %4329  ;;  %v3885_v62 = vpop.f32.mrb[101].mxu1 }
 0x8a7   : > { %v4332_v63 = vpop.eup %4331  ;;  %3192 = vst [vmem:[%s5823_s7 + $0x38] sm:$0xff] %v4330_v61  ;;  %4341 = vpow2.f32 %v3696_v59  ;;  %v3886_v48 = vadd.f32 %v3885_v62, %v3884_v60  ;;  %v3887_v1 = vpop.f32.mrb[102].mxu1 }
 0x8a8   : > { %v3099_v2 = vadd.f32 1.0, %v4332_v63  ;;  %v3888_v3 = vpop.f32.mrb[103].mxu1 }
 0x8a9   : > { %v4334_v0 = vpop.eup %4333  ;;  %v3035_v6 = vadd.f32 %v3886_v48, %v5812_v21  ;;  %v3889_v7 = vadd.f32 %v3888_v3, %v3887_v1 }
 0x8aa   : > { %4343 = vrcp.f32 %v3099_v2  ;;  %v3100_v8 = vadd.f32 1.0, %v4334_v0 }
 0x8ab   : > { %v3697_v9 = vmul.f32 -1.442695, %v3035_v6  ;;  %v3038_v10 = vadd.f32 %v3889_v7, %v5812_v21 }
 0x8ac   : > { %v4336_v12 = vpop.eup %4335  ;;  %4345 = vrcp.f32 %v3100_v8 }
 0x8ad   : > { %3193 = vst [vmem:[%s5823_s7 + $0x40] sm:$0xff] %v4336_v12  ;;  %4347 = vpow2.f32 %v3697_v9  ;;  %v3698_v13 = vmul.f32 -1.442695, %v3038_v10 }
 0x8ae   : > { %v4338_v14 = vpop.eup %4337 }
 0x8af   : > { %v4340_v15 = vpop.eup %4339  ;;  %3194 = vst [vmem:[%s5823_s7 + $0x48] sm:$0xff] %v4338_v14  ;;  %4349 = vpow2.f32 %v3698_v13 }
 0x8b0   : > { %v3101_v16 = vadd.f32 1.0, %v4340_v15 }
 0x8b1   : > { %v4342_v49 = vpop.eup %4341 }
 0x8b2   : > { %4351 = vrcp.f32 %v3101_v16  ;;  %v3102_v51 = vadd.f32 1.0, %v4342_v49 }
 0x8b4   : > { %v4344_v52 = vpop.eup %4343  ;;  %4353 = vrcp.f32 %v3102_v51 }
 0x8b5   : > { %3195 = vst [vmem:[%s5823_s7 + $0x50] sm:$0xff] %v4344_v52 }
 0x8b6   : > { %v4346_v21 = vpop.eup %4345 }
 0x8b7   : > { %v4348_v53 = vpop.eup %4347  ;;  %3196 = vst [vmem:[%s5823_s7 + $0x58] sm:$0xff] %v4346_v21 }
 0x8b8   : > { %v3103_v26 = vadd.f32 1.0, %v4348_v53 }
 0x8b9   : > { %v4350_v17 = vpop.eup %4349 }
 0x8ba   : > { %4355 = vrcp.f32 %v3103_v26  ;;  %v3104_v18 = vadd.f32 1.0, %v4350_v17 }
 0x8bc   : > { %v4352_v4 = vpop.eup %4351  ;;  %4357 = vrcp.f32 %v3104_v18 }
 0x8bd   : > { %3197 = vst [vmem:[%s5823_s7 + $0x60] sm:$0xff] %v4352_v4 }
 0x8be   : > { %v4354_v19 = vpop.eup %4353 }
 0x8bf   : > { %3198 = vst [vmem:[%s5823_s7 + $0x68] sm:$0xff] %v4354_v19 }
 0x8c4   : > { %v4356_v20 = vpop.eup %4355 }
 0x8c5   : > { %3199 = vst [vmem:[%s5823_s7 + $0x70] sm:$0xff] %v4356_v20 }
 0x8c6   : > { %v4358_v5 = vpop.eup %4357 }
 0x8c7   : > { %3200 = vst [vmem:[%s5823_s7 + $0x78] sm:$0xff] %v4358_v5 }
 0x8c8   : > { %4710 = shalt.err (!%p4707_p2)
}
 0x8c9   : > { %s4711_s17 = scalar_lea.hbm %s5853_s12, 2048  ;;  %s4715_s0 = scalar_lea.hbm %s6012_s18, 4096 }
 0x8ca   : > { %p4712_p8 = scmp.ne.s32.totalorder %s5853_s12, %s4711_s17  ;;  %p4716_p11 = scmp.lt.u32.totalorder %s5853_s12, %s6012_s18 }
 0x8cb   : > { %p4717_p3 = scmp.lt.u32.totalorder %s4715_s0, %s4711_s17  ;;  %p4719_p7 = scmp.lt.u32.totalorder %s4711_s17, %s5853_s12 }
 0x8cc   : > { %p4713_p4 = pnand %p4712_p8, %p6008_p13 }
 0x8cd   : > { %p4718_p5 = por %p4717_p3, %p4716_p11 }
 0x8ce   : > { %p4714_p10 = pneg %p4713_p4 }
 0x8cf   : > { %p4720_p6 = por %p4719_p7, %p4718_p5 }
 0x8d1   : > { %p4721_p9 = pnand %p4720_p6, %p4714_p10 }
 0x8d3   : > { %4724 = shalt.err (!%p4721_p9)
}
 0x8d4   : > { %4031 = dma.vmem_to_hbm [thread:$0]  (%p6008_p13), %s5855_s23, 2048, %s5853_s12, %s3217_s19, %s4804_s8, %s4804_s8, %s4805_s1  }
 0x8d5 PF: > { %s3293_s29 = sand.u32 1, %s4775_s2   ;;  %p6013_p12 = scmp.ne.s32.totalorder %s5985_s14, 0 }
 0x8d6   : > { %p6014_p1 = scmp.ge.s32.totalorder %s4787_s27, 2  ;;  %s3294_s16 = scalar_lea.sflag [#allocation4], %s3293_s29 }
 0x8d8   : > { %p4066_p0 = pnand %p6014_p1, %p6013_p12 }
 0x8da   : > { %4762 = dma.done.wait (!%p4066_p0), %s3294_s16, 2048  }
 0x8db   : > { %4764 = vsyncadd (!%p4066_p0), %s3294_s16, 4294965248  ;;  %s6015_s9 = sadd.s32 4294967294, %s4787_s27  }
 0x8dc   : > { %s3302_s10 = sand.u32 1, %s6015_s9  }
 0x8dd   : > { %s3303_s11 = scalar_lea.sflag [#allocation19], %s3302_s10 }
 0x8de   : > { %4766 = dma.done.wait (!%p4066_p0), %s3303_s11, 4096  }
 0x8df   : > { %4768 = vsyncadd (!%p4066_p0), %s3303_s11, 4294963200  ;;  %s3321_s3 = scalar_lea.sflag [#allocation22], %s3293_s29 }
 0x8e0   : > { %4770 = dma.done.wait (!%p4066_p0), %s3321_s3, 2048  }
 0x8e1   : > { %4772 = vsyncadd (!%p4066_p0), %s3321_s3, 4294965248  ;;  %p45_p13 = scmp.ge.s32.totalorder %s5147_s4, 4   ;;  %s6016_s2 = smov %s4779_s25 }
 0x8e2   : > { %s6017_s25 = smov %s4783_s26  ;;  %s6018_s26 = smov %s5158_s21 }
 0x8e3   : > { %s6019_s27 = smov %s5147_s4  ;;  %47 = sbr.rel (!%p45_p13) target bundleno = 36 (0x24), region = 221 }
 0x8ea   :  { %3326 = vsyncpa [#allocation3], 1 }
 0x8eb   :  { %3328 = vsyncpa [#allocation3 + $0x1], 1 }
 0x8ec   :  { %3329 = vsyncpa [#allocation6], 1 }
 0x8ed   :  { %3330 = vsyncpa [#allocation9], 1 }
 0x8ee   :  { %3331 = vsyncpa [#allocation12], 1 }
 0x8ef   :  { %3332 = vsyncpa [#allocation15], 1 }
 0x8f0   :  { %3333 = vsyncpa [#allocation4], 1 }
 0x8f1   :  { %3335 = vsyncpa [#allocation4 + $0x1], 1 }
 0x8f2   :  { %3336 = vsyncpa [#allocation19], 1 }
 0x8f3   :  { %3338 = vsyncpa [#allocation19 + $0x1], 1 }
 0x8f4   :  { %3339 = vsyncpa [#allocation22], 1 }
 0x8f5   :  { %3341 = vsyncpa [#allocation22 + $0x1], 1 }

</bundles_post_ra>
